<compile_context>
chip_gen: v6e
topology: v6e:2x2x1
jax: 0.10.0
libtpu: 0.0.40
codegen_flags: <defaults>
</compile_context>

<pallas_src>
import numpy as np
import jax
import jax.numpy as jnp
from jax import lax
from jax.experimental import pallas as pl
from jax.experimental.pallas import tpu as pltpu

LEAKY_SLOPE = 0.1
BN_EPS = 1e-5
# MXU operand dtype (f32 accumulation via preferred_element_type everywhere).
MATMUL_DTYPE = jnp.bfloat16


def _mm(a, b):
    """MXU matmul: operands in MATMUL_DTYPE, f32 accumulation."""
    return jnp.dot(a.astype(MATMUL_DTYPE), b.astype(MATMUL_DTYPE),
                   preferred_element_type=jnp.float32)


def _bn_lrelu(y, gamma, beta):
    """Training-mode BatchNorm1d (two-pass batch stats over the B*N rows) + LeakyReLU(0.1)."""
    mu = jnp.mean(y, axis=0, keepdims=True)
    var = jnp.mean((y - mu) ** 2, axis=0, keepdims=True)      # two-pass biased variance (torch BN train)
    y = (y - mu) * lax.rsqrt(var + BN_EPS) * gamma + beta
    return jnp.maximum(y, LEAKY_SLOPE * y)


def spatialnet_kernel(x_ref,
                      w1_ref, b1_ref, g1_ref, t1_ref,
                      w2_ref, b2_ref, g2_ref, t2_ref,
                      w3m_ref, b3m_ref, g3m_ref, t3m_ref,
                      wqkv_ref, bqkv_ref, wo_ref, bo_ref,
                      modw_ref,
                      out_ref):
    BN = x_ref.shape[0]
    cin = x_ref.shape[1]
    B, E = out_ref.shape
    N = BN // B
    nc = w3m_ref.shape[0]

    x = x_ref[...]                                            # (BN, cin), already 2-D
    w1 = w1_ref[...]                                          # (cin, H)

    # ---- early_fusion: Linear(cin -> H).  cin is tiny, so skip the MXU and do cin
    # broadcast-FMAs on the VPU (a K=3 MXU pass is almost pure latency). ----
    if cin <= 8:
        y1 = x[:, 0:1] * w1[0:1, :]
        for k in range(1, cin):
            y1 = y1 + x[:, k:k + 1] * w1[k:k + 1, :]
        y1 = y1 + b1_ref[...]
    else:
        y1 = _mm(x, w1) + b1_ref[...]
    h1 = _bn_lrelu(y1, g1_ref[...], t1_ref[...])              # (BN, H)

    # ---- mlp_1 (+ residual) ----
    h2 = _bn_lrelu(_mm(h1, w2_ref[...]) + b2_ref[...],
                   g2_ref[...], t2_ref[...]) + h1             # (BN, H)

    # ---- mlp_2 + shared-weight q/k/v projection, modality-major ----
    # w3 was re-laid-out wrapper-side to (nc, H, E): each modality is a leading-axis
    # slab, so there is no block-diagonal weight and no lane slicing of activations.
    # 1/sqrt(E) is already folded into the Q columns of wqkv (and its bias).
    mods, qs, ks, vs = [], [], [], []
    for i in range(nc):
        h3_i = _bn_lrelu(_mm(h2, w3m_ref[i]) + b3m_ref[i],
                         g3m_ref[i], t3m_ref[i])              # (BN, E)
        mods.append(h3_i)
        qkv_i = _mm(h3_i, wqkv_ref[...]) + bqkv_ref[...]      # (BN, 3E)
        # contiguous [Q | K | V] lane slabs; 128-aligned whenever E is a multiple of 128.
        qs.append(qkv_i[:, :E].reshape(B, N, E).astype(MATMUL_DTYPE))
        ks.append(qkv_i[:, E:2 * E].reshape(B, N, E).astype(MATMUL_DTYPE))
        vs.append(qkv_i[:, 2 * E:].reshape(B, N, E).astype(MATMUL_DTYPE))

    # ---- cross-modal attention ----
    # TODO(synk): MultiModalModel source was not provided; implemented as the canonical
    # cross-modal block: shared single-head attention, query = modality i, keys/values =
    # all modalities (joint softmax over the nc*N key set), out_proj + residual.
    acc_attn = jnp.zeros((B, N, E), jnp.float32)   # sum_i w_i * softmax(q_i K^T) V
    acc_mod = jnp.zeros((BN, E), jnp.float32)      # sum_i w_i * modality_i (residual path)
    wsum = jnp.float32(0.0)
    for i in range(nc):
        w_i = modw_ref[0, i]                                  # scalar read from SMEM
        # per key-modality score blocks (B, N, N); joint softmax computed block-wise.
        s_blk = [jnp.einsum('bqe,bke->bqk', qs[i], ks[m],
                            preferred_element_type=jnp.float32) for m in range(nc)]
        smax = s_blk[0].max(axis=-1, keepdims=True)
        for m in range(1, nc):
            smax = jnp.maximum(smax, s_blk[m].max(axis=-1, keepdims=True))
        p_blk = [jnp.exp(s - smax) for s in s_blk]
        l = p_blk[0].sum(axis=-1, keepdims=True)
        for m in range(1, nc):
            l = l + p_blk[m].sum(axis=-1, keepdims=True)
        o = jnp.einsum('bqk,bke->bqe', p_blk[0].astype(MATMUL_DTYPE), vs[0],
                       preferred_element_type=jnp.float32)
        for m in range(1, nc):
            o = o + jnp.einsum('bqk,bke->bqe', p_blk[m].astype(MATMUL_DTYPE), vs[m],
                               preferred_element_type=jnp.float32)
        o = o / l                                             # exact normalization; l is only (B,N,1)
        acc_attn = acc_attn + o * w_i
        acc_mod = acc_mod + mods[i] * w_i
        wsum = wsum + w_i

    # ---- fused out-projection + modality weighting + mean over N (exact linear identities):
    #   mean_N(sum_i w_i*(O_i@Wo + bo + M_i))
    #     == mean_N(sum_i w_i O_i) @ Wo + (sum_i w_i)*bo + mean_N(sum_i w_i M_i)
    # kept in f32: one tiny (B,E)x(E,E) matmul. ----
    attn_mean = jnp.mean(acc_attn, axis=1)                    # (B, E)
    mod_mean = jnp.mean(acc_mod.reshape(B, N, E), axis=1)     # (B, E)
    out_ref[...] = (jnp.dot(attn_mean, wo_ref[...], preferred_element_type=jnp.float32)
                    + wsum * bo_ref[...] + mod_mean)


def spatialnet_forward(inputs, params, out_ch):
    """JAX glue: flattens modalities to (B*N, C), does the (free) weight-side layout work
    (modality-major mlp_2 params, scale folded into qkv), and launches one Pallas call."""
    num_chd = len(inputs)
    B, N, in_ch = inputs[0].shape
    E = out_ch
    H = params['w1'].shape[1]
    cin = in_ch * num_chd
    BN = B * N

    # torch: cat([x.unsqueeze(-1)]) -> (B, N, in_ch, num_chd); flattened to the Linear's
    # (in_ch*num_chd) feature dim, with the (B, N) axes merged here in the wrapper.
    combined = jnp.concatenate([x[..., None] for x in inputs], axis=-1)
    combined = combined.reshape(BN, cin).astype(jnp.float32)

    # Weight-side layout plumbing (free): modality-major mlp_2 parameters, and 1/sqrt(E)
    # folded into the Q columns of the *shared* (E, 3E) qkv weight + bias.
    w3m = params['w3'].reshape(H, num_chd, E).transpose(1, 0, 2)        # (nc, H, E)
    b3m = params['b3'].reshape(num_chd, 1, E)
    g3m = params['g3'].reshape(num_chd, 1, E)
    t3m = params['t3'].reshape(num_chd, 1, E)
    col_scale = jnp.ones((1, 3 * E), jnp.float32).at[:, :E].set(1.0 / float(E) ** 0.5)
    wqkv_s = params['wqkv'] * col_scale
    bqkv_s = params['bqkv'] * col_scale

    args = (combined,
            params['w1'], params['b1'], params['g1'], params['t1'],
            params['w2'], params['b2'], params['g2'], params['t2'],
            w3m, b3m, g3m, t3m,
            wqkv_s, bqkv_s, params['wo'], params['bo'],
            params['modw'])

    vmem = pl.BlockSpec(memory_space=pltpu.MemorySpace.VMEM)
    smem = pl.BlockSpec(memory_space=pltpu.MemorySpace.SMEM)
    in_specs = [vmem] * (len(args) - 1) + [smem]              # modality weights (last arg) in SMEM

    # Advisory cost estimate + explicit VMEM budget (default scoped VMEM is 16/32 MiB;
    # keep the budget well under v7x's 64 MiB physical VMEM).
    flops = int(2 * BN * cin * H + 2 * BN * H * H + 2 * BN * H * num_chd * E
                + num_chd * 2 * BN * E * 3 * E
                + 2 * (num_chd * num_chd) * 2 * B * N * N * E
                + 2 * B * E * E)
    transcendentals = int(num_chd * num_chd * B * N * N)
    bytes_accessed = int(4 * (combined.size + sum(int(np.prod(a.shape)) for a in args[1:]) + B * E))

    return pl.pallas_call(
        spatialnet_kernel,
        out_shape=jax.ShapeDtypeStruct((B, E), jnp.float32),
        in_specs=in_specs,
        out_specs=pl.BlockSpec(memory_space=pltpu.MemorySpace.VMEM),
        compiler_params=pltpu.CompilerParams(vmem_limit_bytes=32 * 1024 * 1024),
        cost_estimate=pl.CostEstimate(flops=flops, transcendentals=transcendentals,
                                      bytes_accessed=bytes_accessed),
    )(*args)


def reference_forward(inputs, params, out_ch):
    """Plain-JAX mirror of the PyTorch forward (training-mode two-pass BN, shared-weight
    per-modality qkv, softmax attention over the concatenated key set, per-modality
    out_proj + residual, modality weighting, mean over N).  MXU operands are cast to
    MATMUL_DTYPE at the same boundaries as the kernel (f32 accumulation) so the parity
    check isolates kernel-structure error rather than bf16 operand rounding."""
    num_chd = len(inputs)
    B, N, in_ch = inputs[0].shape
    E = out_ch
    x = jnp.concatenate([a[..., None] for a in inputs], axis=-1)
    x = x.reshape(B * N, in_ch * num_chd).astype(jnp.float32)

    def mlp(h, w, b, g, t, mxu=True):
        if mxu:
            y = _mm(h, w) + b
        else:   # kernel does exact f32 VPU FMAs for this tiny-K layer
            y = jnp.dot(h, w, precision=lax.Precision.HIGHEST) + b
        return _bn_lrelu(y, g, t)

    h1 = mlp(x, params['w1'], params['b1'], params['g1'], params['t1'], mxu=False)
    h2 = mlp(h1, params['w2'], params['b2'], params['g2'], params['t2']) + h1
    h3 = mlp(h2, params['w3'], params['b3'], params['g3'], params['t3'])

    mods = [h3[:, i * E:(i + 1) * E] for i in range(num_chd)]
    scale = 1.0 / float(E) ** 0.5
    qs, ks, vs = [], [], []
    for m in mods:
        qkv = _mm(m, params['wqkv']) + params['bqkv']
        qs.append((qkv[:, :E] * scale).reshape(B, N, E))
        ks.append(qkv[:, E:2 * E].reshape(B, N, E))
        vs.append(qkv[:, 2 * E:].reshape(B, N, E))
    k_all = jnp.concatenate(ks, axis=1)                        # (B, nc*N, E)
    v_all = jnp.concatenate(vs, axis=1)

    acc = jnp.zeros((B, N, E), jnp.float32)
    for i in range(num_chd):
        s = jnp.einsum('bqe,bke->bqk', qs[i].astype(MATMUL_DTYPE), k_all.astype(MATMUL_DTYPE),
                       preferred_element_type=jnp.float32)
        smax = s.max(axis=-1, keepdims=True)
        p = jnp.exp(s - smax)
        l = p.sum(axis=-1, keepdims=True)
        o = jnp.einsum('bqk,bke->bqe', p.astype(MATMUL_DTYPE), v_all.astype(MATMUL_DTYPE),
                       preferred_element_type=jnp.float32) / l
        o = (jnp.dot(o.reshape(B * N, E), params['wo'], precision=lax.Precision.HIGHEST)
             + params['bo']).reshape(B, N, E)
        acc = acc + (o + mods[i].reshape(B, N, E)) * params['modw'][0, i]
    return jnp.mean(acc, axis=1)


def init_params(key, in_ch, hid_ch, out_ch, num_chd=3):
    """Deterministic synthetic parameters (PyTorch-default-style init)."""
    cin = in_ch * num_chd
    ks = jax.random.split(key, 5)

    def lin(k, fan_in, fan_out):
        bound = 1.0 / np.sqrt(fan_in)
        kw, kb = jax.random.split(k)
        w = jax.random.uniform(kw, (fan_in, fan_out), jnp.float32, -bound, bound)
        b = jax.random.uniform(kb, (1, fan_out), jnp.float32, -bound, bound)
        return w, b

    w1, b1 = lin(ks[0], cin, hid_ch)
    w2, b2 = lin(ks[1], hid_ch, hid_ch)
    w3, b3 = lin(ks[2], hid_ch, out_ch * 3)
    wqkv, bqkv = lin(ks[3], out_ch, out_ch * 3)
    wo, bo = lin(ks[4], out_ch, out_ch)
    return dict(
        w1=w1, b1=b1, g1=jnp.ones((1, hid_ch), jnp.float32), t1=jnp.zeros((1, hid_ch), jnp.float32),
        w2=w2, b2=b2, g2=jnp.ones((1, hid_ch), jnp.float32), t2=jnp.zeros((1, hid_ch), jnp.float32),
        w3=w3, b3=b3, g3=jnp.ones((1, out_ch * 3), jnp.float32), t3=jnp.zeros((1, out_ch * 3), jnp.float32),
        wqkv=wqkv, bqkv=bqkv, wo=wo, bo=bo,
        modw=jnp.full((1, num_chd), 1.0 / num_chd, jnp.float32),   # nn.Parameter(ones(num_chd)/num_chd)
    )


if __name__ == "__main__":
    B, N = 2, 16
    in_ch, hid_ch, out_ch, num_chd = 1, 32, 16, 3

    key = jax.random.PRNGKey(0)
    kp, kx = jax.random.split(key)
    params = init_params(kp, in_ch, hid_ch, out_ch, num_chd)
    xs = [jax.random.normal(k, (B, N, in_ch), jnp.float32)
          for k in jax.random.split(kx, num_chd)]

    out = spatialnet_forward(xs, params, out_ch)
    out = jax.block_until_ready(out)

    ref = reference_forward(xs, params, out_ch)
    np.testing.assert_allclose(np.asarray(out), np.asarray(ref), rtol=2e-4, atol=2e-4)
    assert out.shape == (B, out_ch)
    print("KERNEL_OK")
</pallas_src>

<mosaic_0001>
module attributes {stable_mosaic.version = 11 : i64} {
  func.func @spatialnet_kernel(%arg0: memref<32x3xf32, #tpu.memory_space<vmem>>, %arg1: memref<3x32xf32, #tpu.memory_space<vmem>>, %arg2: memref<1x32xf32, #tpu.memory_space<vmem>>, %arg3: memref<1x32xf32, #tpu.memory_space<vmem>>, %arg4: memref<1x32xf32, #tpu.memory_space<vmem>>, %arg5: memref<32x32xf32, #tpu.memory_space<vmem>>, %arg6: memref<1x32xf32, #tpu.memory_space<vmem>>, %arg7: memref<1x32xf32, #tpu.memory_space<vmem>>, %arg8: memref<1x32xf32, #tpu.memory_space<vmem>>, %arg9: memref<3x32x16xf32, #tpu.memory_space<vmem>>, %arg10: memref<3x1x16xf32, #tpu.memory_space<vmem>>, %arg11: memref<3x1x16xf32, #tpu.memory_space<vmem>>, %arg12: memref<3x1x16xf32, #tpu.memory_space<vmem>>, %arg13: memref<16x48xf32, #tpu.memory_space<vmem>>, %arg14: memref<1x48xf32, #tpu.memory_space<vmem>>, %arg15: memref<16x16xf32, #tpu.memory_space<vmem>>, %arg16: memref<1x16xf32, #tpu.memory_space<vmem>>, %arg17: memref<1x3xf32, #tpu.memory_space<smem>>, %arg18: memref<2x16xf32, #tpu.memory_space<vmem>>) attributes {dimension_semantics = [], scalar_prefetch = 0 : i64, scratch_operands = 0 : i64, tpu.core_type = #tpu.core_type<tc>} {
    %c0 = arith.constant 0 : index
    %c0_0 = arith.constant 0 : index
    %0 = vector.load %arg0[%c0, %c0_0] : memref<32x3xf32, #tpu.memory_space<vmem>>, vector<32x3xf32>
    %c0_1 = arith.constant 0 : index
    %c0_2 = arith.constant 0 : index
    %1 = vector.load %arg1[%c0_1, %c0_2] : memref<3x32xf32, #tpu.memory_space<vmem>>, vector<3x32xf32>
    %2 = vector.extract_strided_slice %0 {offsets = [0, 0], sizes = [32, 1], strides = [1, 1]} : vector<32x3xf32> to vector<32x1xf32>
    %3 = vector.extract_strided_slice %1 {offsets = [0, 0], sizes = [1, 32], strides = [1, 1]} : vector<3x32xf32> to vector<1x32xf32>
    %4 = vector.broadcast %2 : vector<32x1xf32> to vector<32x32xf32>
    %5 = vector.broadcast %3 : vector<1x32xf32> to vector<32x32xf32>
    %6 = arith.mulf %4, %5 : vector<32x32xf32>
    %7 = vector.extract_strided_slice %0 {offsets = [0, 1], sizes = [32, 1], strides = [1, 1]} : vector<32x3xf32> to vector<32x1xf32>
    %8 = vector.extract_strided_slice %1 {offsets = [1, 0], sizes = [1, 32], strides = [1, 1]} : vector<3x32xf32> to vector<1x32xf32>
    %9 = vector.broadcast %7 : vector<32x1xf32> to vector<32x32xf32>
    %10 = vector.broadcast %8 : vector<1x32xf32> to vector<32x32xf32>
    %11 = arith.mulf %9, %10 : vector<32x32xf32>
    %12 = arith.addf %6, %11 : vector<32x32xf32>
    %13 = vector.extract_strided_slice %0 {offsets = [0, 2], sizes = [32, 1], strides = [1, 1]} : vector<32x3xf32> to vector<32x1xf32>
    %14 = vector.extract_strided_slice %1 {offsets = [2, 0], sizes = [1, 32], strides = [1, 1]} : vector<3x32xf32> to vector<1x32xf32>
    %15 = vector.broadcast %13 : vector<32x1xf32> to vector<32x32xf32>
    %16 = vector.broadcast %14 : vector<1x32xf32> to vector<32x32xf32>
    %17 = arith.mulf %15, %16 : vector<32x32xf32>
    %18 = arith.addf %12, %17 : vector<32x32xf32>
    %c0_3 = arith.constant 0 : index
    %c0_4 = arith.constant 0 : index
    %19 = vector.load %arg2[%c0_3, %c0_4] : memref<1x32xf32, #tpu.memory_space<vmem>>, vector<1x32xf32>
    %20 = vector.broadcast %19 : vector<1x32xf32> to vector<32x32xf32>
    %21 = arith.addf %18, %20 : vector<32x32xf32>
    %c0_5 = arith.constant 0 : index
    %c0_6 = arith.constant 0 : index
    %22 = vector.load %arg3[%c0_5, %c0_6] : memref<1x32xf32, #tpu.memory_space<vmem>>, vector<1x32xf32>
    %c0_7 = arith.constant 0 : index
    %c0_8 = arith.constant 0 : index
    %23 = vector.load %arg4[%c0_7, %c0_8] : memref<1x32xf32, #tpu.memory_space<vmem>>, vector<1x32xf32>
    %cst = arith.constant dense<0.000000e+00> : vector<32xf32>
    %24 = vector.multi_reduction <add>, %21, %cst [0] : vector<32x32xf32> to vector<32xf32>
    %25 = vector.shape_cast %24 : vector<32xf32> to vector<1x32xf32>
    %cst_9 = arith.constant 3.200000e+01 : f32
    %26 = vector.broadcast %cst_9 : f32 to vector<1x32xf32>
    %27 = arith.divf %25, %26 : vector<1x32xf32>
    %28 = vector.broadcast %27 : vector<1x32xf32> to vector<32x32xf32>
    %29 = arith.subf %21, %28 : vector<32x32xf32>
    %30 = arith.mulf %29, %29 : vector<32x32xf32>
    %cst_10 = arith.constant dense<0.000000e+00> : vector<32xf32>
    %31 = vector.multi_reduction <add>, %30, %cst_10 [0] : vector<32x32xf32> to vector<32xf32>
    %32 = vector.shape_cast %31 : vector<32xf32> to vector<1x32xf32>
    %cst_11 = arith.constant 3.200000e+01 : f32
    %33 = vector.broadcast %cst_11 : f32 to vector<1x32xf32>
    %34 = arith.divf %32, %33 : vector<1x32xf32>
    %35 = vector.broadcast %27 : vector<1x32xf32> to vector<32x32xf32>
    %36 = arith.subf %21, %35 : vector<32x32xf32>
    %cst_12 = arith.constant 9.99999974E-6 : f32
    %37 = vector.broadcast %cst_12 : f32 to vector<1x32xf32>
    %38 = arith.addf %34, %37 : vector<1x32xf32>
    %39 = math.rsqrt %38 : vector<1x32xf32>
    %40 = vector.broadcast %39 : vector<1x32xf32> to vector<32x32xf32>
    %41 = arith.mulf %36, %40 : vector<32x32xf32>
    %42 = vector.broadcast %22 : vector<1x32xf32> to vector<32x32xf32>
    %43 = arith.mulf %41, %42 : vector<32x32xf32>
    %44 = vector.broadcast %23 : vector<1x32xf32> to vector<32x32xf32>
    %45 = arith.addf %43, %44 : vector<32x32xf32>
    %cst_13 = arith.constant 1.000000e-01 : f32
    %46 = vector.broadcast %cst_13 : f32 to vector<32x32xf32>
    %47 = arith.mulf %46, %45 : vector<32x32xf32>
    %48 = arith.maximumf %45, %47 : vector<32x32xf32>
    %c0_14 = arith.constant 0 : index
    %c0_15 = arith.constant 0 : index
    %49 = vector.load %arg5[%c0_14, %c0_15] : memref<32x32xf32, #tpu.memory_space<vmem>>, vector<32x32xf32>
    %50 = arith.truncf %48 : vector<32x32xf32> to vector<32x32xbf16>
    %51 = arith.truncf %49 : vector<32x32xf32> to vector<32x32xbf16>
    %cst_16 = arith.constant dense<0.000000e+00> : vector<32x32xf32>
    %52 = tpu.matmul %50, %51, %cst_16 {dimension_numbers = #tpu.dot_dimension_numbers<[1], [0], [0], [1], [0, 0, 1, 1], [], []>} : vector<32x32xbf16>, vector<32x32xbf16>, vector<32x32xf32> -> vector<32x32xf32>
    %c0_17 = arith.constant 0 : index
    %c0_18 = arith.constant 0 : index
    %53 = vector.load %arg6[%c0_17, %c0_18] : memref<1x32xf32, #tpu.memory_space<vmem>>, vector<1x32xf32>
    %54 = vector.broadcast %53 : vector<1x32xf32> to vector<32x32xf32>
    %55 = arith.addf %52, %54 : vector<32x32xf32>
    %c0_19 = arith.constant 0 : index
    %c0_20 = arith.constant 0 : index
    %56 = vector.load %arg7[%c0_19, %c0_20] : memref<1x32xf32, #tpu.memory_space<vmem>>, vector<1x32xf32>
    %c0_21 = arith.constant 0 : index
    %c0_22 = arith.constant 0 : index
    %57 = vector.load %arg8[%c0_21, %c0_22] : memref<1x32xf32, #tpu.memory_space<vmem>>, vector<1x32xf32>
    %cst_23 = arith.constant dense<0.000000e+00> : vector<32xf32>
    %58 = vector.multi_reduction <add>, %55, %cst_23 [0] : vector<32x32xf32> to vector<32xf32>
    %59 = vector.shape_cast %58 : vector<32xf32> to vector<1x32xf32>
    %cst_24 = arith.constant 3.200000e+01 : f32
    %60 = vector.broadcast %cst_24 : f32 to vector<1x32xf32>
    %61 = arith.divf %59, %60 : vector<1x32xf32>
    %62 = vector.broadcast %61 : vector<1x32xf32> to vector<32x32xf32>
    %63 = arith.subf %55, %62 : vector<32x32xf32>
    %64 = arith.mulf %63, %63 : vector<32x32xf32>
    %cst_25 = arith.constant dense<0.000000e+00> : vector<32xf32>
    %65 = vector.multi_reduction <add>, %64, %cst_25 [0] : vector<32x32xf32> to vector<32xf32>
    %66 = vector.shape_cast %65 : vector<32xf32> to vector<1x32xf32>
    %cst_26 = arith.constant 3.200000e+01 : f32
    %67 = vector.broadcast %cst_26 : f32 to vector<1x32xf32>
    %68 = arith.divf %66, %67 : vector<1x32xf32>
    %69 = vector.broadcast %61 : vector<1x32xf32> to vector<32x32xf32>
    %70 = arith.subf %55, %69 : vector<32x32xf32>
    %cst_27 = arith.constant 9.99999974E-6 : f32
    %71 = vector.broadcast %cst_27 : f32 to vector<1x32xf32>
    %72 = arith.addf %68, %71 : vector<1x32xf32>
    %73 = math.rsqrt %72 : vector<1x32xf32>
    %74 = vector.broadcast %73 : vector<1x32xf32> to vector<32x32xf32>
    %75 = arith.mulf %70, %74 : vector<32x32xf32>
    %76 = vector.broadcast %56 : vector<1x32xf32> to vector<32x32xf32>
    %77 = arith.mulf %75, %76 : vector<32x32xf32>
    %78 = vector.broadcast %57 : vector<1x32xf32> to vector<32x32xf32>
    %79 = arith.addf %77, %78 : vector<32x32xf32>
    %cst_28 = arith.constant 1.000000e-01 : f32
    %80 = vector.broadcast %cst_28 : f32 to vector<32x32xf32>
    %81 = arith.mulf %80, %79 : vector<32x32xf32>
    %82 = arith.maximumf %79, %81 : vector<32x32xf32>
    %83 = arith.addf %82, %48 : vector<32x32xf32>
    %c0_29 = arith.constant 0 : index
    %c0_30 = arith.constant 0 : index
    %c0_31 = arith.constant 0 : index
    %84 = vector.load %arg9[%c0_29, %c0_30, %c0_31] : memref<3x32x16xf32, #tpu.memory_space<vmem>>, vector<1x32x16xf32>
    %85 = vector.shape_cast %84 : vector<1x32x16xf32> to vector<32x16xf32>
    %86 = arith.truncf %83 : vector<32x32xf32> to vector<32x32xbf16>
    %87 = arith.truncf %85 : vector<32x16xf32> to vector<32x16xbf16>
    %cst_32 = arith.constant dense<0.000000e+00> : vector<32x16xf32>
    %88 = tpu.matmul %86, %87, %cst_32 {dimension_numbers = #tpu.dot_dimension_numbers<[1], [0], [0], [1], [0, 0, 1, 1], [], []>} : vector<32x32xbf16>, vector<32x16xbf16>, vector<32x16xf32> -> vector<32x16xf32>
    %c0_33 = arith.constant 0 : index
    %c0_34 = arith.constant 0 : index
    %c0_35 = arith.constant 0 : index
    %89 = vector.load %arg10[%c0_33, %c0_34, %c0_35] : memref<3x1x16xf32, #tpu.memory_space<vmem>>, vector<1x1x16xf32>
    %90 = vector.shape_cast %89 : vector<1x1x16xf32> to vector<1x16xf32>
    %91 = vector.broadcast %90 : vector<1x16xf32> to vector<32x16xf32>
    %92 = arith.addf %88, %91 : vector<32x16xf32>
    %c0_36 = arith.constant 0 : index
    %c0_37 = arith.constant 0 : index
    %c0_38 = arith.constant 0 : index
    %93 = vector.load %arg11[%c0_36, %c0_37, %c0_38] : memref<3x1x16xf32, #tpu.memory_space<vmem>>, vector<1x1x16xf32>
    %94 = vector.shape_cast %93 : vector<1x1x16xf32> to vector<1x16xf32>
    %c0_39 = arith.constant 0 : index
    %c0_40 = arith.constant 0 : index
    %c0_41 = arith.constant 0 : index
    %95 = vector.load %arg12[%c0_39, %c0_40, %c0_41] : memref<3x1x16xf32, #tpu.memory_space<vmem>>, vector<1x1x16xf32>
    %96 = vector.shape_cast %95 : vector<1x1x16xf32> to vector<1x16xf32>
    %cst_42 = arith.constant dense<0.000000e+00> : vector<16xf32>
    %97 = vector.multi_reduction <add>, %92, %cst_42 [0] : vector<32x16xf32> to vector<16xf32>
    %98 = vector.shape_cast %97 : vector<16xf32> to vector<1x16xf32>
    %cst_43 = arith.constant 3.200000e+01 : f32
    %99 = vector.broadcast %cst_43 : f32 to vector<1x16xf32>
    %100 = arith.divf %98, %99 : vector<1x16xf32>
    %101 = vector.broadcast %100 : vector<1x16xf32> to vector<32x16xf32>
    %102 = arith.subf %92, %101 : vector<32x16xf32>
    %103 = arith.mulf %102, %102 : vector<32x16xf32>
    %cst_44 = arith.constant dense<0.000000e+00> : vector<16xf32>
    %104 = vector.multi_reduction <add>, %103, %cst_44 [0] : vector<32x16xf32> to vector<16xf32>
    %105 = vector.shape_cast %104 : vector<16xf32> to vector<1x16xf32>
    %cst_45 = arith.constant 3.200000e+01 : f32
    %106 = vector.broadcast %cst_45 : f32 to vector<1x16xf32>
    %107 = arith.divf %105, %106 : vector<1x16xf32>
    %108 = vector.broadcast %100 : vector<1x16xf32> to vector<32x16xf32>
    %109 = arith.subf %92, %108 : vector<32x16xf32>
    %cst_46 = arith.constant 9.99999974E-6 : f32
    %110 = vector.broadcast %cst_46 : f32 to vector<1x16xf32>
    %111 = arith.addf %107, %110 : vector<1x16xf32>
    %112 = math.rsqrt %111 : vector<1x16xf32>
    %113 = vector.broadcast %112 : vector<1x16xf32> to vector<32x16xf32>
    %114 = arith.mulf %109, %113 : vector<32x16xf32>
    %115 = vector.broadcast %94 : vector<1x16xf32> to vector<32x16xf32>
    %116 = arith.mulf %114, %115 : vector<32x16xf32>
    %117 = vector.broadcast %96 : vector<1x16xf32> to vector<32x16xf32>
    %118 = arith.addf %116, %117 : vector<32x16xf32>
    %cst_47 = arith.constant 1.000000e-01 : f32
    %119 = vector.broadcast %cst_47 : f32 to vector<32x16xf32>
    %120 = arith.mulf %119, %118 : vector<32x16xf32>
    %121 = arith.maximumf %118, %120 : vector<32x16xf32>
    %c0_48 = arith.constant 0 : index
    %c0_49 = arith.constant 0 : index
    %122 = vector.load %arg13[%c0_48, %c0_49] : memref<16x48xf32, #tpu.memory_space<vmem>>, vector<16x48xf32>
    %123 = arith.truncf %121 : vector<32x16xf32> to vector<32x16xbf16>
    %124 = arith.truncf %122 : vector<16x48xf32> to vector<16x48xbf16>
    %cst_50 = arith.constant dense<0.000000e+00> : vector<32x48xf32>
    %125 = tpu.matmul %123, %124, %cst_50 {dimension_numbers = #tpu.dot_dimension_numbers<[1], [0], [0], [1], [0, 0, 1, 1], [], []>} : vector<32x16xbf16>, vector<16x48xbf16>, vector<32x48xf32> -> vector<32x48xf32>
    %c0_51 = arith.constant 0 : index
    %c0_52 = arith.constant 0 : index
    %126 = vector.load %arg14[%c0_51, %c0_52] : memref<1x48xf32, #tpu.memory_space<vmem>>, vector<1x48xf32>
    %127 = vector.broadcast %126 : vector<1x48xf32> to vector<32x48xf32>
    %128 = arith.addf %125, %127 : vector<32x48xf32>
    %129 = vector.extract_strided_slice %128 {offsets = [0, 0], sizes = [32, 16], strides = [1, 1]} : vector<32x48xf32> to vector<32x16xf32>
    %130 = vector.shape_cast %129 : vector<32x16xf32> to vector<2x16x16xf32>
    %131 = arith.truncf %130 : vector<2x16x16xf32> to vector<2x16x16xbf16>
    %132 = vector.extract_strided_slice %128 {offsets = [0, 16], sizes = [32, 16], strides = [1, 1]} : vector<32x48xf32> to vector<32x16xf32>
    %133 = vector.shape_cast %132 : vector<32x16xf32> to vector<2x16x16xf32>
    %134 = arith.truncf %133 : vector<2x16x16xf32> to vector<2x16x16xbf16>
    %135 = vector.extract_strided_slice %128 {offsets = [0, 32], sizes = [32, 16], strides = [1, 1]} : vector<32x48xf32> to vector<32x16xf32>
    %136 = vector.shape_cast %135 : vector<32x16xf32> to vector<2x16x16xf32>
    %137 = arith.truncf %136 : vector<2x16x16xf32> to vector<2x16x16xbf16>
    %c1 = arith.constant 1 : index
    %c0_53 = arith.constant 0 : index
    %c0_54 = arith.constant 0 : index
    %138 = vector.load %arg9[%c1, %c0_53, %c0_54] : memref<3x32x16xf32, #tpu.memory_space<vmem>>, vector<1x32x16xf32>
    %139 = vector.shape_cast %138 : vector<1x32x16xf32> to vector<32x16xf32>
    %140 = arith.truncf %83 : vector<32x32xf32> to vector<32x32xbf16>
    %141 = arith.truncf %139 : vector<32x16xf32> to vector<32x16xbf16>
    %cst_55 = arith.constant dense<0.000000e+00> : vector<32x16xf32>
    %142 = tpu.matmul %140, %141, %cst_55 {dimension_numbers = #tpu.dot_dimension_numbers<[1], [0], [0], [1], [0, 0, 1, 1], [], []>} : vector<32x32xbf16>, vector<32x16xbf16>, vector<32x16xf32> -> vector<32x16xf32>
    %c1_56 = arith.constant 1 : index
    %c0_57 = arith.constant 0 : index
    %c0_58 = arith.constant 0 : index
    %143 = vector.load %arg10[%c1_56, %c0_57, %c0_58] : memref<3x1x16xf32, #tpu.memory_space<vmem>>, vector<1x1x16xf32>
    %144 = vector.shape_cast %143 : vector<1x1x16xf32> to vector<1x16xf32>
    %145 = vector.broadcast %144 : vector<1x16xf32> to vector<32x16xf32>
    %146 = arith.addf %142, %145 : vector<32x16xf32>
    %c1_59 = arith.constant 1 : index
    %c0_60 = arith.constant 0 : index
    %c0_61 = arith.constant 0 : index
    %147 = vector.load %arg11[%c1_59, %c0_60, %c0_61] : memref<3x1x16xf32, #tpu.memory_space<vmem>>, vector<1x1x16xf32>
    %148 = vector.shape_cast %147 : vector<1x1x16xf32> to vector<1x16xf32>
    %c1_62 = arith.constant 1 : index
    %c0_63 = arith.constant 0 : index
    %c0_64 = arith.constant 0 : index
    %149 = vector.load %arg12[%c1_62, %c0_63, %c0_64] : memref<3x1x16xf32, #tpu.memory_space<vmem>>, vector<1x1x16xf32>
    %150 = vector.shape_cast %149 : vector<1x1x16xf32> to vector<1x16xf32>
    %cst_65 = arith.constant dense<0.000000e+00> : vector<16xf32>
    %151 = vector.multi_reduction <add>, %146, %cst_65 [0] : vector<32x16xf32> to vector<16xf32>
    %152 = vector.shape_cast %151 : vector<16xf32> to vector<1x16xf32>
    %cst_66 = arith.constant 3.200000e+01 : f32
    %153 = vector.broadcast %cst_66 : f32 to vector<1x16xf32>
    %154 = arith.divf %152, %153 : vector<1x16xf32>
    %155 = vector.broadcast %154 : vector<1x16xf32> to vector<32x16xf32>
    %156 = arith.subf %146, %155 : vector<32x16xf32>
    %157 = arith.mulf %156, %156 : vector<32x16xf32>
    %cst_67 = arith.constant dense<0.000000e+00> : vector<16xf32>
    %158 = vector.multi_reduction <add>, %157, %cst_67 [0] : vector<32x16xf32> to vector<16xf32>
    %159 = vector.shape_cast %158 : vector<16xf32> to vector<1x16xf32>
    %cst_68 = arith.constant 3.200000e+01 : f32
    %160 = vector.broadcast %cst_68 : f32 to vector<1x16xf32>
    %161 = arith.divf %159, %160 : vector<1x16xf32>
    %162 = vector.broadcast %154 : vector<1x16xf32> to vector<32x16xf32>
    %163 = arith.subf %146, %162 : vector<32x16xf32>
    %cst_69 = arith.constant 9.99999974E-6 : f32
    %164 = vector.broadcast %cst_69 : f32 to vector<1x16xf32>
    %165 = arith.addf %161, %164 : vector<1x16xf32>
    %166 = math.rsqrt %165 : vector<1x16xf32>
    %167 = vector.broadcast %166 : vector<1x16xf32> to vector<32x16xf32>
    %168 = arith.mulf %163, %167 : vector<32x16xf32>
    %169 = vector.broadcast %148 : vector<1x16xf32> to vector<32x16xf32>
    %170 = arith.mulf %168, %169 : vector<32x16xf32>
    %171 = vector.broadcast %150 : vector<1x16xf32> to vector<32x16xf32>
    %172 = arith.addf %170, %171 : vector<32x16xf32>
    %cst_70 = arith.constant 1.000000e-01 : f32
    %173 = vector.broadcast %cst_70 : f32 to vector<32x16xf32>
    %174 = arith.mulf %173, %172 : vector<32x16xf32>
    %175 = arith.maximumf %172, %174 : vector<32x16xf32>
    %c0_71 = arith.constant 0 : index
    %c0_72 = arith.constant 0 : index
    %176 = vector.load %arg13[%c0_71, %c0_72] : memref<16x48xf32, #tpu.memory_space<vmem>>, vector<16x48xf32>
    %177 = arith.truncf %175 : vector<32x16xf32> to vector<32x16xbf16>
    %178 = arith.truncf %176 : vector<16x48xf32> to vector<16x48xbf16>
    %cst_73 = arith.constant dense<0.000000e+00> : vector<32x48xf32>
    %179 = tpu.matmul %177, %178, %cst_73 {dimension_numbers = #tpu.dot_dimension_numbers<[1], [0], [0], [1], [0, 0, 1, 1], [], []>} : vector<32x16xbf16>, vector<16x48xbf16>, vector<32x48xf32> -> vector<32x48xf32>
    %c0_74 = arith.constant 0 : index
    %c0_75 = arith.constant 0 : index
    %180 = vector.load %arg14[%c0_74, %c0_75] : memref<1x48xf32, #tpu.memory_space<vmem>>, vector<1x48xf32>
    %181 = vector.broadcast %180 : vector<1x48xf32> to vector<32x48xf32>
    %182 = arith.addf %179, %181 : vector<32x48xf32>
    %183 = vector.extract_strided_slice %182 {offsets = [0, 0], sizes = [32, 16], strides = [1, 1]} : vector<32x48xf32> to vector<32x16xf32>
    %184 = vector.shape_cast %183 : vector<32x16xf32> to vector<2x16x16xf32>
    %185 = arith.truncf %184 : vector<2x16x16xf32> to vector<2x16x16xbf16>
    %186 = vector.extract_strided_slice %182 {offsets = [0, 16], sizes = [32, 16], strides = [1, 1]} : vector<32x48xf32> to vector<32x16xf32>
    %187 = vector.shape_cast %186 : vector<32x16xf32> to vector<2x16x16xf32>
    %188 = arith.truncf %187 : vector<2x16x16xf32> to vector<2x16x16xbf16>
    %189 = vector.extract_strided_slice %182 {offsets = [0, 32], sizes = [32, 16], strides = [1, 1]} : vector<32x48xf32> to vector<32x16xf32>
    %190 = vector.shape_cast %189 : vector<32x16xf32> to vector<2x16x16xf32>
    %191 = arith.truncf %190 : vector<2x16x16xf32> to vector<2x16x16xbf16>
    %c2 = arith.constant 2 : index
    %c0_76 = arith.constant 0 : index
    %c0_77 = arith.constant 0 : index
    %192 = vector.load %arg9[%c2, %c0_76, %c0_77] : memref<3x32x16xf32, #tpu.memory_space<vmem>>, vector<1x32x16xf32>
    %193 = vector.shape_cast %192 : vector<1x32x16xf32> to vector<32x16xf32>
    %194 = arith.truncf %83 : vector<32x32xf32> to vector<32x32xbf16>
    %195 = arith.truncf %193 : vector<32x16xf32> to vector<32x16xbf16>
    %cst_78 = arith.constant dense<0.000000e+00> : vector<32x16xf32>
    %196 = tpu.matmul %194, %195, %cst_78 {dimension_numbers = #tpu.dot_dimension_numbers<[1], [0], [0], [1], [0, 0, 1, 1], [], []>} : vector<32x32xbf16>, vector<32x16xbf16>, vector<32x16xf32> -> vector<32x16xf32>
    %c2_79 = arith.constant 2 : index
    %c0_80 = arith.constant 0 : index
    %c0_81 = arith.constant 0 : index
    %197 = vector.load %arg10[%c2_79, %c0_80, %c0_81] : memref<3x1x16xf32, #tpu.memory_space<vmem>>, vector<1x1x16xf32>
    %198 = vector.shape_cast %197 : vector<1x1x16xf32> to vector<1x16xf32>
    %199 = vector.broadcast %198 : vector<1x16xf32> to vector<32x16xf32>
    %200 = arith.addf %196, %199 : vector<32x16xf32>
    %c2_82 = arith.constant 2 : index
    %c0_83 = arith.constant 0 : index
    %c0_84 = arith.constant 0 : index
    %201 = vector.load %arg11[%c2_82, %c0_83, %c0_84] : memref<3x1x16xf32, #tpu.memory_space<vmem>>, vector<1x1x16xf32>
    %202 = vector.shape_cast %201 : vector<1x1x16xf32> to vector<1x16xf32>
    %c2_85 = arith.constant 2 : index
    %c0_86 = arith.constant 0 : index
    %c0_87 = arith.constant 0 : index
    %203 = vector.load %arg12[%c2_85, %c0_86, %c0_87] : memref<3x1x16xf32, #tpu.memory_space<vmem>>, vector<1x1x16xf32>
    %204 = vector.shape_cast %203 : vector<1x1x16xf32> to vector<1x16xf32>
    %cst_88 = arith.constant dense<0.000000e+00> : vector<16xf32>
    %205 = vector.multi_reduction <add>, %200, %cst_88 [0] : vector<32x16xf32> to vector<16xf32>
    %206 = vector.shape_cast %205 : vector<16xf32> to vector<1x16xf32>
    %cst_89 = arith.constant 3.200000e+01 : f32
    %207 = vector.broadcast %cst_89 : f32 to vector<1x16xf32>
    %208 = arith.divf %206, %207 : vector<1x16xf32>
    %209 = vector.broadcast %208 : vector<1x16xf32> to vector<32x16xf32>
    %210 = arith.subf %200, %209 : vector<32x16xf32>
    %211 = arith.mulf %210, %210 : vector<32x16xf32>
    %cst_90 = arith.constant dense<0.000000e+00> : vector<16xf32>
    %212 = vector.multi_reduction <add>, %211, %cst_90 [0] : vector<32x16xf32> to vector<16xf32>
    %213 = vector.shape_cast %212 : vector<16xf32> to vector<1x16xf32>
    %cst_91 = arith.constant 3.200000e+01 : f32
    %214 = vector.broadcast %cst_91 : f32 to vector<1x16xf32>
    %215 = arith.divf %213, %214 : vector<1x16xf32>
    %216 = vector.broadcast %208 : vector<1x16xf32> to vector<32x16xf32>
    %217 = arith.subf %200, %216 : vector<32x16xf32>
    %cst_92 = arith.constant 9.99999974E-6 : f32
    %218 = vector.broadcast %cst_92 : f32 to vector<1x16xf32>
    %219 = arith.addf %215, %218 : vector<1x16xf32>
    %220 = math.rsqrt %219 : vector<1x16xf32>
    %221 = vector.broadcast %220 : vector<1x16xf32> to vector<32x16xf32>
    %222 = arith.mulf %217, %221 : vector<32x16xf32>
    %223 = vector.broadcast %202 : vector<1x16xf32> to vector<32x16xf32>
    %224 = arith.mulf %222, %223 : vector<32x16xf32>
    %225 = vector.broadcast %204 : vector<1x16xf32> to vector<32x16xf32>
    %226 = arith.addf %224, %225 : vector<32x16xf32>
    %cst_93 = arith.constant 1.000000e-01 : f32
    %227 = vector.broadcast %cst_93 : f32 to vector<32x16xf32>
    %228 = arith.mulf %227, %226 : vector<32x16xf32>
    %229 = arith.maximumf %226, %228 : vector<32x16xf32>
    %c0_94 = arith.constant 0 : index
    %c0_95 = arith.constant 0 : index
    %230 = vector.load %arg13[%c0_94, %c0_95] : memref<16x48xf32, #tpu.memory_space<vmem>>, vector<16x48xf32>
    %231 = arith.truncf %229 : vector<32x16xf32> to vector<32x16xbf16>
    %232 = arith.truncf %230 : vector<16x48xf32> to vector<16x48xbf16>
    %cst_96 = arith.constant dense<0.000000e+00> : vector<32x48xf32>
    %233 = tpu.matmul %231, %232, %cst_96 {dimension_numbers = #tpu.dot_dimension_numbers<[1], [0], [0], [1], [0, 0, 1, 1], [], []>} : vector<32x16xbf16>, vector<16x48xbf16>, vector<32x48xf32> -> vector<32x48xf32>
    %c0_97 = arith.constant 0 : index
    %c0_98 = arith.constant 0 : index
    %234 = vector.load %arg14[%c0_97, %c0_98] : memref<1x48xf32, #tpu.memory_space<vmem>>, vector<1x48xf32>
    %235 = vector.broadcast %234 : vector<1x48xf32> to vector<32x48xf32>
    %236 = arith.addf %233, %235 : vector<32x48xf32>
    %237 = vector.extract_strided_slice %236 {offsets = [0, 0], sizes = [32, 16], strides = [1, 1]} : vector<32x48xf32> to vector<32x16xf32>
    %238 = vector.shape_cast %237 : vector<32x16xf32> to vector<2x16x16xf32>
    %239 = arith.truncf %238 : vector<2x16x16xf32> to vector<2x16x16xbf16>
    %240 = vector.extract_strided_slice %236 {offsets = [0, 16], sizes = [32, 16], strides = [1, 1]} : vector<32x48xf32> to vector<32x16xf32>
    %241 = vector.shape_cast %240 : vector<32x16xf32> to vector<2x16x16xf32>
    %242 = arith.truncf %241 : vector<2x16x16xf32> to vector<2x16x16xbf16>
    %243 = vector.extract_strided_slice %236 {offsets = [0, 32], sizes = [32, 16], strides = [1, 1]} : vector<32x48xf32> to vector<32x16xf32>
    %244 = vector.shape_cast %243 : vector<32x16xf32> to vector<2x16x16xf32>
    %245 = arith.truncf %244 : vector<2x16x16xf32> to vector<2x16x16xbf16>
    %cst_99 = arith.constant 0.000000e+00 : f32
    %246 = vector.broadcast %cst_99 : f32 to vector<2x16x16xf32>
    %cst_100 = arith.constant 0.000000e+00 : f32
    %247 = vector.broadcast %cst_100 : f32 to vector<32x16xf32>
    %c0_101 = arith.constant 0 : index
    %c0_102 = arith.constant 0 : index
    %248 = memref.load %arg17[%c0_101, %c0_102] : memref<1x3xf32, #tpu.memory_space<smem>>
    "tpu.trace_start"() <{level = 10 : i32, message = "bqe,bke->bqk"}> : () -> ()
    %cst_103 = arith.constant dense<0.000000e+00> : vector<2x16x16xf32>
    %249 = tpu.matmul %131, %134, %cst_103 {dimension_numbers = #tpu.dot_dimension_numbers<[2], [2], [1], [1], [0, 0, 0, 1, 1, 1], [0], [0]>} : vector<2x16x16xbf16>, vector<2x16x16xbf16>, vector<2x16x16xf32> -> vector<2x16x16xf32>
    %cst_104 = arith.constant dense<0.000000e+00> : vector<2x16x16xf32>
    %250 = tpu.matmul %131, %188, %cst_104 {dimension_numbers = #tpu.dot_dimension_numbers<[2], [2], [1], [1], [0, 0, 0, 1, 1, 1], [0], [0]>} : vector<2x16x16xbf16>, vector<2x16x16xbf16>, vector<2x16x16xf32> -> vector<2x16x16xf32>
    %cst_105 = arith.constant dense<0.000000e+00> : vector<2x16x16xf32>
    %251 = tpu.matmul %131, %242, %cst_105 {dimension_numbers = #tpu.dot_dimension_numbers<[2], [2], [1], [1], [0, 0, 0, 1, 1, 1], [0], [0]>} : vector<2x16x16xbf16>, vector<2x16x16xbf16>, vector<2x16x16xf32> -> vector<2x16x16xf32>
    "tpu.trace_stop"() : () -> ()
    %cst_106 = arith.constant dense<0xFF800000> : vector<2x16xf32>
    %252 = vector.multi_reduction <maximumf>, %249, %cst_106 [2] : vector<2x16x16xf32> to vector<2x16xf32>
    %253 = vector.shape_cast %252 : vector<2x16xf32> to vector<2x16x1xf32>
    %cst_107 = arith.constant dense<0xFF800000> : vector<2x16xf32>
    %254 = vector.multi_reduction <maximumf>, %250, %cst_107 [2] : vector<2x16x16xf32> to vector<2x16xf32>
    %255 = vector.shape_cast %254 : vector<2x16xf32> to vector<2x16x1xf32>
    %256 = arith.maximumf %253, %255 : vector<2x16x1xf32>
    %cst_108 = arith.constant dense<0xFF800000> : vector<2x16xf32>
    %257 = vector.multi_reduction <maximumf>, %251, %cst_108 [2] : vector<2x16x16xf32> to vector<2x16xf32>
    %258 = vector.shape_cast %257 : vector<2x16xf32> to vector<2x16x1xf32>
    %259 = arith.maximumf %256, %258 : vector<2x16x1xf32>
    %260 = vector.broadcast %259 : vector<2x16x1xf32> to vector<2x16x16xf32>
    %261 = arith.subf %249, %260 : vector<2x16x16xf32>
    %262 = math.exp %261 : vector<2x16x16xf32>
    %263 = vector.broadcast %259 : vector<2x16x1xf32> to vector<2x16x16xf32>
    %264 = arith.subf %250, %263 : vector<2x16x16xf32>
    %265 = math.exp %264 : vector<2x16x16xf32>
    %266 = vector.broadcast %259 : vector<2x16x1xf32> to vector<2x16x16xf32>
    %267 = arith.subf %251, %266 : vector<2x16x16xf32>
    %268 = math.exp %267 : vector<2x16x16xf32>
    %cst_109 = arith.constant dense<0.000000e+00> : vector<2x16xf32>
    %269 = vector.multi_reduction <add>, %262, %cst_109 [2] : vector<2x16x16xf32> to vector<2x16xf32>
    %270 = vector.shape_cast %269 : vector<2x16xf32> to vector<2x16x1xf32>
    %cst_110 = arith.constant dense<0.000000e+00> : vector<2x16xf32>
    %271 = vector.multi_reduction <add>, %265, %cst_110 [2] : vector<2x16x16xf32> to vector<2x16xf32>
    %272 = vector.shape_cast %271 : vector<2x16xf32> to vector<2x16x1xf32>
    %273 = arith.addf %270, %272 : vector<2x16x1xf32>
    %cst_111 = arith.constant dense<0.000000e+00> : vector<2x16xf32>
    %274 = vector.multi_reduction <add>, %268, %cst_111 [2] : vector<2x16x16xf32> to vector<2x16xf32>
    %275 = vector.shape_cast %274 : vector<2x16xf32> to vector<2x16x1xf32>
    %276 = arith.addf %273, %275 : vector<2x16x1xf32>
    %277 = arith.truncf %262 : vector<2x16x16xf32> to vector<2x16x16xbf16>
    "tpu.trace_start"() <{level = 10 : i32, message = "bqk,bke->bqe"}> : () -> ()
    %cst_112 = arith.constant dense<0.000000e+00> : vector<2x16x16xf32>
    %278 = tpu.matmul %277, %137, %cst_112 {dimension_numbers = #tpu.dot_dimension_numbers<[2], [1], [1], [2], [0, 0, 0, 1, 1, 2], [0], [0]>} : vector<2x16x16xbf16>, vector<2x16x16xbf16>, vector<2x16x16xf32> -> vector<2x16x16xf32>
    "tpu.trace_stop"() : () -> ()
    %279 = arith.truncf %265 : vector<2x16x16xf32> to vector<2x16x16xbf16>
    "tpu.trace_start"() <{level = 10 : i32, message = "bqk,bke->bqe"}> : () -> ()
    %cst_113 = arith.constant dense<0.000000e+00> : vector<2x16x16xf32>
    %280 = tpu.matmul %279, %191, %cst_113 {dimension_numbers = #tpu.dot_dimension_numbers<[2], [1], [1], [2], [0, 0, 0, 1, 1, 2], [0], [0]>} : vector<2x16x16xbf16>, vector<2x16x16xbf16>, vector<2x16x16xf32> -> vector<2x16x16xf32>
    "tpu.trace_stop"() : () -> ()
    %281 = arith.addf %278, %280 : vector<2x16x16xf32>
    %282 = arith.truncf %268 : vector<2x16x16xf32> to vector<2x16x16xbf16>
    "tpu.trace_start"() <{level = 10 : i32, message = "bqk,bke->bqe"}> : () -> ()
    %cst_114 = arith.constant dense<0.000000e+00> : vector<2x16x16xf32>
    %283 = tpu.matmul %282, %245, %cst_114 {dimension_numbers = #tpu.dot_dimension_numbers<[2], [1], [1], [2], [0, 0, 0, 1, 1, 2], [0], [0]>} : vector<2x16x16xbf16>, vector<2x16x16xbf16>, vector<2x16x16xf32> -> vector<2x16x16xf32>
    "tpu.trace_stop"() : () -> ()
    %284 = arith.addf %281, %283 : vector<2x16x16xf32>
    %285 = vector.broadcast %276 : vector<2x16x1xf32> to vector<2x16x16xf32>
    %286 = arith.divf %284, %285 : vector<2x16x16xf32>
    %287 = vector.broadcast %248 : f32 to vector<2x16x16xf32>
    %288 = arith.mulf %286, %287 : vector<2x16x16xf32>
    %289 = arith.addf %246, %288 : vector<2x16x16xf32>
    %290 = vector.broadcast %248 : f32 to vector<32x16xf32>
    %291 = arith.mulf %121, %290 : vector<32x16xf32>
    %292 = arith.addf %247, %291 : vector<32x16xf32>
    %cst_115 = arith.constant 0.000000e+00 : f32
    %293 = arith.addf %cst_115, %248 : f32
    %c0_116 = arith.constant 0 : index
    %c1_117 = arith.constant 1 : index
    %294 = memref.load %arg17[%c0_116, %c1_117] : memref<1x3xf32, #tpu.memory_space<smem>>
    "tpu.trace_start"() <{level = 10 : i32, message = "bqe,bke->bqk"}> : () -> ()
    %cst_118 = arith.constant dense<0.000000e+00> : vector<2x16x16xf32>
    %295 = tpu.matmul %185, %134, %cst_118 {dimension_numbers = #tpu.dot_dimension_numbers<[2], [2], [1], [1], [0, 0, 0, 1, 1, 1], [0], [0]>} : vector<2x16x16xbf16>, vector<2x16x16xbf16>, vector<2x16x16xf32> -> vector<2x16x16xf32>
    %cst_119 = arith.constant dense<0.000000e+00> : vector<2x16x16xf32>
    %296 = tpu.matmul %185, %188, %cst_119 {dimension_numbers = #tpu.dot_dimension_numbers<[2], [2], [1], [1], [0, 0, 0, 1, 1, 1], [0], [0]>} : vector<2x16x16xbf16>, vector<2x16x16xbf16>, vector<2x16x16xf32> -> vector<2x16x16xf32>
    %cst_120 = arith.constant dense<0.000000e+00> : vector<2x16x16xf32>
    %297 = tpu.matmul %185, %242, %cst_120 {dimension_numbers = #tpu.dot_dimension_numbers<[2], [2], [1], [1], [0, 0, 0, 1, 1, 1], [0], [0]>} : vector<2x16x16xbf16>, vector<2x16x16xbf16>, vector<2x16x16xf32> -> vector<2x16x16xf32>
    "tpu.trace_stop"() : () -> ()
    %cst_121 = arith.constant dense<0xFF800000> : vector<2x16xf32>
    %298 = vector.multi_reduction <maximumf>, %295, %cst_121 [2] : vector<2x16x16xf32> to vector<2x16xf32>
    %299 = vector.shape_cast %298 : vector<2x16xf32> to vector<2x16x1xf32>
    %cst_122 = arith.constant dense<0xFF800000> : vector<2x16xf32>
    %300 = vector.multi_reduction <maximumf>, %296, %cst_122 [2] : vector<2x16x16xf32> to vector<2x16xf32>
    %301 = vector.shape_cast %300 : vector<2x16xf32> to vector<2x16x1xf32>
    %302 = arith.maximumf %299, %301 : vector<2x16x1xf32>
    %cst_123 = arith.constant dense<0xFF800000> : vector<2x16xf32>
    %303 = vector.multi_reduction <maximumf>, %297, %cst_123 [2] : vector<2x16x16xf32> to vector<2x16xf32>
    %304 = vector.shape_cast %303 : vector<2x16xf32> to vector<2x16x1xf32>
    %305 = arith.maximumf %302, %304 : vector<2x16x1xf32>
    %306 = vector.broadcast %305 : vector<2x16x1xf32> to vector<2x16x16xf32>
    %307 = arith.subf %295, %306 : vector<2x16x16xf32>
    %308 = math.exp %307 : vector<2x16x16xf32>
    %309 = vector.broadcast %305 : vector<2x16x1xf32> to vector<2x16x16xf32>
    %310 = arith.subf %296, %309 : vector<2x16x16xf32>
    %311 = math.exp %310 : vector<2x16x16xf32>
    %312 = vector.broadcast %305 : vector<2x16x1xf32> to vector<2x16x16xf32>
    %313 = arith.subf %297, %312 : vector<2x16x16xf32>
    %314 = math.exp %313 : vector<2x16x16xf32>
    %cst_124 = arith.constant dense<0.000000e+00> : vector<2x16xf32>
    %315 = vector.multi_reduction <add>, %308, %cst_124 [2] : vector<2x16x16xf32> to vector<2x16xf32>
    %316 = vector.shape_cast %315 : vector<2x16xf32> to vector<2x16x1xf32>
    %cst_125 = arith.constant dense<0.000000e+00> : vector<2x16xf32>
    %317 = vector.multi_reduction <add>, %311, %cst_125 [2] : vector<2x16x16xf32> to vector<2x16xf32>
    %318 = vector.shape_cast %317 : vector<2x16xf32> to vector<2x16x1xf32>
    %319 = arith.addf %316, %318 : vector<2x16x1xf32>
    %cst_126 = arith.constant dense<0.000000e+00> : vector<2x16xf32>
    %320 = vector.multi_reduction <add>, %314, %cst_126 [2] : vector<2x16x16xf32> to vector<2x16xf32>
    %321 = vector.shape_cast %320 : vector<2x16xf32> to vector<2x16x1xf32>
    %322 = arith.addf %319, %321 : vector<2x16x1xf32>
    %323 = arith.truncf %308 : vector<2x16x16xf32> to vector<2x16x16xbf16>
    "tpu.trace_start"() <{level = 10 : i32, message = "bqk,bke->bqe"}> : () -> ()
    %cst_127 = arith.constant dense<0.000000e+00> : vector<2x16x16xf32>
    %324 = tpu.matmul %323, %137, %cst_127 {dimension_numbers = #tpu.dot_dimension_numbers<[2], [1], [1], [2], [0, 0, 0, 1, 1, 2], [0], [0]>} : vector<2x16x16xbf16>, vector<2x16x16xbf16>, vector<2x16x16xf32> -> vector<2x16x16xf32>
    "tpu.trace_stop"() : () -> ()
    %325 = arith.truncf %311 : vector<2x16x16xf32> to vector<2x16x16xbf16>
    "tpu.trace_start"() <{level = 10 : i32, message = "bqk,bke->bqe"}> : () -> ()
    %cst_128 = arith.constant dense<0.000000e+00> : vector<2x16x16xf32>
    %326 = tpu.matmul %325, %191, %cst_128 {dimension_numbers = #tpu.dot_dimension_numbers<[2], [1], [1], [2], [0, 0, 0, 1, 1, 2], [0], [0]>} : vector<2x16x16xbf16>, vector<2x16x16xbf16>, vector<2x16x16xf32> -> vector<2x16x16xf32>
    "tpu.trace_stop"() : () -> ()
    %327 = arith.addf %324, %326 : vector<2x16x16xf32>
    %328 = arith.truncf %314 : vector<2x16x16xf32> to vector<2x16x16xbf16>
    "tpu.trace_start"() <{level = 10 : i32, message = "bqk,bke->bqe"}> : () -> ()
    %cst_129 = arith.constant dense<0.000000e+00> : vector<2x16x16xf32>
    %329 = tpu.matmul %328, %245, %cst_129 {dimension_numbers = #tpu.dot_dimension_numbers<[2], [1], [1], [2], [0, 0, 0, 1, 1, 2], [0], [0]>} : vector<2x16x16xbf16>, vector<2x16x16xbf16>, vector<2x16x16xf32> -> vector<2x16x16xf32>
    "tpu.trace_stop"() : () -> ()
    %330 = arith.addf %327, %329 : vector<2x16x16xf32>
    %331 = vector.broadcast %322 : vector<2x16x1xf32> to vector<2x16x16xf32>
    %332 = arith.divf %330, %331 : vector<2x16x16xf32>
    %333 = vector.broadcast %294 : f32 to vector<2x16x16xf32>
    %334 = arith.mulf %332, %333 : vector<2x16x16xf32>
    %335 = arith.addf %289, %334 : vector<2x16x16xf32>
    %336 = vector.broadcast %294 : f32 to vector<32x16xf32>
    %337 = arith.mulf %175, %336 : vector<32x16xf32>
    %338 = arith.addf %292, %337 : vector<32x16xf32>
    %339 = arith.addf %293, %294 : f32
    %c0_130 = arith.constant 0 : index
    %c2_131 = arith.constant 2 : index
    %340 = memref.load %arg17[%c0_130, %c2_131] : memref<1x3xf32, #tpu.memory_space<smem>>
    "tpu.trace_start"() <{level = 10 : i32, message = "bqe,bke->bqk"}> : () -> ()
    %cst_132 = arith.constant dense<0.000000e+00> : vector<2x16x16xf32>
    %341 = tpu.matmul %239, %134, %cst_132 {dimension_numbers = #tpu.dot_dimension_numbers<[2], [2], [1], [1], [0, 0, 0, 1, 1, 1], [0], [0]>} : vector<2x16x16xbf16>, vector<2x16x16xbf16>, vector<2x16x16xf32> -> vector<2x16x16xf32>
    %cst_133 = arith.constant dense<0.000000e+00> : vector<2x16x16xf32>
    %342 = tpu.matmul %239, %188, %cst_133 {dimension_numbers = #tpu.dot_dimension_numbers<[2], [2], [1], [1], [0, 0, 0, 1, 1, 1], [0], [0]>} : vector<2x16x16xbf16>, vector<2x16x16xbf16>, vector<2x16x16xf32> -> vector<2x16x16xf32>
    %cst_134 = arith.constant dense<0.000000e+00> : vector<2x16x16xf32>
    %343 = tpu.matmul %239, %242, %cst_134 {dimension_numbers = #tpu.dot_dimension_numbers<[2], [2], [1], [1], [0, 0, 0, 1, 1, 1], [0], [0]>} : vector<2x16x16xbf16>, vector<2x16x16xbf16>, vector<2x16x16xf32> -> vector<2x16x16xf32>
    "tpu.trace_stop"() : () -> ()
    %cst_135 = arith.constant dense<0xFF800000> : vector<2x16xf32>
    %344 = vector.multi_reduction <maximumf>, %341, %cst_135 [2] : vector<2x16x16xf32> to vector<2x16xf32>
    %345 = vector.shape_cast %344 : vector<2x16xf32> to vector<2x16x1xf32>
    %cst_136 = arith.constant dense<0xFF800000> : vector<2x16xf32>
    %346 = vector.multi_reduction <maximumf>, %342, %cst_136 [2] : vector<2x16x16xf32> to vector<2x16xf32>
    %347 = vector.shape_cast %346 : vector<2x16xf32> to vector<2x16x1xf32>
    %348 = arith.maximumf %345, %347 : vector<2x16x1xf32>
    %cst_137 = arith.constant dense<0xFF800000> : vector<2x16xf32>
    %349 = vector.multi_reduction <maximumf>, %343, %cst_137 [2] : vector<2x16x16xf32> to vector<2x16xf32>
    %350 = vector.shape_cast %349 : vector<2x16xf32> to vector<2x16x1xf32>
    %351 = arith.maximumf %348, %350 : vector<2x16x1xf32>
    %352 = vector.broadcast %351 : vector<2x16x1xf32> to vector<2x16x16xf32>
    %353 = arith.subf %341, %352 : vector<2x16x16xf32>
    %354 = math.exp %353 : vector<2x16x16xf32>
    %355 = vector.broadcast %351 : vector<2x16x1xf32> to vector<2x16x16xf32>
    %356 = arith.subf %342, %355 : vector<2x16x16xf32>
    %357 = math.exp %356 : vector<2x16x16xf32>
    %358 = vector.broadcast %351 : vector<2x16x1xf32> to vector<2x16x16xf32>
    %359 = arith.subf %343, %358 : vector<2x16x16xf32>
    %360 = math.exp %359 : vector<2x16x16xf32>
    %cst_138 = arith.constant dense<0.000000e+00> : vector<2x16xf32>
    %361 = vector.multi_reduction <add>, %354, %cst_138 [2] : vector<2x16x16xf32> to vector<2x16xf32>
    %362 = vector.shape_cast %361 : vector<2x16xf32> to vector<2x16x1xf32>
    %cst_139 = arith.constant dense<0.000000e+00> : vector<2x16xf32>
    %363 = vector.multi_reduction <add>, %357, %cst_139 [2] : vector<2x16x16xf32> to vector<2x16xf32>
    %364 = vector.shape_cast %363 : vector<2x16xf32> to vector<2x16x1xf32>
    %365 = arith.addf %362, %364 : vector<2x16x1xf32>
    %cst_140 = arith.constant dense<0.000000e+00> : vector<2x16xf32>
    %366 = vector.multi_reduction <add>, %360, %cst_140 [2] : vector<2x16x16xf32> to vector<2x16xf32>
    %367 = vector.shape_cast %366 : vector<2x16xf32> to vector<2x16x1xf32>
    %368 = arith.addf %365, %367 : vector<2x16x1xf32>
    %369 = arith.truncf %354 : vector<2x16x16xf32> to vector<2x16x16xbf16>
    "tpu.trace_start"() <{level = 10 : i32, message = "bqk,bke->bqe"}> : () -> ()
    %cst_141 = arith.constant dense<0.000000e+00> : vector<2x16x16xf32>
    %370 = tpu.matmul %369, %137, %cst_141 {dimension_numbers = #tpu.dot_dimension_numbers<[2], [1], [1], [2], [0, 0, 0, 1, 1, 2], [0], [0]>} : vector<2x16x16xbf16>, vector<2x16x16xbf16>, vector<2x16x16xf32> -> vector<2x16x16xf32>
    "tpu.trace_stop"() : () -> ()
    %371 = arith.truncf %357 : vector<2x16x16xf32> to vector<2x16x16xbf16>
    "tpu.trace_start"() <{level = 10 : i32, message = "bqk,bke->bqe"}> : () -> ()
    %cst_142 = arith.constant dense<0.000000e+00> : vector<2x16x16xf32>
    %372 = tpu.matmul %371, %191, %cst_142 {dimension_numbers = #tpu.dot_dimension_numbers<[2], [1], [1], [2], [0, 0, 0, 1, 1, 2], [0], [0]>} : vector<2x16x16xbf16>, vector<2x16x16xbf16>, vector<2x16x16xf32> -> vector<2x16x16xf32>
    "tpu.trace_stop"() : () -> ()
    %373 = arith.addf %370, %372 : vector<2x16x16xf32>
    %374 = arith.truncf %360 : vector<2x16x16xf32> to vector<2x16x16xbf16>
    "tpu.trace_start"() <{level = 10 : i32, message = "bqk,bke->bqe"}> : () -> ()
    %cst_143 = arith.constant dense<0.000000e+00> : vector<2x16x16xf32>
    %375 = tpu.matmul %374, %245, %cst_143 {dimension_numbers = #tpu.dot_dimension_numbers<[2], [1], [1], [2], [0, 0, 0, 1, 1, 2], [0], [0]>} : vector<2x16x16xbf16>, vector<2x16x16xbf16>, vector<2x16x16xf32> -> vector<2x16x16xf32>
    "tpu.trace_stop"() : () -> ()
    %376 = arith.addf %373, %375 : vector<2x16x16xf32>
    %377 = vector.broadcast %368 : vector<2x16x1xf32> to vector<2x16x16xf32>
    %378 = arith.divf %376, %377 : vector<2x16x16xf32>
    %379 = vector.broadcast %340 : f32 to vector<2x16x16xf32>
    %380 = arith.mulf %378, %379 : vector<2x16x16xf32>
    %381 = arith.addf %335, %380 : vector<2x16x16xf32>
    %382 = vector.broadcast %340 : f32 to vector<32x16xf32>
    %383 = arith.mulf %229, %382 : vector<32x16xf32>
    %384 = arith.addf %338, %383 : vector<32x16xf32>
    %385 = arith.addf %339, %340 : f32
    %cst_144 = arith.constant dense<0.000000e+00> : vector<2x16xf32>
    %386 = vector.multi_reduction <add>, %381, %cst_144 [1] : vector<2x16x16xf32> to vector<2x16xf32>
    %cst_145 = arith.constant 1.600000e+01 : f32
    %387 = vector.broadcast %cst_145 : f32 to vector<2x16xf32>
    %388 = arith.divf %386, %387 : vector<2x16xf32>
    %389 = vector.shape_cast %384 : vector<32x16xf32> to vector<2x16x16xf32>
    %cst_146 = arith.constant dense<0.000000e+00> : vector<2x16xf32>
    %390 = vector.multi_reduction <add>, %389, %cst_146 [1] : vector<2x16x16xf32> to vector<2x16xf32>
    %cst_147 = arith.constant 1.600000e+01 : f32
    %391 = vector.broadcast %cst_147 : f32 to vector<2x16xf32>
    %392 = arith.divf %390, %391 : vector<2x16xf32>
    %c0_148 = arith.constant 0 : index
    %c0_149 = arith.constant 0 : index
    %393 = vector.load %arg15[%c0_148, %c0_149] : memref<16x16xf32, #tpu.memory_space<vmem>>, vector<16x16xf32>
    %cst_150 = arith.constant dense<0.000000e+00> : vector<2x16xf32>
    %394 = tpu.matmul %388, %393, %cst_150 {dimension_numbers = #tpu.dot_dimension_numbers<[1], [0], [0], [1], [0, 0, 1, 1], [], []>} : vector<2x16xf32>, vector<16x16xf32>, vector<2x16xf32> -> vector<2x16xf32>
    %c0_151 = arith.constant 0 : index
    %c0_152 = arith.constant 0 : index
    %395 = vector.load %arg16[%c0_151, %c0_152] : memref<1x16xf32, #tpu.memory_space<vmem>>, vector<1x16xf32>
    %396 = vector.broadcast %385 : f32 to vector<1x16xf32>
    %397 = arith.mulf %396, %395 : vector<1x16xf32>
    %398 = vector.broadcast %397 : vector<1x16xf32> to vector<2x16xf32>
    %399 = arith.addf %394, %398 : vector<2x16xf32>
    %400 = arith.addf %399, %392 : vector<2x16xf32>
    %c0_153 = arith.constant 0 : index
    %c0_154 = arith.constant 0 : index
    %401 = vector.load %arg18[%c0_153, %c0_154] : memref<2x16xf32, #tpu.memory_space<vmem>>, vector<2x16xf32>
    tpu.vector_store %arg18[%c0_153, %c0_154], %400 {strides = array<i32>} : memref<2x16xf32, #tpu.memory_space<vmem>>, vector<2x16xf32>,
    return
  }
}

</mosaic_0001>

<bundles_post_ra>
// kernel: tpu_custom_call.1
= control target key start
LH: loop header
LB: loop body
LE: loop exit
PB: predicated region body
PF: predicated region fallthrough
CT: control target
= control target key end

     0   :  { %s4912_s0 = inlined_call_operand.vmem [shape: f32[32,3], index: 0, kind: input, shape index: {}]   ;;  %s4913_s1 = inlined_call_operand.vmem [shape: f32[3,32], index: 1, kind: input, shape index: {}]   ;;  %s4914_s2 = inlined_call_operand.vmem [shape: f32[1,32], index: 2, kind: input, shape index: {}]   ;;  %s4915_s3 = inlined_call_operand.vmem [shape: f32[1,32], index: 3, kind: input, shape index: {}]   ;;  %s4916_s4 = inlined_call_operand.vmem [shape: f32[1,32], index: 4, kind: input, shape index: {}]   ;;  %s4917_s5 = inlined_call_operand.vmem [shape: f32[32,32], index: 5, kind: input, shape index: {}]   ;;  %s4918_s6 = inlined_call_operand.vmem [shape: f32[1,32], index: 6, kind: input, shape index: {}]   ;;  %s4919_s7 = inlined_call_operand.vmem [shape: f32[1,32], index: 7, kind: input, shape index: {}]   ;;  %s4920_s8 = inlined_call_operand.vmem [shape: f32[1,32], index: 8, kind: input, shape index: {}]   ;;  %s4921_s9 = inlined_call_operand.vmem [shape: f32[3,32,16], index: 9, kind: input, shape index: {}]   ;;  %s4922_s10 = inlined_call_operand.vmem [shape: f32[3,1,16], index: 10, kind: input, shape index: {}]   ;;  %s4923_s11 = inlined_call_operand.vmem [shape: f32[3,1,16], index: 11, kind: input, shape index: {}]   ;;  %s4924_s12 = inlined_call_operand.vmem [shape: f32[3,1,16], index: 12, kind: input, shape index: {}]   ;;  %s4925_s13 = inlined_call_operand.vmem [shape: f32[16,48], index: 13, kind: input, shape index: {}]   ;;  %s4926_s14 = inlined_call_operand.vmem [shape: f32[1,48], index: 14, kind: input, shape index: {}]   ;;  %s4927_s15 = inlined_call_operand.vmem [shape: f32[16,16], index: 15, kind: input, shape index: {}]   ;;  %s4928_s16 = inlined_call_operand.vmem [shape: f32[1,16], index: 16, kind: input, shape index: {}]   ;;  %s4929_s17 = inlined_call_operand.vmem [shape: f32[1,3], index: 17, kind: input, shape index: {}]   ;;  %s4930_s18 = inlined_call_operand.hbm [shape: f32[2,16], index: 18, kind: output, shape index: {}]  }
   0x1   :  { %4942 = sst [smem:[#allocation17_spill]] %s4912_s0 }
   0x2   :  { %4943 = sst [smem:[#allocation18_spill]] %s4913_s1 }
   0x3   :  { %4944 = sst [smem:[#allocation19_spill]] %s4914_s2 }
   0x4   :  { %23 = vsyncpa [#allocation4], 0 }
   0x5   :  { %24 = vsyncpa [#allocation3], 0  ;;  %s65_s29 = sshll.u32 %s4929_s17, 4  ;;  %s66_s29 = int_to_ptr.vmem [resolvable:$true] %s65_s29 }
   0x6   :  { %s3814_s30 = scalar_lea.vmem %s66_s29, 16  ;;  %p3819_p1 = scmp.lt.s32.totalorder %s66_s29, %s66_s29 }
   0x7   :  { %p3815_p0 = scmp.ne.s32.totalorder %s66_s29, %s3814_s30  ;;  %p3820_p2 = scmp.lt.s32.totalorder %s3814_s30, %s3814_s30 }
   0x9   :  { %p3821_p3 = por %p3820_p2, %p3819_p1 }
   0xb   :  { %p3822_p4 = pnand %p3821_p3, %p3815_p0 }
   0xd   :  { %3825 = shalt.err (!%p3822_p4)
}
   0xe   :  { %s3850_s0 = smov [#allocation2]  }
   0xf   :  { %68 = dma.vmem_to_smem %s66_s29, 16, %s3850_s0, [#allocation4]  }
  0x10   :  { %3846 = dma.done.wait [#allocation4], 16  }
  0x11   :  { %3847 = vsyncadd [#allocation4], 4294967280 }
  0x12   :  { %72 = sfence }
  0x13   :  { %s4945_s20 = sld [smem:[#allocation17_spill]]  ;;  %v3851_v1 = vmov 1   ;;  %v3852_v2 = vmov 0   ;;  %v3853_v5 = vmov 2   ;;  %v250_v7 = vld [vmem:[%s4917_s5 + $0x10] sm:$0xff]  ;;  %v251_v8 = vld [vmem:[%s4917_s5 + $0x18] sm:$0xff]  ;;  %v99_v13 = vlaneseq }
  0x14   :  { %3701 = vset.pattern.permute.xlu1 %v3851_v1  ;;  %3700 = vset.pattern.permute.xlu0 %v3852_v2  ;;  %v248_v9 = vld [vmem:[%s4917_s5] sm:$0xff]  ;;  %v255_v10 = vpack.c.bf16 %v251_v8, %v250_v7  ;;  %v249_v11 = vld [vmem:[%s4917_s5 + $0x8] sm:$0xff]  ;;  %s4947_s17 = sld [smem:[#allocation18_spill]]  ;;  %vm176_vm0 = vcmask 261120   ;;  %vm466_vm1 = vcmask 130048   ;;  %vm3139_vm2 = vcmask 1041409  }
  0x15   :  { %v254_v12 = vpack.c.bf16 %v249_v11, %v248_v9  ;;  %v3981_v16 = vshrl.u32 %v99_v13, 7  ;;  %s4948_s22 = sld [smem:[#allocation19_spill]]  ;;  %vm3855_vm3 = vmmov 0   ;;  %s3856_s19 = smov 112   ;;  %vm3218_vm4 = vcmask 123904  }
  0x16   :  { %3418 = vmatprep.subr.bf16.mxu0 %v255_v10  ;;  %s4230_s29 = sld [smem:[#allocation2 + $0x2]] }
  0x17   :  { %3419 = vmatpush3.bf16.msra.mxu0 %v255_v10  ;;  %4946 = vst [vmem:[#allocation8_spill] sm:$0xff] %v3981_v16  ;;  %v125_v19 = vsub.s32 1, %v3981_v16  ;;  %v4932_v20 = vsub.s32 0, %v3981_v16  ;;  %v153_v22 = vsub.s32 2, %v3981_v16 }
  0x18   :  { %3420 = vmatprep.subr.bf16.mxu0 %v254_v12 }
  0x19   :  { %v74_v0 = vld [vmem:[%s4945_s20] sm:$0xff]  ;;  %v75_v3 = vld [vmem:[%s4945_s20 + $0x8] sm:$0xff]  ;;  %v76_v4 = vld [vmem:[%s4945_s20 + $0x10] sm:$0xff] }
  0x1a   :  { %108 = vperm.xlu1 %3701, %v74_v0   ;;  %81 = vperm.xlu0 %3700, %v74_v0   ;;  %v77_v6 = vld [vmem:[%s4945_s20 + $0x18] sm:$0xff]  ;;  %v78_v21 = vld [vmem:[%s4947_s17] sm:$0x7] }
  0x1b   :  { %3421 = vmatpush3.bf16.msra.mxu0 %v254_v12  ;;  %v126_v25 = vrot.slane %v78_v21, %v125_v19  ;;  %v102_v26 = vrot.slane %v78_v21, %v4932_v20  ;;  %v154_v27 = vrot.slane %v78_v21, %v153_v22  ;;  %v3235_v42 = vld [vmem:[%s4948_s22] ss:$0 sm:$0xff] }
  0x1e   :  { %112 = vperm.xlu1 %3701, %v75_v3   ;;  %86 = vperm.xlu0 %3700, %v75_v3  }
  0x22   :  { %116 = vperm.xlu1 %3701, %v76_v4   ;;  %91 = vperm.xlu0 %3700, %v76_v4  }
  0x26   :  { %3703 = vset.pattern.permute.xlu1 %v3853_v5  ;;  %3702 = vset.pattern.permute.xlu0 %v3853_v5 }
  0x27   :  { %140 = vperm.xlu1 %3703, %v75_v3   ;;  %136 = vperm.xlu0 %3702, %v74_v0  }
  0x2b   :  { %3704 = vset.pattern.permute.xlu1 %v3852_v2  ;;  %3705 = vset.pattern.permute.xlu0 %v3851_v1 }
  0x2c   :  { %96 = vperm.xlu1 %3704, %v77_v6   ;;  %120 = vperm.xlu0 %3705, %v77_v6  }
  0x30   :  { %3706 = vset.pattern.permute.xlu1 %v3853_v5  ;;  %3707 = vset.pattern.permute.xlu0 %v3853_v5 }
  0x31   :  { %144 = vperm.xlu1 %3706, %v76_v4  }
  0x35   :  { %148 = vperm.xlu1 %3706, %v77_v6  }
  0x95   :  { %v109_v14 = vpop.permute.xlu1 %108  ;;  %v82_v15 = vpop.permute.xlu0 %81 }
  0x96   :  { %v127_v32 = vmul.f32 %v126_v25, %v109_v14  ;;  %v103_v33 = vmul.f32 %v102_v26, %v82_v15 }
  0x98   :  { %v131_v37 = vadd.f32 %v127_v32, %v103_v33 }
  0x99   :  { %v113_v17 = vpop.permute.xlu1 %112  ;;  %v87_v18 = vpop.permute.xlu0 %86 }
  0x9a   :  { %v128_v28 = vmul.f32 %v126_v25, %v113_v17  ;;  %v104_v29 = vmul.f32 %v102_v26, %v87_v18 }
  0x9c   :  { %v132_v36 = vadd.f32 %v128_v28, %v104_v29 }
  0x9d   :  { %v117_v23 = vpop.permute.xlu1 %116  ;;  %v92_v24 = vpop.permute.xlu0 %91 }
  0x9e   :  { %v129_v39 = vmul.f32 %v126_v25, %v117_v23  ;;  %v105_v40 = vmul.f32 %v102_v26, %v92_v24 }
  0xa0   :  { %v133_v45 = vadd.f32 %v129_v39, %v105_v40  ;;  %v3237_v40 = vld [vmem:[%s4916_s4] ss:$0 sm:$0xff] }
  0xa2   :  { %v141_v30 = vpop.permute.xlu1 %140  ;;  %v137_v31 = vpop.permute.xlu0 %136 }
  0xa3   :  { %v156_v34 = vmul.f32 %v154_v27, %v141_v30  ;;  %v155_v35 = vmul.f32 %v154_v27, %v137_v31 }
  0xa5   :  { %v160_v41 = vadd.f32 %v156_v34, %v132_v36  ;;  %v159_v43 = vadd.f32 %v155_v35, %v131_v37  ;;  %v3236_v35 = vld [vmem:[%s4915_s3] ss:$0 sm:$0xff]  ;;  %s4204_s3 = sld [smem:[#allocation2 + $0x1]] }
  0xa7   :  { %v97_v38 = vpop.permute.xlu1 %96  ;;  %v121_v44 = vpop.permute.xlu0 %120  ;;  %v171_v46 = vadd.f32 %v3235_v42, %v160_v41  ;;  %v170_v48 = vadd.f32 %v3235_v42, %v159_v43 }
  0xa8   :  { %v106_v49 = vmul.f32 %v102_v26, %v97_v38  ;;  %v130_v50 = vmul.f32 %v126_v25, %v121_v44 }
  0xa9   :  { %v178_v53 = vsel %vm176_vm0, %v171_v46, 0.0  ;;  %v177_v55 = vsel %vm176_vm0, %v170_v48, 0.0 }
  0xaa   :  { %v134_v56 = vadd.f32 %v130_v50, %v106_v49  ;;  %v179_v61 = vadd.f32 %v178_v53, %v177_v55 }
  0xac   :  { %v145_v47 = vpop.permute.xlu1 %144 }
  0xad   :  { %v157_v51 = vmul.f32 %v154_v27, %v145_v47 }
  0xaf   :  { %v161_v52 = vadd.f32 %v157_v51, %v133_v45 }
  0xb0   :  { %v149_v54 = vpop.permute.xlu1 %148 }
  0xb1   :  { %v172_v57 = vadd.f32 %v3235_v42, %v161_v52  ;;  %v158_v58 = vmul.f32 %v154_v27, %v149_v54 }
  0xb3   :  { %v180_v59 = vsel %vm176_vm0, %v172_v57, 0.0  ;;  %v162_v60 = vadd.f32 %v158_v58, %v134_v56 }
  0xb4   :  { %v181_v63 = vadd.f32 %v180_v59, %v179_v61  ;;  %v396_v59 = vld [vmem:[%s4921_s9 + $0x10] sm:$0xff]  ;;  %v394_v61 = vld [vmem:[%s4921_s9] sm:$0xff] }
  0xb5   :  { %v173_v62 = vadd.f32 %v3235_v42, %v162_v60  ;;  %v397_v60 = vld [vmem:[%s4921_s9 + $0x18] sm:$0xff] }
  0xb7   :  { %v182_v0 = vsel %vm176_vm0, %v173_v62, 0.0 }
  0xb8   :  { %v183_v1 = vadd.f32 %v182_v0, %v181_v63  ;;  %v395_v63 = vld [vmem:[%s4921_s9 + $0x8] sm:$0xff] }
  0xb9   :  { %v400_v0 = vpack.c.bf16 %v395_v63, %v394_v61 }
  0xba   :  { %v184_v2 = vrot.slane %v183_v1, 4 }
  0xbc   :  { %v185_v3 = vadd.f32 %v184_v2, %v183_v1  ;;  %v3253_v1 = vld [vmem:[%s4921_s9 + $0x30] sm:$0xff]  ;;  %v3254_v2 = vld [vmem:[%s4921_s9 + $0x38] sm:$0xff] }
  0xbe   :  { %v186_v4 = vrot.slane %v185_v3, 2 }
  0xc0   :  { %v187_v5 = vadd.f32 %v186_v4, %v185_v3  ;;  %v4040_v3 = vpack.c.bf16 %v3254_v2, %v3253_v1 }
  0xc2   :  { %v188_v6 = vrot.slane %v187_v5, 1 }
  0xc4   :  { %v189_v7 = vadd.f32 %v188_v6, %v187_v5  ;;  %v3238_v6 = vld [vmem:[%s4918_s6] ss:$0 sm:$0xff]  ;;  %s3858_s6 = smov [#allocation5]  }
  0xc5   :  { %s3226_s22 = sshll.u32 %s3858_s6, 4  ;;  %s3227_s22 = int_to_ptr.vmem [resolvable:$true] %s3226_s22 }
  0xc6   :  { %v191_v8 = vmul.f32 0.03125, %v189_v7  ;;  %p3831_p6 = scmp.lt.s32.totalorder %s3227_s22, %s3227_s22 }
  0xc8   :  { %v192_v9 = vsub.f32 %v170_v48, %v191_v8  ;;  %v193_v10 = vsub.f32 %v171_v46, %v191_v8  ;;  %v194_v11 = vsub.f32 %v172_v57, %v191_v8  ;;  %v195_v12 = vsub.f32 %v173_v62, %v191_v8 }
  0xc9   :  { %v401_v62 = vpack.c.bf16 %v397_v60, %v396_v59 }
  0xca   :  { %v196_v13 = vmul.f32 %v192_v9, %v192_v9  ;;  %v197_v14 = vmul.f32 %v193_v10, %v193_v10  ;;  %v198_v15 = vmul.f32 %v194_v11, %v194_v11  ;;  %v199_v17 = vmul.f32 %v195_v12, %v195_v12 }
  0xcb   :  { %3426 = vmatprep.subr.bf16.mxu1 %v401_v62 }
  0xcc   :  { %v200_v18 = vsel %vm176_vm0, %v196_v13, 0.0  ;;  %v201_v19 = vsel %vm176_vm0, %v197_v14, 0.0  ;;  %v203_v22 = vsel %vm176_vm0, %v198_v15, 0.0  ;;  %v205_v24 = vsel %vm176_vm0, %v199_v17, 0.0  ;;  %3427 = vmatpush3.bf16.msra.mxu1 %v401_v62  ;;  %v3242_v62 = vld [vmem:[%s4920_s8] ss:$0 sm:$0xff] }
  0xcd   :  { %v202_v21 = vadd.f32 %v201_v19, %v200_v18  ;;  %3428 = vmatprep.subr.bf16.mxu1 %v400_v0  ;;  %s4199_s8 = sld [smem:[#allocation2]] }
  0xcf   :  { %v204_v23 = vadd.f32 %v203_v22, %v202_v21 }
  0xd0   :  { %3429 = vmatpush3.bf16.msra.mxu1 %v400_v0 }
  0xd1   :  { %v206_v25 = vadd.f32 %v205_v24, %v204_v23  ;;  %3440 = vmatprep.subr.bf16.mxu1 %v4040_v3 }
  0xd3   :  { %v207_v26 = vrot.slane %v206_v25, 4 }
  0xd5   :  { %v208_v27 = vadd.f32 %v207_v26, %v206_v25 }
  0xd7   :  { %v209_v28 = vrot.slane %v208_v27, 2 }
  0xd9   :  { %v210_v29 = vadd.f32 %v209_v28, %v208_v27 }
  0xdb   :  { %v211_v30 = vrot.slane %v210_v29, 1 }
  0xdd   :  { %v212_v31 = vadd.f32 %v211_v30, %v210_v29 }
  0xdf   :  { %v213_v32 = vmul.f32 0.03125, %v212_v31 }
  0xe1   :  { %v214_v33 = vadd.f32 1e-05, %v213_v32 }
  0xe3   :  { %3708 = vrsqrt.f32 %v214_v33 }
  0xf0   :  { %v3709_v34 = vpop.eup %3708 }
  0xf1   :  { %v219_v36 = vmul.f32 %v3709_v34, %v195_v12  ;;  %v216_v37 = vmul.f32 %v3709_v34, %v192_v9  ;;  %v217_v38 = vmul.f32 %v3709_v34, %v193_v10  ;;  %v218_v39 = vmul.f32 %v3709_v34, %v194_v11 }
  0xf3   :  { %v229_v41 = vmul.f32 %v3236_v35, %v219_v36  ;;  %v226_v42 = vmul.f32 %v3236_v35, %v216_v37  ;;  %v227_v43 = vmul.f32 %v3236_v35, %v217_v38  ;;  %v228_v44 = vmul.f32 %v3236_v35, %v218_v39 }
  0xf5   :  { %v236_v45 = vadd.f32 %v3237_v40, %v226_v42  ;;  %v237_v46 = vadd.f32 %v3237_v40, %v227_v43  ;;  %v238_v47 = vadd.f32 %v3237_v40, %v228_v44  ;;  %v239_v48 = vadd.f32 %v3237_v40, %v229_v41 }
  0xf7   :  { %v240_v49 = vmul.f32 0.1, %v236_v45  ;;  %v241_v50 = vmul.f32 0.1, %v237_v46  ;;  %v242_v51 = vmul.f32 0.1, %v238_v47 }
  0xf8   :  { %v243_v52 = vmul.f32 0.1, %v239_v48 }
  0xf9   :  { %v4008_v53 = vmax.f32 %v236_v45, %v240_v49  ;;  %v4010_v54 = vmax.f32 %v237_v46, %v241_v50  ;;  %v4012_v55 = vmax.f32 %v238_v47, %v242_v51 }
  0xfa   :  { %v4014_v56 = vmax.f32 %v239_v48, %v243_v52 }
  0xfb   :  { %v252_v57 = vpack.c.bf16 %v4010_v54, %v4008_v53 }
  0xfc   :  { %v253_v58 = vpack.c.bf16 %v4014_v56, %v4012_v55 }
  0xfd   :  { %3422 = vmatprep.mubr.msk.bf16.mxu0 %vm176_vm0, %v252_v57  ;;  %v3241_v57 = vld [vmem:[%s4919_s7] ss:$0 sm:$0xff] }
  0xfe   :  { %3423 = vmatmul.mubr.msk.bf16.vlgmr.msra.gmra.mxu0 %vm176_vm0, %v253_v58 }
 0x1be   :  { %v3424_v4 = vpop.f32.mrf.mxu0 }
 0x1bf   :  { %v312_v10 = vadd.f32 %v3424_v4, %v3238_v6 }
 0x1c0   :  { %v303_v5 = vpop.f32.mrf.mxu0 }
 0x1c1   :  { %v304_v8 = vadd.f32 %v3238_v6, %v303_v5  ;;  %v323_v17 = vsel %vm176_vm0, %v312_v10, 0.0 }
 0x1c2   :  { %v3425_v7 = vpop.f32.mrf.mxu0 }
 0x1c3   :  { %v320_v12 = vsel %vm176_vm0, %v304_v8, 0.0  ;;  %v315_v13 = vadd.f32 %v3425_v7, %v3238_v6 }
 0x1c4   :  { %v306_v9 = vpop.f32.mrf.mxu0 }
 0x1c5   :  { %v307_v11 = vadd.f32 %v3238_v6, %v306_v9  ;;  %v325_v19 = vsel %vm176_vm0, %v315_v13, 0.0 }
 0x1c7   :  { %v321_v14 = vsel %vm176_vm0, %v307_v11, 0.0 }
 0x1c8   :  { %v322_v15 = vadd.f32 %v321_v14, %v320_v12 }
 0x1ca   :  { %v324_v18 = vadd.f32 %v323_v17, %v322_v15 }
 0x1cc   :  { %v326_v21 = vadd.f32 %v325_v19, %v324_v18 }
 0x1ce   :  { %v327_v22 = vrot.slane %v326_v21, 4 }
 0x1d0   :  { %v328_v23 = vadd.f32 %v327_v22, %v326_v21  ;;  %v3251_v21 = vld [vmem:[%s4921_s9 + $0x20] sm:$0xff]  ;;  %v3252_v22 = vld [vmem:[%s4921_s9 + $0x28] sm:$0xff] }
 0x1d2   :  { %v329_v24 = vrot.slane %v328_v23, 2 }
 0x1d4   :  { %v330_v25 = vadd.f32 %v329_v24, %v328_v23 }
 0x1d6   :  { %v331_v26 = vrot.slane %v330_v25, 1 }
 0x1d8   :  { %v332_v27 = vadd.f32 %v331_v26, %v330_v25  ;;  %v611_v26 = vpack.c.bf16 %v3252_v22, %v3251_v21 }
 0x1da   :  { %v333_v28 = vmul.f32 0.03125, %v332_v27  ;;  %v3266_v27 = vld [vmem:[%s4921_s9 + $0x48] sm:$0xff] }
 0x1dc   :  { %v334_v29 = vsub.f32 %v304_v8, %v333_v28  ;;  %v335_v30 = vsub.f32 %v307_v11, %v333_v28  ;;  %v336_v31 = vsub.f32 %v312_v10, %v333_v28  ;;  %v337_v32 = vsub.f32 %v315_v13, %v333_v28 }
 0x1de   :  { %v338_v33 = vmul.f32 %v334_v29, %v334_v29  ;;  %v339_v34 = vmul.f32 %v335_v30, %v335_v30  ;;  %v340_v35 = vmul.f32 %v336_v31, %v336_v31  ;;  %v341_v36 = vmul.f32 %v337_v32, %v337_v32 }
 0x1e0   :  { %v342_v37 = vsel %vm176_vm0, %v338_v33, 0.0  ;;  %v343_v38 = vsel %vm176_vm0, %v339_v34, 0.0  ;;  %v345_v40 = vsel %vm176_vm0, %v340_v35, 0.0  ;;  %v347_v42 = vsel %vm176_vm0, %v341_v36, 0.0  ;;  %v3243_v33 = vld [vmem:[%s4922_s10] ss:$0 sm:$0xff] }
 0x1e1   :  { %v344_v39 = vadd.f32 %v343_v38, %v342_v37 }
 0x1e3   :  { %v346_v41 = vadd.f32 %v345_v40, %v344_v39 }
 0x1e5   :  { %v348_v43 = vadd.f32 %v347_v42, %v346_v41 }
 0x1e7   :  { %v349_v44 = vrot.slane %v348_v43, 4 }
 0x1e9   :  { %v350_v45 = vadd.f32 %v349_v44, %v348_v43 }
 0x1eb   :  { %v351_v46 = vrot.slane %v350_v45, 2 }
 0x1ed   :  { %v352_v47 = vadd.f32 %v351_v46, %v350_v45 }
 0x1ef   :  { %v353_v48 = vrot.slane %v352_v47, 1 }
 0x1f1   :  { %v354_v49 = vadd.f32 %v353_v48, %v352_v47  ;;  %v3256_v47 = vld [vmem:[%s4922_s10 + $0x1] ss:$0 sm:$0xff] }
 0x1f3   :  { %v355_v50 = vmul.f32 0.03125, %v354_v49 }
 0x1f5   :  { %v356_v51 = vadd.f32 1e-05, %v355_v50 }
 0x1f7   :  { %3710 = vrsqrt.f32 %v356_v51 }
 0x204   :  { %v3711_v52 = vpop.eup %3710 }
 0x205   :  { %v359_v58 = vmul.f32 %v3711_v52, %v335_v30  ;;  %v360_v59 = vmul.f32 %v3711_v52, %v336_v31  ;;  %v361_v60 = vmul.f32 %v3711_v52, %v337_v32  ;;  %v358_v61 = vmul.f32 %v3711_v52, %v334_v29  ;;  %v538_v29 = vld [vmem:[%s4925_s13 + $0x8] sm:$0xff] }
 0x207   :  { %v369_v63 = vmul.f32 %v3241_v57, %v359_v58  ;;  %v370_v0 = vmul.f32 %v3241_v57, %v360_v59  ;;  %v371_v1 = vmul.f32 %v3241_v57, %v361_v60  ;;  %v368_v2 = vmul.f32 %v3241_v57, %v358_v61 }
 0x209   :  { %v379_v4 = vadd.f32 %v3242_v62, %v369_v63  ;;  %v378_v5 = vadd.f32 %v3242_v62, %v368_v2  ;;  %v380_v6 = vadd.f32 %v3242_v62, %v370_v0  ;;  %v381_v7 = vadd.f32 %v3242_v62, %v371_v1 }
 0x20b   :  { %v382_v8 = vmul.f32 0.1, %v378_v5  ;;  %v383_v9 = vmul.f32 0.1, %v379_v4  ;;  %v384_v10 = vmul.f32 0.1, %v380_v6 }
 0x20c   :  { %v385_v11 = vmul.f32 0.1, %v381_v7 }
 0x20d   :  { %v386_v12 = vmax.f32 %v378_v5, %v382_v8  ;;  %v387_v13 = vmax.f32 %v379_v4, %v383_v9  ;;  %v388_v14 = vmax.f32 %v380_v6, %v384_v10 }
 0x20e   :  { %v389_v15 = vmax.f32 %v381_v7, %v385_v11  ;;  %v3270_v7 = vld [vmem:[%s4922_s10 + $0x2] ss:$0 sm:$0xff]  ;;  %s3826_s10 = scalar_lea.vmem %s3227_s22, 32 }
 0x20f   :  { %v390_v17 = vadd.f32 %v386_v12, %v4008_v53  ;;  %v391_v18 = vadd.f32 %v387_v13, %v4010_v54  ;;  %v392_v19 = vadd.f32 %v388_v14, %v4012_v55  ;;  %v3267_v53 = vld [vmem:[%s4921_s9 + $0x50] sm:$0xff]  ;;  %v3268_v54 = vld [vmem:[%s4921_s9 + $0x58] sm:$0xff]  ;;  %p3827_p5 = scmp.ne.s32.totalorder %s3227_s22, %s3826_s10  ;;  %p3832_p7 = scmp.lt.s32.totalorder %s3826_s10, %s3826_s10 }
 0x210   :  { %v393_v23 = vadd.f32 %v389_v15, %v4014_v56  ;;  %v809_v55 = vpack.c.bf16 %v3268_v54, %v3267_v53  ;;  %v3265_v56 = vld [vmem:[%s4921_s9 + $0x40] sm:$0xff] }
 0x211   :  { %v398_v24 = vpack.c.bf16 %v391_v18, %v390_v17  ;;  %v808_v28 = vpack.c.bf16 %v3266_v27, %v3265_v56  ;;  %p3833_p8 = por %p3832_p7, %p3831_p6 }
 0x212   :  { %v399_v25 = vpack.c.bf16 %v393_v23, %v392_v19 }
 0x213   :  { %3430 = vmatprep.mubr.msk.bf16.mxu1 %vm176_vm0, %v398_v24  ;;  %p3834_p9 = pnand %p3833_p8, %p3827_p5 }
 0x214   :  { %3431 = vmatmul.mubr.msk.bf16.vlgmr.msra.gmra.mxu1 %vm176_vm0, %v399_v25 }
 0x215   :  { %3441 = vmatpush3.bf16.msra.mxu1 %v4040_v3  ;;  %3444 = vmatprep.mubr.msk.bf16.mxu1 %vm176_vm0, %v398_v24  ;;  %v537_v3 = vld [vmem:[%s4925_s13] sm:$0xff] }
 0x216   :  { %3442 = vmatprep.subr.bf16.mxu1 %v611_v26  ;;  %v4095_v30 = vpack.c.bf16 %v538_v29, %v537_v3 }
 0x218   :  { %3434 = vmatprep.subr.bf16.mxu0 %v4095_v30 }
 0x219   :  { %3443 = vmatpush3.bf16.msra.mxu1 %v611_v26  ;;  %3435 = vmatpush3.bf16.msra.mxu0 %v4095_v30 }
 0x21a   :  { %3454 = vmatprep.subr.bf16.mxu1 %v809_v55  ;;  %3448 = vmatprep.subr.bf16.mxu0 %v4095_v30 }
 0x21c   :  { %3445 = vmatmul.mubr.msk.bf16.vlgmr.msra.gmra.mxu1 %vm176_vm0, %v399_v25 }
 0x21d   :  { %3455 = vmatpush3.bf16.msra.mxu1 %v809_v55  ;;  %3458 = vmatprep.mubr.msk.bf16.mxu1 %vm176_vm0, %v398_v24 }
 0x21e   :  { %3456 = vmatprep.subr.bf16.mxu1 %v808_v28 }
 0x221   :  { %3457 = vmatpush3.bf16.msra.mxu1 %v808_v28 }
 0x224   :  { %3459 = vmatmul.mubr.msk.bf16.vlgmr.msra.gmra.mxu1 %vm176_vm0, %v399_v25 }
 0x2d4   :  { %v3432_v31 = vpop.f32.mrf.mxu1 }
 0x2d5   :  { %v458_v37 = vadd.f32 %v3432_v31, %v3243_v33 }
 0x2d6   :  { %v449_v32 = vpop.f32.mrf.mxu1 }
 0x2d7   :  { %v450_v35 = vadd.f32 %v3243_v33, %v449_v32  ;;  %v470_v45 = vsel %vm466_vm1, %v458_v37, 0.0 }
 0x2d8   :  { %v3433_v34 = vpop.f32.mrf.mxu1 }
 0x2d9   :  { %v467_v40 = vsel %vm466_vm1, %v450_v35, 0.0  ;;  %v461_v41 = vadd.f32 %v3433_v34, %v3243_v33 }
 0x2da   :  { %v452_v36 = vpop.f32.mrf.mxu1 }
 0x2db   :  { %v453_v38 = vadd.f32 %v3243_v33, %v452_v36  ;;  %v472_v49 = vsel %vm466_vm1, %v461_v41, 0.0 }
 0x2dc   :  { %v3446_v39 = vpop.f32.mrf.mxu1 }
 0x2dd   :  { %v468_v42 = vsel %vm466_vm1, %v453_v38, 0.0  ;;  %v664_v57 = vadd.f32 %v3446_v39, %v3256_v47 }
 0x2de   :  { %v469_v43 = vadd.f32 %v468_v42, %v467_v40  ;;  %v655_v44 = vpop.f32.mrf.mxu1 }
 0x2df   :  { %v656_v50 = vadd.f32 %v3256_v47, %v655_v44  ;;  %v677_v4 = vsel %vm466_vm1, %v664_v57, 0.0 }
 0x2e0   :  { %v471_v46 = vadd.f32 %v470_v45, %v469_v43  ;;  %v3447_v48 = vpop.f32.mrf.mxu1 }
 0x2e1   :  { %v674_v61 = vsel %vm466_vm1, %v656_v50, 0.0  ;;  %v667_v62 = vadd.f32 %v3447_v48, %v3256_v47 }
 0x2e2   :  { %v473_v51 = vadd.f32 %v472_v49, %v471_v46  ;;  %v658_v52 = vpop.f32.mrf.mxu1 }
 0x2e3   :  { %v659_v58 = vadd.f32 %v3256_v47, %v658_v52  ;;  %v679_v9 = vsel %vm466_vm1, %v667_v62, 0.0 }
 0x2e4   :  { %v474_v59 = vrot.slane %v473_v51, 4  ;;  %v3460_v60 = vpop.f32.mrf.mxu1 }
 0x2e5   :  { %v675_v63 = vsel %vm466_vm1, %v659_v58, 0.0  ;;  %v4119_v14 = vadd.f32 %v3460_v60, %v3270_v7 }
 0x2e6   :  { %v475_v0 = vadd.f32 %v474_v59, %v473_v51  ;;  %v676_v1 = vadd.f32 %v675_v63, %v674_v61  ;;  %v852_v2 = vpop.f32.mrf.mxu1 }
 0x2e7   :  { %v4117_v10 = vadd.f32 %v3270_v7, %v852_v2  ;;  %v874_v26 = vsel %vm466_vm1, %v4119_v14, 0.0 }
 0x2e8   :  { %v476_v5 = vrot.slane %v475_v0, 2  ;;  %v678_v6 = vadd.f32 %v677_v4, %v676_v1  ;;  %v3461_v8 = vpop.f32.mrf.mxu1 }
 0x2e9   :  { %v871_v19 = vsel %vm466_vm1, %v4117_v10, 0.0  ;;  %v864_v21 = vadd.f32 %v3461_v8, %v3270_v7 }
 0x2ea   :  { %v477_v11 = vadd.f32 %v476_v5, %v475_v0  ;;  %v680_v12 = vadd.f32 %v679_v9, %v678_v6  ;;  %v855_v13 = vpop.f32.mrf.mxu1 }
 0x2eb   :  { %v856_v15 = vadd.f32 %v3270_v7, %v855_v13  ;;  %v876_v56 = vsel %vm466_vm1, %v864_v21, 0.0 }
 0x2ec   :  { %v478_v17 = vrot.slane %v477_v11, 1  ;;  %v681_v18 = vrot.slane %v680_v12, 4 }
 0x2ed   :  { %v872_v22 = vsel %vm466_vm1, %v856_v15, 0.0 }
 0x2ee   :  { %v479_v23 = vadd.f32 %v478_v17, %v477_v11  ;;  %v682_v24 = vadd.f32 %v681_v18, %v680_v12  ;;  %v873_v25 = vadd.f32 %v872_v22, %v871_v19 }
 0x2f0   :  { %v480_v53 = vmul.f32 0.03125, %v479_v23  ;;  %v683_v54 = vrot.slane %v682_v24, 2  ;;  %v875_v55 = vadd.f32 %v874_v26, %v873_v25 }
 0x2f2   :  { %v4127_v27 = vsub.f32 %v450_v35, %v480_v53  ;;  %v4129_v28 = vsub.f32 %v453_v38, %v480_v53  ;;  %v4131_v3 = vsub.f32 %v458_v37, %v480_v53  ;;  %v4133_v29 = vsub.f32 %v461_v41, %v480_v53 }
 0x2f3   :  { %v684_v31 = vadd.f32 %v683_v54, %v682_v24  ;;  %v877_v32 = vadd.f32 %v876_v56, %v875_v55 }
 0x2f4   :  { %v485_v33 = vmul.f32 %v4127_v27, %v4127_v27  ;;  %v486_v34 = vmul.f32 %v4129_v28, %v4129_v28  ;;  %v487_v36 = vmul.f32 %v4131_v3, %v4131_v3  ;;  %v488_v38 = vmul.f32 %v4133_v29, %v4133_v29 }
 0x2f5   :  { %v685_v39 = vrot.slane %v684_v31, 1  ;;  %v878_v35 = vrot.slane %v877_v32, 4 }
 0x2f6   :  { %v489_v37 = vsel %vm466_vm1, %v485_v33, 0.0  ;;  %v490_v40 = vsel %vm466_vm1, %v486_v34, 0.0  ;;  %v492_v44 = vsel %vm466_vm1, %v487_v36, 0.0  ;;  %v494_v48 = vsel %vm466_vm1, %v488_v38, 0.0 }
 0x2f7   :  { %v491_v41 = vadd.f32 %v490_v40, %v489_v37  ;;  %v686_v42 = vadd.f32 %v685_v39, %v684_v31  ;;  %v879_v43 = vadd.f32 %v878_v35, %v877_v32 }
 0x2f9   :  { %v493_v45 = vadd.f32 %v492_v44, %v491_v41  ;;  %v687_v46 = vmul.f32 0.03125, %v686_v42  ;;  %v880_v47 = vrot.slane %v879_v43, 2 }
 0x2fb   :  { %v495_v49 = vadd.f32 %v494_v48, %v493_v45  ;;  %v4147_v51 = vsub.f32 %v656_v50, %v687_v46  ;;  %v4149_v52 = vsub.f32 %v659_v58, %v687_v46  ;;  %v4151_v59 = vsub.f32 %v664_v57, %v687_v46 }
 0x2fc   :  { %v4153_v60 = vsub.f32 %v667_v62, %v687_v46  ;;  %v881_v61 = vadd.f32 %v880_v47, %v879_v43 }
 0x2fd   :  { %v496_v63 = vrot.slane %v495_v49, 4  ;;  %v692_v0 = vmul.f32 %v4147_v51, %v4147_v51  ;;  %v693_v1 = vmul.f32 %v4149_v52, %v4149_v52  ;;  %v694_v2 = vmul.f32 %v4151_v59, %v4151_v59 }
 0x2fe   :  { %v882_v4 = vrot.slane %v881_v61, 1  ;;  %v695_v58 = vmul.f32 %v4153_v60, %v4153_v60 }
 0x2ff   :  { %v497_v50 = vadd.f32 %v496_v63, %v495_v49  ;;  %v696_v57 = vsel %vm466_vm1, %v692_v0, 0.0  ;;  %v697_v62 = vsel %vm466_vm1, %v693_v1, 0.0  ;;  %v699_v8 = vsel %vm466_vm1, %v694_v2, 0.0 }
 0x300   :  { %v698_v5 = vadd.f32 %v697_v62, %v696_v57  ;;  %v883_v6 = vadd.f32 %v882_v4, %v881_v61  ;;  %v701_v13 = vsel %vm466_vm1, %v695_v58, 0.0  ;;  %v3246_v61 = vld [vmem:[%s4923_s11] ss:$0 sm:$0xff] }
 0x301   :  { %v498_v7 = vrot.slane %v497_v50, 2  ;;  %v3247_v4 = vld [vmem:[%s4924_s12] ss:$0 sm:$0xff] }
 0x302   :  { %v700_v9 = vadd.f32 %v699_v8, %v698_v5  ;;  %v884_v11 = vmul.f32 0.03125, %v883_v6 }
 0x303   :  { %v499_v12 = vadd.f32 %v498_v7, %v497_v50 }
 0x304   :  { %v702_v17 = vadd.f32 %v701_v13, %v700_v9  ;;  %v4168_v18 = vsub.f32 %v4117_v10, %v884_v11  ;;  %v4170_v19 = vsub.f32 %v856_v15, %v884_v11  ;;  %v4173_v22 = vsub.f32 %v4119_v14, %v884_v11  ;;  %v3261_v13 = vld [vmem:[%s4923_s11 + $0x1] ss:$0 sm:$0xff] }
 0x305   :  { %v500_v23 = vrot.slane %v499_v12, 1  ;;  %v4175_v24 = vsub.f32 %v864_v21, %v884_v11 }
 0x306   :  { %v703_v25 = vrot.slane %v702_v17, 4  ;;  %v889_v26 = vmul.f32 %v4168_v18, %v4168_v18  ;;  %v890_v53 = vmul.f32 %v4170_v19, %v4170_v19  ;;  %v891_v54 = vmul.f32 %v4173_v22, %v4173_v22 }
 0x307   :  { %v501_v10 = vadd.f32 %v500_v23, %v499_v12  ;;  %v892_v15 = vmul.f32 %v4175_v24, %v4175_v24 }
 0x308   :  { %v704_v55 = vadd.f32 %v703_v25, %v702_v17  ;;  %v893_v14 = vsel %vm466_vm1, %v889_v26, 0.0  ;;  %v894_v21 = vsel %vm466_vm1, %v890_v53, 0.0  ;;  %v896_v33 = vsel %vm466_vm1, %v891_v54, 0.0 }
 0x309   :  { %v502_v56 = vmul.f32 0.03125, %v501_v10  ;;  %v895_v31 = vadd.f32 %v894_v21, %v893_v14  ;;  %v898_v35 = vsel %vm466_vm1, %v892_v15, 0.0 }
 0x30a   :  { %v705_v32 = vrot.slane %v704_v55, 2 }
 0x30b   :  { %v503_v34 = vadd.f32 1e-05, %v502_v56  ;;  %v897_v36 = vadd.f32 %v896_v33, %v895_v31 }
 0x30c   :  { %v706_v39 = vadd.f32 %v705_v32, %v704_v55  ;;  %v3262_v55 = vld [vmem:[%s4924_s12 + $0x1] ss:$0 sm:$0xff] }
 0x30d   :  { %3712 = vrsqrt.f32 %v503_v34  ;;  %v899_v38 = vadd.f32 %v898_v35, %v897_v36 }
 0x30e   :  { %v707_v37 = vrot.slane %v706_v39, 1 }
 0x30f   :  { %v900_v40 = vrot.slane %v899_v38, 4 }
 0x310   :  { %v708_v41 = vadd.f32 %v707_v37, %v706_v39  ;;  %v4220_v37 = vstv %s4204_s3 }
 0x311   :  { %v901_v42 = vadd.f32 %v900_v40, %v899_v38  ;;  %4950 = vst [vmem:[#allocation10_spill] sm:$0xff] %v4220_v37 }
 0x312   :  { %v709_v43 = vmul.f32 0.03125, %v708_v41 }
 0x313   :  { %v902_v44 = vrot.slane %v901_v42, 2 }
 0x314   :  { %v710_v45 = vadd.f32 1e-05, %v709_v43 }
 0x315   :  { %v903_v46 = vadd.f32 %v902_v44, %v901_v42 }
 0x316   :  { %3714 = vrsqrt.f32 %v710_v45  ;;  %v3275_v45 = vld [vmem:[%s4923_s11 + $0x2] ss:$0 sm:$0xff] }
 0x317   :  { %v904_v47 = vrot.slane %v903_v46, 1 }
 0x319   :  { %v905_v48 = vadd.f32 %v904_v47, %v903_v46 }
 0x31a   :  { %v3713_v49 = vpop.eup %3712 }
 0x31b   :  { %v505_v63 = vmul.f32 %v3713_v49, %v4127_v27  ;;  %v506_v0 = vmul.f32 %v3713_v49, %v4129_v28  ;;  %v507_v1 = vmul.f32 %v3713_v49, %v4131_v3  ;;  %v508_v2 = vmul.f32 %v3713_v49, %v4133_v29 }
 0x31c   :  { %v906_v50 = vmul.f32 0.03125, %v905_v48 }
 0x31d   :  { %v516_v58 = vmul.f32 %v3246_v61, %v506_v0  ;;  %v517_v57 = vmul.f32 %v3246_v61, %v507_v1  ;;  %v518_v62 = vmul.f32 %v3246_v61, %v508_v2  ;;  %v515_v5 = vmul.f32 %v3246_v61, %v505_v63  ;;  %v3276_v2 = vld [vmem:[%s4924_s12 + $0x2] ss:$0 sm:$0xff] }
 0x31e   :  { %v907_v6 = vadd.f32 1e-05, %v906_v50 }
 0x31f   :  { %v526_v7 = vadd.f32 %v3247_v4, %v516_v58  ;;  %v525_v8 = vadd.f32 %v3247_v4, %v515_v5  ;;  %v527_v9 = vadd.f32 %v3247_v4, %v517_v57  ;;  %v528_v27 = vadd.f32 %v3247_v4, %v518_v62 }
 0x320   :  { %3716 = vrsqrt.f32 %v907_v6 }
 0x321   :  { %v530_v28 = vmul.f32 0.1, %v526_v7  ;;  %v529_v3 = vmul.f32 0.1, %v525_v8  ;;  %v531_v29 = vmul.f32 0.1, %v527_v9 }
 0x322   :  { %v532_v11 = vmul.f32 0.1, %v528_v27 }
 0x323   :  { %v3715_v12 = vpop.eup %3714  ;;  %v533_v17 = vmax.f32 %v525_v8, %v529_v3  ;;  %v534_v23 = vmax.f32 %v526_v7, %v530_v28  ;;  %v535_v25 = vmax.f32 %v527_v9, %v531_v29 }
 0x324   :  { %v712_v26 = vmul.f32 %v3715_v12, %v4147_v51  ;;  %v713_v53 = vmul.f32 %v3715_v12, %v4149_v52  ;;  %v714_v54 = vmul.f32 %v3715_v12, %v4151_v59  ;;  %v715_v10 = vmul.f32 %v3715_v12, %v4153_v60 }
 0x325   :  { %v539_v15 = vpack.c.bf16 %v534_v23, %v533_v17  ;;  %v536_v14 = vmax.f32 %v528_v27, %v532_v11  ;;  %v4215_v59 = vstv %s4199_s8 }
 0x326   :  { %v723_v21 = vmul.f32 %v3261_v13, %v713_v53  ;;  %v724_v56 = vmul.f32 %v3261_v13, %v714_v54  ;;  %v725_v31 = vmul.f32 %v3261_v13, %v715_v10  ;;  %v722_v32 = vmul.f32 %v3261_v13, %v712_v26  ;;  %4949 = vst [vmem:[#allocation9_spill] sm:$0xff] %v4215_v59 }
 0x327   :  { %3436 = vmatprep.mubr.msk.bf16.mxu0 %vm466_vm1, %v539_v15  ;;  %v540_v51 = vpack.c.bf16 %v536_v14, %v535_v25  ;;  %v1722_v40 = vmul.f32 %v4215_v59, %v533_v17  ;;  %v1723_v46 = vmul.f32 %v4215_v59, %v534_v23  ;;  %v1724_v47 = vmul.f32 %v4215_v59, %v535_v25 }
 0x328   :  { %v733_v33 = vadd.f32 %v3262_v55, %v723_v21  ;;  %v734_v52 = vadd.f32 %v3262_v55, %v724_v56  ;;  %v735_v34 = vadd.f32 %v3262_v55, %v725_v31  ;;  %v732_v60 = vadd.f32 %v3262_v55, %v722_v32 }
 0x329   :  { %3437 = vmatmul.mubr.msk.bf16.vlgmr.msra.gmra.mxu0 %vm466_vm1, %v540_v51  ;;  %v1725_v48 = vmul.f32 %v4215_v59, %v536_v14  ;;  %v4247_v23 = vstv %s4230_s29 }
 0x32a   :  { %v737_v36 = vmul.f32 0.1, %v733_v33  ;;  %3449 = vmatpush3.bf16.msra.mxu0 %v4095_v30  ;;  %v738_v39 = vmul.f32 0.1, %v734_v52  ;;  %v739_v35 = vmul.f32 0.1, %v735_v34 }
 0x32b   :  { %v736_v38 = vmul.f32 0.1, %v732_v60  ;;  %3462 = vmatprep.subr.bf16.mxu0 %v4095_v30  ;;  %4951 = vst [vmem:[#allocation11_spill] sm:$0xff] %v4247_v23 }
 0x32c   :  { %v741_v41 = vmax.f32 %v733_v33, %v737_v36  ;;  %v742_v42 = vmax.f32 %v734_v52, %v738_v39  ;;  %v743_v43 = vmax.f32 %v735_v34, %v739_v35 }
 0x32d   :  { %v3717_v44 = vpop.eup %3716  ;;  %v740_v49 = vmax.f32 %v732_v60, %v736_v38 }
 0x32e   :  { %v909_v61 = vmul.f32 %v3717_v44, %v4168_v18  ;;  %v910_v63 = vmul.f32 %v3717_v44, %v4170_v19  ;;  %v911_v0 = vmul.f32 %v3717_v44, %v4173_v22  ;;  %v912_v1 = vmul.f32 %v3717_v44, %v4175_v24 }
 0x32f   :  { %v744_v4 = vpack.c.bf16 %v741_v41, %v740_v49  ;;  %v2399_v50 = vmul.f32 %v4220_v37, %v740_v49  ;;  %v2400_v58 = vmul.f32 %v4220_v37, %v741_v41  ;;  %v745_v57 = vpack.c.bf16 %v743_v43, %v742_v42 }
 0x330   :  { %v920_v62 = vmul.f32 %v3275_v45, %v910_v63  ;;  %v921_v5 = vmul.f32 %v3275_v45, %v911_v0  ;;  %v922_v6 = vmul.f32 %v3275_v45, %v912_v1  ;;  %v2401_v18 = vmul.f32 %v4220_v37, %v742_v42 }
 0x331   :  { %3450 = vmatprep.mubr.msk.bf16.mxu0 %vm466_vm1, %v744_v4  ;;  %v2403_v19 = vadd.f32 %v2399_v50, %v1722_v40  ;;  %v2404_v22 = vadd.f32 %v2400_v58, %v1723_v46  ;;  %v2402_v24 = vmul.f32 %v4220_v37, %v743_v43  ;;  %v919_v7 = vmul.f32 %v3275_v45, %v909_v61  ;;  %v3248_v4 = vld [vmem:[%s4926_s14] ss:$0 sm:$0xff]  ;;  %s3857_s14 = smov 96  }
 0x332   :  { %v930_v8 = vadd.f32 %v3276_v2, %v920_v62  ;;  %3451 = vmatmul.mubr.msk.bf16.vlgmr.msra.gmra.mxu0 %vm466_vm1, %v745_v57  ;;  %v2405_v9 = vadd.f32 %v2401_v18, %v1724_v47  ;;  %v931_v27 = vadd.f32 %v3276_v2, %v921_v5  ;;  %v932_v28 = vadd.f32 %v3276_v2, %v922_v6 }
 0x333   :  { %v2406_v3 = vadd.f32 %v2402_v24, %v1725_v48  ;;  %3463 = vmatpush3.bf16.msra.mxu0 %v4095_v30  ;;  %v929_v29 = vadd.f32 %v3276_v2, %v919_v7  ;;  %v4933_v1 = vmov 0.0  }
 0x334   :  { %v934_v11 = vmul.f32 0.1, %v930_v8  ;;  %v935_v12 = vmul.f32 0.1, %v931_v27  ;;  %v936_v13 = vmul.f32 0.1, %v932_v28  ;;  %3474 = vmatprep.subr.bf16.mxu0 %v4933_v1  ;;  %3468 = vmatprep.subr.bf16.mxu1 %v4933_v1 }
 0x335   :  { %v933_v17 = vmul.f32 0.1, %v929_v29  ;;  %3470 = vmatprep.mubr.msk.bf16.mxu1 %vm3855_vm3, %v4933_v1 }
 0x336   :  { %v938_v25 = vmax.f32 %v930_v8, %v934_v11  ;;  %v939_v26 = vmax.f32 %v931_v27, %v935_v12  ;;  %v940_v53 = vmax.f32 %v932_v28, %v936_v13 }
 0x337   :  { %v937_v54 = vmax.f32 %v929_v29, %v933_v17 }
 0x338   :  { %v3077_v10 = vmul.f32 %v4247_v23, %v938_v25  ;;  %v942_v55 = vpack.c.bf16 %v940_v53, %v939_v26  ;;  %v3078_v15 = vmul.f32 %v4247_v23, %v939_v26  ;;  %v3079_v14 = vmul.f32 %v4247_v23, %v940_v53 }
 0x339   :  { %v941_v21 = vpack.c.bf16 %v938_v25, %v937_v54  ;;  %v3076_v30 = vmul.f32 %v4247_v23, %v937_v54 }
 0x33a   :  { %v3081_v56 = vadd.f32 %v3077_v10, %v2404_v22  ;;  %v3082_v31 = vadd.f32 %v3078_v15, %v2405_v9  ;;  %v3083_v51 = vadd.f32 %v3079_v14, %v2406_v3 }
 0x33b   :  { %3464 = vmatprep.mubr.msk.bf16.mxu0 %vm466_vm1, %v941_v21  ;;  %v3080_v32 = vadd.f32 %v3076_v30, %v2403_v19 }
 0x33c   :  { %3465 = vmatmul.mubr.msk.bf16.vlgmr.msra.gmra.mxu0 %vm466_vm1, %v942_v55  ;;  %v3107_v33 = vsel %vm466_vm1, %v3081_v56, 0.0  ;;  %v3115_v52 = vsel %vm466_vm1, %v3082_v31, 0.0  ;;  %v3116_v34 = vsel %vm466_vm1, %v3083_v51, 0.0 }
 0x33d   :  { %v3106_v60 = vsel %vm466_vm1, %v3080_v32, 0.0  ;;  %v3117_v36 = vadd.f32 %v3116_v34, %v3115_v52  ;;  %3476 = vmatprep.mubr.msk.bf16.mxu0 %vm3855_vm3, %v4933_v1 }
 0x33e   :  { %v3108_v39 = vadd.f32 %v3107_v33, %v3106_v60 }
 0x33f   :  { %v3118_v35 = vrot.slane %v3117_v36, 4 }
 0x340   :  { %v3109_v38 = vrot.slane %v3108_v39, 4 }
 0x341   :  { %v3119_v40 = vadd.f32 %v3118_v35, %v3117_v36 }
 0x342   :  { %v3110_v41 = vadd.f32 %v3109_v38, %v3108_v39 }
 0x343   :  { %v3120_v42 = vrot.slane %v3119_v40, 2 }
 0x344   :  { %v3111_v43 = vrot.slane %v3110_v41, 2 }
 0x345   :  { %v3121_v44 = vadd.f32 %v3120_v42, %v3119_v40 }
 0x346   :  { %v3112_v45 = vadd.f32 %v3111_v43, %v3110_v41 }
 0x347   :  { %v3122_v46 = vrot.slane %v3121_v44, 1 }
 0x348   :  { %v3113_v47 = vrot.slane %v3112_v45, 1 }
 0x349   :  { %v3123_v48 = vadd.f32 %v3122_v46, %v3121_v44 }
 0x34a   :  { %v3114_v49 = vadd.f32 %v3113_v47, %v3112_v45 }
 0x34b   :  { %v3125_v61 = vmul.f32 0.0625, %v3123_v48 }
 0x34c   :  { %v3124_v63 = vmul.f32 0.0625, %v3114_v49 }
 0x34e   :  { %v4260_v0 = vsel %vm3139_vm2, %v3125_v61, %v3124_v63 }
 0x34f   :  { %4952 = vst [vmem:[#allocation12_spill] sm:$0xff] %v4260_v0 }
 0x3e9   :  { %v3438_v2 = vpop.f32.mrf.mxu0 }
 0x3ea   :  { %v598_v57 = vadd.f32 %v3438_v2, %v3248_v4 }
 0x3eb   :  { %v589_v50 = vpop.f32.mrf.mxu0 }
 0x3ec   :  { %v590_v6 = vadd.f32 %v3248_v4, %v589_v50 }
 0x3ed   :  { %v3439_v58 = vpop.f32.mrf.mxu0 }
 0x3ee   :  { %v601_v62 = vadd.f32 %v3439_v58, %v3248_v4 }
 0x3ef   :  { %v592_v5 = vpop.f32.mrf.mxu0 }
 0x3f0   :  { %v4271_v18 = vpack.c.bf16 %v601_v62, %v598_v57  ;;  %v593_v19 = vadd.f32 %v3248_v4, %v592_v5 }
 0x3f2   :  { %v4273_v22 = vpack.c.bf16 %v593_v19, %v590_v6  ;;  %v3452_v24 = vpop.f32.mrf.mxu0  ;;  %1052 = vrot.lane.b32.xlu1 %v4271_v18, %s3856_s19 }
 0x3f3   :  { %v795_v9 = vadd.f32 %v3452_v24, %v3248_v4 }
 0x3f4   :  { %v786_v7 = vpop.f32.mrf.mxu0  ;;  %1002 = vrot.lane.b32.xlu0 %v4273_v22, %s3856_s19 }
 0x3f5   :  { %v787_v3 = vadd.f32 %v3248_v4, %v786_v7 }
 0x3f6   :  { %v3453_v8 = vpop.f32.mrf.mxu0 }
 0x3f7   :  { %v798_v27 = vadd.f32 %v3453_v8, %v3248_v4 }
 0x3f8   :  { %v789_v28 = vpop.f32.mrf.mxu0 }
 0x3f9   :  { %v4277_v29 = vpack.c.bf16 %v798_v27, %v795_v9  ;;  %v790_v11 = vadd.f32 %v3248_v4, %v789_v28 }
 0x3fb   :  { %v4279_v12 = vpack.c.bf16 %v790_v11, %v787_v3  ;;  %1149 = vrot.lane.b32.xlu1 %v4277_v29, %s3856_s19 }
 0x3fc   :  { %v3466_v13 = vpop.f32.mrf.mxu0 }
 0x3fd   :  { %1102 = vrot.lane.b32.xlu0 %v4279_v12, %s3856_s19  ;;  %v992_v26 = vadd.f32 %v3466_v13, %v3248_v4 }
 0x3fe   :  { %v983_v17 = vpop.f32.mrf.mxu0 }
 0x3ff   :  { %v984_v10 = vadd.f32 %v3248_v4, %v983_v17 }
 0x400   :  { %v3467_v25 = vpop.f32.mrf.mxu0 }
 0x401   :  { %v995_v53 = vadd.f32 %v3467_v25, %v3248_v4 }
 0x402   :  { %v986_v54 = vpop.f32.mrf.mxu0 }
 0x403   :  { %v4283_v55 = vpack.c.bf16 %v995_v53, %v992_v26  ;;  %v987_v15 = vadd.f32 %v3248_v4, %v986_v54 }
 0x405   :  { %v4285_v14 = vpack.c.bf16 %v987_v15, %v984_v10  ;;  %1243 = vrot.lane.b32.xlu1 %v4283_v55, %s3856_s19 }
 0x407   :  { %1196 = vrot.lane.b32.xlu0 %v4285_v14, %s3856_s19 }
 0x409   :  { %1417 = vrot.lane.b32.xlu1 %v4279_v12, %s3857_s14 }
 0x464   :  { %v1053_v21 = vpop.permute.xlu1 %1052 }
 0x465   :  { %v4292_v30 = vsel %vm466_vm1, %v1053_v21, 0 }
 0x466   :  { %3475 = vmatpush3.bf16.xpose.msra.mxu0 %v4292_v30  ;;  %v1003_v56 = vpop.permute.xlu0 %1002 }
 0x467   :  { %v4296_v31 = vsel %vm466_vm1, %v1003_v56, 0  ;;  %3486 = vmatprep.subr.bf16.mxu0 %v4933_v1 }
 0x468   :  { %3469 = vmatpush3.bf16.xpose.msra.mxu1 %v4296_v31 }
 0x469   :  { %3480 = vmatprep.subr.bf16.mxu1 %v4933_v1 }
 0x46d   :  { %v1150_v51 = vpop.permute.xlu1 %1149  ;;  %3477 = vmatmul.mubr.msk.bf16.vlgmr.msra.gmra.mxu0 %vm466_vm1, %v4271_v18 }
 0x46e   :  { %v4304_v32 = vsel %vm466_vm1, %v1150_v51, 0  ;;  %3488 = vmatprep.mubr.msk.bf16.mxu0 %vm3855_vm3, %v4933_v1 }
 0x46f   :  { %3487 = vmatpush3.bf16.xpose.msra.mxu0 %v4304_v32  ;;  %v1103_v33 = vpop.permute.xlu0 %1102  ;;  %3471 = vmatmul.mubr.msk.bf16.vlgmr.msra.gmra.mxu1 %vm466_vm1, %v4273_v22 }
 0x470   :  { %v4312_v52 = vsel %vm466_vm1, %v1103_v33, 0  ;;  %3498 = vmatprep.subr.bf16.mxu0 %v4933_v1  ;;  %3482 = vmatprep.mubr.msk.bf16.mxu1 %vm3855_vm3, %v4933_v1 }
 0x471   :  { %3481 = vmatpush3.bf16.xpose.msra.mxu1 %v4312_v52 }
 0x472   :  { %3492 = vmatprep.subr.bf16.mxu1 %v4933_v1 }
 0x476   :  { %3489 = vmatmul.mubr.msk.bf16.vlgmr.msra.gmra.mxu0 %vm466_vm1, %v4271_v18 }
 0x477   :  { %v1244_v34 = vpop.permute.xlu1 %1243  ;;  %3500 = vmatprep.mubr.msk.bf16.mxu0 %vm3855_vm3, %v4933_v1 }
 0x478   :  { %v4324_v60 = vsel %vm466_vm1, %v1244_v34, 0  ;;  %3483 = vmatmul.mubr.msk.bf16.vlgmr.msra.gmra.mxu1 %vm466_vm1, %v4273_v22 }
 0x479   :  { %3499 = vmatpush3.bf16.xpose.msra.mxu0 %v4324_v60  ;;  %v1197_v36 = vpop.permute.xlu0 %1196  ;;  %3494 = vmatprep.mubr.msk.bf16.mxu1 %vm3855_vm3, %v4933_v1 }
 0x47a   :  { %v4332_v39 = vsel %vm466_vm1, %v1197_v36, 0  ;;  %3510 = vmatprep.subr.bf16.mxu0 %v4933_v1 }
 0x47b   :  { %3493 = vmatpush3.bf16.xpose.msra.mxu1 %v4332_v39  ;;  %v4341_v35 = vpop.permute.xlu1 %1417 }
 0x47c   :  { %3504 = vmatprep.subr.bf16.mxu1 %v4933_v1 }
 0x480   :  { %3501 = vmatmul.mubr.msk.bf16.vlgmr.msra.gmra.mxu0 %vm466_vm1, %v4271_v18 }
 0x481   :  { %3512 = vmatprep.mubr.msk.bf16.mxu0 %vm3855_vm3, %v4933_v1 }
 0x482   :  { %3495 = vmatmul.mubr.msk.bf16.vlgmr.msra.gmra.mxu1 %vm466_vm1, %v4273_v22 }
 0x483   :  { %3505 = vmatpush3.bf16.msra.mxu1 %v4341_v35  ;;  %3506 = vmatprep.mubr.msk.bf16.mxu1 %vm3855_vm3, %v4933_v1 }
 0x484   :  { %3516 = vmatprep.subr.bf16.mxu1 %v4933_v1 }
 0x52d   :  { %v4349_v38 = vpop.f32.mrf.mxu0 }
 0x52e   :  { %v1295_v40 = vsel %vm466_vm1, %v4349_v38, -inf }
 0x52f   :  { %v3478_v41 = vpop.f32.mrf.mxu0  ;;  %1296 = vmax.xlane.f32.xlu0 %v1295_v40  ;;  %v4353_v42 = vpop.f32.mrf.mxu1 }
 0x530   :  { %v1289_v45 = vsel %vm466_vm1, %v4353_v42, -inf }
 0x531   :  { %v3472_v43 = vpop.f32.mrf.mxu1  ;;  %v4355_v44 = vpop.f32.mrf.mxu0 }
 0x532   :  { %v1298_v63 = vsel %vm466_vm1, %v4355_v44, -inf }
 0x533   :  { %v3479_v46 = vpop.f32.mrf.mxu0  ;;  %1290 = vmax.xlane.f32.xlu0 %v1289_v45  ;;  %v4359_v47 = vpop.f32.mrf.mxu1 }
 0x534   :  { %v1292_v48 = vsel %vm466_vm1, %v4359_v47, -inf }
 0x535   :  { %1293 = vmax.xlane.f32.xlu1 %v1292_v48  ;;  %v3473_v49 = vpop.f32.mrf.mxu1 }
 0x536   :  { %v1188_v61 = vpop.f32.mrf.mxu0 }
 0x537   :  { %1299 = vmax.xlane.f32.xlu0 %v1298_v63  ;;  %v1307_v50 = vsel %vm466_vm1, %v1188_v61, -inf }
 0x538   :  { %v3490_v2 = vpop.f32.mrf.mxu0  ;;  %v4365_v4 = vpop.f32.mrf.mxu1 }
 0x539   :  { %1308 = vmax.xlane.f32.xlu1 %v1307_v50  ;;  %v1301_v19 = vsel %vm466_vm1, %v4365_v4, -inf }
 0x53a   :  { %v1191_v58 = vpop.f32.mrf.mxu0  ;;  %v3484_v57 = vpop.f32.mrf.mxu1 }
 0x53b   :  { %v1310_v62 = vsel %vm466_vm1, %v1191_v58, -inf }
 0x53c   :  { %v3491_v5 = vpop.f32.mrf.mxu0  ;;  %1311 = vmax.xlane.f32.xlu0 %v1310_v62  ;;  %v1144_v6 = vpop.f32.mrf.mxu1 }
 0x53d   :  { %1302 = vmax.xlane.f32.xlu1 %v1301_v19  ;;  %v1304_v7 = vsel %vm466_vm1, %v1144_v6, -inf }
 0x53e   :  { %v3485_v24 = vpop.f32.mrf.mxu1 }
 0x540   :  { %v4372_v8 = vpop.f32.mrf.mxu0  ;;  %1305 = vmax.xlane.f32.xlu0 %v1304_v7 }
 0x541   :  { %v1323_v9 = vsel %vm466_vm1, %v4372_v8, -inf }
 0x542   :  { %v3502_v27 = vpop.f32.mrf.mxu0  ;;  %v4376_v28 = vpop.f32.mrf.mxu1  ;;  %1324 = vmax.xlane.f32.xlu1 %v1323_v9 }
 0x543   :  { %v1317_v17 = vsel %vm466_vm1, %v4376_v28, -inf }
 0x544   :  { %v1285_v3 = vpop.f32.mrf.mxu0  ;;  %v3496_v11 = vpop.f32.mrf.mxu1 }
 0x545   :  { %v1326_v13 = vsel %vm466_vm1, %v1285_v3, -inf }
 0x546   :  { %v3503_v25 = vpop.f32.mrf.mxu0  ;;  %1327 = vmax.xlane.f32.xlu0 %v1326_v13  ;;  %v4381_v26 = vpop.f32.mrf.mxu1  ;;  %1318 = vmax.xlane.f32.xlu1 %v1317_v17 }
 0x547   :  { %v1320_v54 = vsel %vm466_vm1, %v4381_v26, -inf }
 0x548   :  { %v3497_v53 = vpop.f32.mrf.mxu1 }
 0x54a   :  { %1321 = vmax.xlane.f32.xlu0 %v1320_v54 }
 0x557   :  { %1511 = vrot.lane.b32.xlu1 %v4273_v22, %s3857_s14 }
 0x55b   :  { %1558 = vrot.lane.b32.xlu1 %v4271_v18, %s3857_s14 }
 0x55f   :  { %1654 = vrot.lane.b32.xlu1 %v4283_v55, %s3857_s14 }
 0x560   :  { %1464 = vrot.lane.b32.xlu0 %v4277_v29, %s3857_s14 }
 0x564   :  { %1607 = vrot.lane.b32.xlu0 %v4285_v14, %s3857_s14 }
 0x5b8   :  { %v1297_v10 = vpop.xlane.xlu0 %1296 }
 0x5bc   :  { %v1291_v15 = vpop.xlane.xlu0 %1290 }
 0x5be   :  { %v1294_v21 = vpop.xlane.xlu1 %1293 }
 0x5c0   :  { %v1300_v56 = vpop.xlane.xlu0 %1299 }
 0x5c2   :  { %v1309_v51 = vpop.xlane.xlu1 %1308 }
 0x5c3   :  { %v1315_v36 = vmax.f32 %v1297_v10, %v1309_v51 }
 0x5c5   :  { %v1312_v33 = vpop.xlane.xlu0 %1311 }
 0x5c6   :  { %v1303_v34 = vpop.xlane.xlu1 %1302  ;;  %v1316_v41 = vmax.f32 %v1300_v56, %v1312_v33 }
 0x5c7   :  { %v1313_v45 = vmax.f32 %v1291_v15, %v1303_v34 }
 0x5c9   :  { %v1306_v22 = vpop.xlane.xlu0 %1305 }
 0x5ca   :  { %v1314_v57 = vmax.f32 %v1294_v21, %v1306_v22 }
 0x5cb   :  { %v1325_v40 = vpop.xlane.xlu1 %1324 }
 0x5cc   :  { %v1331_v18 = vmax.f32 %v1315_v36, %v1325_v40 }
 0x5ce   :  { %v1347_v43 = vsub.f32 %v1188_v61, %v1331_v18  ;;  %v1335_v9 = vsub.f32 %v4349_v38, %v1331_v18  ;;  %v1359_v38 = vsub.f32 %v4372_v8, %v1331_v18 }
 0x5cf   :  { %v1328_v46 = vpop.xlane.xlu0 %1327  ;;  %v1319_v48 = vpop.xlane.xlu1 %1318 }
 0x5d0   :  { %v1332_v49 = vmax.f32 %v1316_v41, %v1328_v46  ;;  %v1329_v63 = vmax.f32 %v1313_v45, %v1319_v48  ;;  %v1353_v2 = vmul.f32 1.442695, %v1347_v43  ;;  %v1365_v21 = vmul.f32 1.442695, %v1359_v38 }
 0x5d2   :  { %v1348_v50 = vsub.f32 %v1191_v58, %v1332_v49  ;;  %v1336_v62 = vsub.f32 %v4355_v44, %v1332_v49  ;;  %v1345_v24 = vsub.f32 %v4365_v4, %v1329_v63  ;;  %3718 = vpow2.f32 %v1353_v2 }
 0x5d3   :  { %v1322_v5 = vpop.xlane.xlu0 %1321  ;;  %v1341_v44 = vmul.f32 1.442695, %v1335_v9  ;;  %v1360_v4 = vsub.f32 %v1285_v3, %v1332_v49  ;;  %v1333_v25 = vsub.f32 %v4353_v42, %v1329_v63  ;;  %v4405_v10 = vpop.permute.xlu1 %1511  ;;  %v1357_v42 = vsub.f32 %v4376_v28, %v1329_v63 }
 0x5d4   :  { %v1355_v19 = vmul.f32 1.442695, %v1348_v50  ;;  %v1330_v7 = vmax.f32 %v1314_v57, %v1322_v5  ;;  %v1343_v27 = vmul.f32 1.442695, %v1336_v62  ;;  %v1349_v13 = vmul.f32 1.442695, %v1345_v24 }
 0x5d5   :  { %v1367_v53 = vmul.f32 1.442695, %v1360_v4  ;;  %v1337_v54 = vmul.f32 1.442695, %v1333_v25  ;;  %v1361_v34 = vmul.f32 1.442695, %v1357_v42 }
 0x5d6   :  { %3720 = vpow2.f32 %v1355_v19  ;;  %v1346_v61 = vsub.f32 %v1144_v6, %v1330_v7  ;;  %v1334_v17 = vsub.f32 %v4359_v47, %v1330_v7  ;;  %v1358_v56 = vsub.f32 %v4381_v26, %v1330_v7 }
 0x5d7   :  { %v4398_v11 = vpop.permute.xlu0 %1464  ;;  %3722 = vpow2.f32 %v1343_v27  ;;  %v4415_v51 = vpop.permute.xlu1 %1558 }
 0x5d8   :  { %3511 = vmatpush3.bf16.msra.mxu0 %v4398_v11  ;;  %v1351_v58 = vmul.f32 1.442695, %v1346_v61  ;;  %3724 = vpow2.f32 %v1349_v13  ;;  %v1339_v6 = vmul.f32 1.442695, %v1334_v17  ;;  %v1363_v3 = vmul.f32 1.442695, %v1358_v56 }
 0x5d9   :  { %3522 = vmatprep.subr.bf16.mxu0 %v4933_v1 }
 0x5da   :  { %3726 = vpow2.f32 %v1351_v58 }
 0x5db   :  { %3728 = vpow2.f32 %v1341_v44  ;;  %v4438_v18 = vpop.permute.xlu1 %1654  ;;  %v4456_v49 = vpop.permute.xlu0 %1607 }
 0x5dc   :  { %3730 = vpow2.f32 %v1339_v6 }
 0x5dd   :  { %3732 = vpow2.f32 %v1367_v53 }
 0x5de   :  { %3734 = vpow2.f32 %v1337_v54 }
 0x5df   :  { %v4407_v15 = vpop.eup %3718  ;;  %3736 = vpow2.f32 %v1365_v21 }
 0x5e0   :  { %3738 = vpow2.f32 %v1363_v3 }
 0x5e1   :  { %3740 = vpow2.f32 %v1361_v34 }
 0x5e3   :  { %v4410_v47 = vpop.eup %3720 }
 0x5e4   :  { %v1416_v8 = vpack.c.bf16 %v4410_v47, %v4407_v15  ;;  %v4418_v33 = vpop.eup %3722 }
 0x5e5   :  { %v4423_v26 = vpop.eup %3724 }
 0x5e6   :  { %3513 = vmatmul.mubr.msk.bf16.vlgmr.msra.gmra.mxu0 %vm466_vm1, %v1416_v8 }
 0x5e7   :  { %3523 = vmatpush3.bf16.msra.mxu0 %v4415_v51  ;;  %3524 = vmatprep.mubr.msk.bf16.mxu0 %vm3855_vm3, %v4933_v1  ;;  %v4426_v28 = vpop.eup %3726 }
 0x5e8   :  { %3534 = vmatprep.subr.bf16.mxu0 %v4933_v1  ;;  %v1415_v22 = vpack.c.bf16 %v4426_v28, %v4423_v26  ;;  %v4430_v36 = vpop.eup %3728 }
 0x5e9   :  { %v1414_v40 = vpack.c.bf16 %v4418_v33, %v4430_v36  ;;  %v4442_v41 = vpop.eup %3730 }
 0x5ea   :  { %3507 = vmatmul.mubr.msk.bf16.vlgmr.msra.gmra.mxu1 %vm466_vm1, %v1415_v22  ;;  %v4447_v43 = vpop.eup %3732 }
 0x5eb   :  { %3517 = vmatpush3.bf16.msra.mxu1 %v4405_v10  ;;  %3518 = vmatprep.mubr.msk.bf16.mxu1 %vm3855_vm3, %v4933_v1  ;;  %v4450_v45 = vpop.eup %3734 }
 0x5ec   :  { %3528 = vmatprep.subr.bf16.mxu1 %v4933_v1  ;;  %v1413_v46 = vpack.c.bf16 %v4442_v41, %v4450_v45  ;;  %v4454_v48 = vpop.eup %3736 }
 0x5ed   :  { %v1606_v63 = vpack.c.bf16 %v4447_v43, %v4454_v48  ;;  %v4466_v2 = vpop.eup %3738 }
 0x5ee   :  { %3525 = vmatmul.mubr.msk.bf16.vlgmr.msra.gmra.mxu0 %vm466_vm1, %v1414_v40  ;;  %v4472_v50 = vpop.eup %3740 }
 0x5ef   :  { %3535 = vmatpush3.bf16.msra.mxu0 %v4438_v18  ;;  %3536 = vmatprep.mubr.msk.bf16.mxu0 %vm3855_vm3, %v4933_v1  ;;  %v1605_v57 = vpack.c.bf16 %v4466_v2, %v4472_v50 }
 0x5f0   :  { %3546 = vmatprep.subr.bf16.mxu0 %v4933_v1 }
 0x5f2   :  { %3519 = vmatmul.mubr.msk.bf16.vlgmr.msra.gmra.mxu1 %vm466_vm1, %v1413_v46 }
 0x5f3   :  { %3529 = vmatpush3.bf16.msra.mxu1 %v4456_v49  ;;  %3530 = vmatprep.mubr.msk.bf16.mxu1 %vm3855_vm3, %v4933_v1 }
 0x5f4   :  { %3540 = vmatprep.subr.bf16.mxu1 %v4933_v1 }
 0x5f6   :  { %3537 = vmatmul.mubr.msk.bf16.vlgmr.msra.gmra.mxu0 %vm466_vm1, %v1606_v63 }
 0x5f7   :  { %3547 = vmatpush3.bf16.xpose.msra.mxu0 %v4292_v30  ;;  %3548 = vmatprep.mubr.msk.bf16.mxu0 %vm3855_vm3, %v4933_v1 }
 0x5f8   :  { %3558 = vmatprep.subr.bf16.mxu0 %v4933_v1 }
 0x5fa   :  { %3531 = vmatmul.mubr.msk.bf16.vlgmr.msra.gmra.mxu1 %vm466_vm1, %v1605_v57 }
 0x5fb   :  { %3541 = vmatpush3.bf16.xpose.msra.mxu1 %v4296_v31  ;;  %3542 = vmatprep.mubr.msk.bf16.mxu1 %vm3855_vm3, %v4933_v1 }
 0x5fc   :  { %3552 = vmatprep.subr.bf16.mxu1 %v4933_v1 }
 0x5fe   :  { %3549 = vmatmul.mubr.msk.bf16.vlgmr.msra.gmra.mxu0 %vm466_vm1, %v4277_v29 }
 0x5ff   :  { %3559 = vmatpush3.bf16.xpose.msra.mxu0 %v4304_v32  ;;  %3560 = vmatprep.mubr.msk.bf16.mxu0 %vm3855_vm3, %v4933_v1 }
 0x600   :  { %3570 = vmatprep.subr.bf16.mxu0 %v4933_v1 }
 0x602   :  { %3543 = vmatmul.mubr.msk.bf16.vlgmr.msra.gmra.mxu1 %vm466_vm1, %v4279_v12 }
 0x603   :  { %3553 = vmatpush3.bf16.xpose.msra.mxu1 %v4312_v52  ;;  %3554 = vmatprep.mubr.msk.bf16.mxu1 %vm3855_vm3, %v4933_v1 }
 0x604   :  { %3564 = vmatprep.subr.bf16.mxu1 %v4933_v1 }
 0x606   :  { %3561 = vmatmul.mubr.msk.bf16.vlgmr.msra.gmra.mxu0 %vm466_vm1, %v4277_v29 }
 0x607   :  { %3571 = vmatpush3.bf16.xpose.msra.mxu0 %v4324_v60  ;;  %3572 = vmatprep.mubr.msk.bf16.mxu0 %vm3855_vm3, %v4933_v1 }
 0x608   :  { %3582 = vmatprep.subr.bf16.mxu0 %v4933_v1 }
 0x60a   :  { %3555 = vmatmul.mubr.msk.bf16.vlgmr.msra.gmra.mxu1 %vm466_vm1, %v4279_v12 }
 0x60b   :  { %3565 = vmatpush3.bf16.xpose.msra.mxu1 %v4332_v39  ;;  %3566 = vmatprep.mubr.msk.bf16.mxu1 %vm3855_vm3, %v4933_v1 }
 0x60c   :  { %3576 = vmatprep.subr.bf16.mxu1 %v4933_v1 }
 0x60e   :  { %3573 = vmatmul.mubr.msk.bf16.vlgmr.msra.gmra.mxu0 %vm466_vm1, %v4277_v29 }
 0x60f   :  { %3583 = vmatpush3.bf16.msra.mxu0 %v4398_v11  ;;  %3584 = vmatprep.mubr.msk.bf16.mxu0 %vm3855_vm3, %v4933_v1 }
 0x610   :  { %3594 = vmatprep.subr.bf16.mxu0 %v4933_v1 }
 0x612   :  { %3567 = vmatmul.mubr.msk.bf16.vlgmr.msra.gmra.mxu1 %vm466_vm1, %v4279_v12 }
 0x613   :  { %3577 = vmatpush3.bf16.msra.mxu1 %v4341_v35  ;;  %3578 = vmatprep.mubr.msk.bf16.mxu1 %vm3855_vm3, %v4933_v1 }
 0x614   :  { %3588 = vmatprep.subr.bf16.mxu1 %v4933_v1 }
 0x6a6   :  { %v1504_v29 = vpop.f32.mrf.mxu0 }
 0x6a8   :  { %v3514_v62 = vpop.f32.mrf.mxu0 }
 0x6aa   :  { %v1507_v5 = vpop.f32.mrf.mxu0  ;;  %v1457_v19 = vpop.f32.mrf.mxu1 }
 0x6ac   :  { %v3515_v24 = vpop.f32.mrf.mxu0  ;;  %v3508_v7 = vpop.f32.mrf.mxu1 }
 0x6ae   :  { %v1598_v9 = vpop.f32.mrf.mxu0  ;;  %v1460_v61 = vpop.f32.mrf.mxu1 }
 0x6af   :  { %v1599_v27 = vadd.f32 %v1598_v9, %v1504_v29 }
 0x6b0   :  { %v3526_v13 = vpop.f32.mrf.mxu0  ;;  %v3509_v58 = vpop.f32.mrf.mxu1 }
 0x6b2   :  { %v1601_v44 = vpop.f32.mrf.mxu0  ;;  %v1551_v17 = vpop.f32.mrf.mxu1 }
 0x6b3   :  { %v1602_v12 = vadd.f32 %v1601_v44, %v1507_v5  ;;  %v1552_v25 = vadd.f32 %v1551_v17, %v1457_v19 }
 0x6b4   :  { %v3527_v4 = vpop.f32.mrf.mxu0  ;;  %v3520_v38 = vpop.f32.mrf.mxu1 }
 0x6b6   :  { %v1694_v6 = vpop.f32.mrf.mxu0  ;;  %v1554_v54 = vpop.f32.mrf.mxu1 }
 0x6b7   :  { %v4517_v53 = vadd.f32 %v1694_v6, %v1599_v27  ;;  %v1555_v56 = vadd.f32 %v1554_v54, %v1460_v61 }
 0x6b8   :  { %v3538_v21 = vpop.f32.mrf.mxu0  ;;  %v3521_v42 = vpop.f32.mrf.mxu1 }
 0x6b9   :  { %4953 = vst [vmem:[#allocation13_spill] sm:$0xff] %v4517_v53 }
 0x6ba   :  { %v1697_v8 = vpop.f32.mrf.mxu0  ;;  %v1647_v34 = vpop.f32.mrf.mxu1 }
 0x6bb   :  { %v4519_v3 = vadd.f32 %v1697_v8, %v1602_v12  ;;  %v4521_v40 = vadd.f32 %v1647_v34, %v1552_v25 }
 0x6bc   :  { %v3539_v22 = vpop.f32.mrf.mxu0  ;;  %v3532_v46 = vpop.f32.mrf.mxu1 }
 0x6bd   :  { %4954 = vst [vmem:[#allocation14_spill] sm:$0xff] %v4519_v3  ;;  %4955 = vst [vmem:[#allocation15_spill] sm:$0xff] %v4521_v40 }
 0x6be   :  { %v4523_v63 = vpop.f32.mrf.mxu0  ;;  %v1650_v29 = vpop.f32.mrf.mxu1 }
 0x6bf   :  { %v1990_v57 = vsel %vm466_vm1, %v4523_v63, -inf  ;;  %v4527_v5 = vadd.f32 %v1650_v29, %v1555_v56 }
 0x6c0   :  { %1991 = vmax.xlane.f32.xlu0 %v1990_v57  ;;  %v3550_v62 = vpop.f32.mrf.mxu0  ;;  %v3533_v19 = vpop.f32.mrf.mxu1 }
 0x6c1   :  { %4956 = vst [vmem:[#allocation16_spill] sm:$0xff] %v4527_v5 }
 0x6c2   :  { %v4529_v24 = vpop.f32.mrf.mxu0  ;;  %v4531_v7 = vpop.f32.mrf.mxu1 }
 0x6c3   :  { %v1984_v27 = vsel %vm466_vm1, %v4531_v7, -inf  ;;  %v1993_v12 = vsel %vm466_vm1, %v4529_v24, -inf }
 0x6c4   :  { %v3551_v9 = vpop.f32.mrf.mxu0  ;;  %1985 = vmax.xlane.f32.xlu0 %v1984_v27  ;;  %v3544_v61 = vpop.f32.mrf.mxu1 }
 0x6c6   :  { %v4535_v13 = vpop.f32.mrf.mxu0  ;;  %v4537_v58 = vpop.f32.mrf.mxu1 }
 0x6c7   :  { %v1987_v17 = vsel %vm466_vm1, %v4537_v58, -inf  ;;  %v2002_v21 = vsel %vm466_vm1, %v4535_v13, -inf }
 0x6c8   :  { %v3562_v44 = vpop.f32.mrf.mxu0  ;;  %1994 = vmax.xlane.f32.xlu0 %v1993_v12  ;;  %1988 = vmax.xlane.f32.xlu1 %v1987_v17  ;;  %v3545_v4 = vpop.f32.mrf.mxu1 }
 0x6ca   :  { %v1898_v25 = vpop.f32.mrf.mxu0  ;;  %v1854_v6 = vpop.f32.mrf.mxu1 }
 0x6cb   :  { %v2005_v38 = vsel %vm466_vm1, %v1898_v25, -inf  ;;  %v1996_v22 = vsel %vm466_vm1, %v1854_v6, -inf }
 0x6cc   :  { %v3563_v54 = vpop.f32.mrf.mxu0  ;;  %2006 = vmax.xlane.f32.xlu0 %v2005_v38  ;;  %2003 = vmax.xlane.f32.xlu1 %v2002_v21  ;;  %v3556_v56 = vpop.f32.mrf.mxu1 }
 0x6ce   :  { %v4546_v42 = vpop.f32.mrf.mxu0  ;;  %v1857_v8 = vpop.f32.mrf.mxu1 }
 0x6cf   :  { %v1999_v46 = vsel %vm466_vm1, %v1857_v8, -inf  ;;  %v2018_v44 = vsel %vm466_vm1, %v4546_v42, -inf }
 0x6d0   :  { %v3574_v34 = vpop.f32.mrf.mxu0  ;;  %1997 = vmax.xlane.f32.xlu1 %v1996_v22  ;;  %2000 = vmax.xlane.f32.xlu0 %v1999_v46  ;;  %v3557_v57 = vpop.f32.mrf.mxu1 }
 0x6d2   :  { %v4550_v29 = vpop.f32.mrf.mxu0  ;;  %v4552_v62 = vpop.f32.mrf.mxu1 }
 0x6d3   :  { %v2012_v9 = vsel %vm466_vm1, %v4552_v62, -inf  ;;  %v2021_v4 = vsel %vm466_vm1, %v4550_v29, -inf }
 0x6d4   :  { %v3575_v19 = vpop.f32.mrf.mxu0  ;;  %2013 = vmax.xlane.f32.xlu1 %v2012_v9  ;;  %v3568_v27 = vpop.f32.mrf.mxu1 }
 0x6d6   :  { %v1939_v61 = vpop.f32.mrf.mxu1 }
 0x6d7   :  { %v2015_v12 = vsel %vm466_vm1, %v1939_v61, -inf }
 0x6d8   :  { %2019 = vmax.xlane.f32.xlu1 %v2018_v44  ;;  %2016 = vmax.xlane.f32.xlu0 %v2015_v12  ;;  %v3569_v17 = vpop.f32.mrf.mxu1 }
 0x6dc   :  { %2022 = vmax.xlane.f32.xlu0 %v2021_v4 }
 0x749   :  { %v1992_v38 = vpop.xlane.xlu0 %1991 }
 0x74d   :  { %v1986_v54 = vpop.xlane.xlu0 %1985 }
 0x751   :  { %v1989_v21 = vpop.xlane.xlu1 %1988  ;;  %v1995_v56 = vpop.xlane.xlu0 %1994 }
 0x755   :  { %v2004_v34 = vpop.xlane.xlu1 %2003  ;;  %v2007_v22 = vpop.xlane.xlu0 %2006 }
 0x756   :  { %v2010_v20 = vmax.f32 %v1992_v38, %v2004_v34  ;;  %v2011_v23 = vmax.f32 %v1995_v56, %v2007_v22 }
 0x759   :  { %v1998_v46 = vpop.xlane.xlu1 %1997  ;;  %v2001_v19 = vpop.xlane.xlu0 %2000 }
 0x75a   :  { %v2008_v57 = vmax.f32 %v1986_v54, %v1998_v46  ;;  %v2009_v1 = vmax.f32 %v1989_v21, %v2001_v19 }
 0x75d   :  { %v2014_v9 = vpop.xlane.xlu1 %2013 }
 0x75e   :  { %v2024_v27 = vmax.f32 %v2008_v57, %v2014_v9 }
 0x760   :  { %v2040_v0 = vsub.f32 %v1854_v6, %v2024_v27  ;;  %v2028_v21 = vsub.f32 %v4531_v7, %v2024_v27 }
 0x761   :  { %v2020_v44 = vpop.xlane.xlu1 %2019  ;;  %v2017_v12 = vpop.xlane.xlu0 %2016 }
 0x762   :  { %v2026_v17 = vmax.f32 %v2010_v20, %v2020_v44  ;;  %v2025_v16 = vmax.f32 %v2009_v1, %v2017_v12  ;;  %v2044_v37 = vmul.f32 1.442695, %v2040_v0 }
 0x764   :  { %v2041_v4 = vsub.f32 %v1857_v8, %v2025_v16  ;;  %v2042_v53 = vsub.f32 %v4535_v13, %v2026_v17  ;;  %v2029_v46 = vsub.f32 %v4537_v58, %v2025_v16  ;;  %3742 = vpow2.f32 %v2044_v37 }
 0x765   :  { %v2023_v3 = vpop.xlane.xlu0 %2022  ;;  %v2030_v6 = vsub.f32 %v4523_v63, %v2026_v17  ;;  %v2032_v13 = vmul.f32 1.442695, %v2028_v21 }
 0x766   :  { %v2027_v59 = vmax.f32 %v2011_v23, %v2023_v3  ;;  %v2046_v5 = vmul.f32 1.442695, %v2041_v4  ;;  %v2048_v54 = vmul.f32 1.442695, %v2042_v53  ;;  %v2034_v1 = vmul.f32 1.442695, %v2029_v46 }
 0x767   :  { %v2053_v23 = vsub.f32 %v1939_v61, %v2025_v16  ;;  %v2036_v3 = vmul.f32 1.442695, %v2030_v6  ;;  %v2052_v53 = vsub.f32 %v4552_v62, %v2024_v27 }
 0x768   :  { %v2043_v40 = vsub.f32 %v1898_v25, %v2027_v59  ;;  %3744 = vpow2.f32 %v2046_v5  ;;  %v2031_v20 = vsub.f32 %v4529_v24, %v2027_v59  ;;  %v2055_v37 = vsub.f32 %v4550_v29, %v2027_v59 }
 0x769   :  { %3746 = vpow2.f32 %v2048_v54  ;;  %v2054_v5 = vsub.f32 %v4546_v42, %v2026_v17  ;;  %v2056_v7 = vmul.f32 1.442695, %v2052_v53  ;;  %v4957_v42 = vmov 0.0  }
 0x76a   :  { %v2050_v38 = vmul.f32 1.442695, %v2043_v40  ;;  %v2038_v0 = vmul.f32 1.442695, %v2031_v20  ;;  %v2058_v40 = vmul.f32 1.442695, %v2053_v23 }
 0x76b   :  { %v2062_v58 = vmul.f32 1.442695, %v2055_v37  ;;  %v2060_v8 = vmul.f32 1.442695, %v2054_v5 }
 0x76c   :  { %3748 = vpow2.f32 %v2050_v38 }
 0x76d   :  { %3750 = vpow2.f32 %v2034_v1 }
 0x76e   :  { %3752 = vpow2.f32 %v2032_v13 }
 0x76f   :  { %3754 = vpow2.f32 %v2038_v0 }
 0x770   :  { %3756 = vpow2.f32 %v2036_v3 }
 0x771   :  { %v4569_v24 = vpop.eup %3742  ;;  %3758 = vpow2.f32 %v2058_v40 }
 0x772   :  { %3760 = vpow2.f32 %v2056_v7 }
 0x773   :  { %3762 = vpow2.f32 %v2062_v58 }
 0x774   :  { %3764 = vpow2.f32 %v2060_v8 }
 0x775   :  { %v4571_v63 = vpop.eup %3744 }
 0x776   :  { %v2110_v16 = vpack.c.bf16 %v4571_v63, %v4569_v24  ;;  %v4575_v25 = vpop.eup %3746 }
 0x778   :  { %3579 = vmatmul.mubr.msk.bf16.vlgmr.msra.gmra.mxu1 %vm466_vm1, %v2110_v16 }
 0x779   :  { %v4577_v62 = vpop.eup %3748  ;;  %3589 = vmatpush3.bf16.msra.mxu1 %v4405_v10  ;;  %3590 = vmatprep.mubr.msk.bf16.mxu1 %vm3855_vm3, %v4957_v42 }
 0x77a   :  { %v2111_v59 = vpack.c.bf16 %v4577_v62, %v4575_v25  ;;  %3600 = vmatprep.subr.bf16.mxu1 %v4957_v42  ;;  %v4586_v29 = vpop.eup %3750 }
 0x77b   :  { %v4592_v61 = vpop.eup %3752 }
 0x77c   :  { %3585 = vmatmul.mubr.msk.bf16.vlgmr.msra.gmra.mxu0 %vm466_vm1, %v2111_v59  ;;  %v4595_v56 = vpop.eup %3754  ;;  %v2108_v34 = vpack.c.bf16 %v4586_v29, %v4592_v61 }
 0x77d   :  { %3595 = vmatpush3.bf16.msra.mxu0 %v4415_v51  ;;  %3596 = vmatprep.mubr.msk.bf16.mxu0 %vm3855_vm3, %v4957_v42  ;;  %v4599_v22 = vpop.eup %3756 }
 0x77e   :  { %3606 = vmatprep.subr.bf16.mxu0 %v4957_v42  ;;  %v2109_v57 = vpack.c.bf16 %v4595_v56, %v4599_v22  ;;  %v4608_v19 = vpop.eup %3758 }
 0x77f   :  { %v4614_v9 = vpop.eup %3760 }
 0x780   :  { %3591 = vmatmul.mubr.msk.bf16.vlgmr.msra.gmra.mxu1 %vm466_vm1, %v2108_v34  ;;  %v4617_v27 = vpop.eup %3762  ;;  %v2288_v44 = vpack.c.bf16 %v4608_v19, %v4614_v9 }
 0x781   :  { %3601 = vmatpush3.bf16.msra.mxu1 %v4456_v49  ;;  %3602 = vmatprep.mubr.msk.bf16.mxu1 %vm3855_vm3, %v4957_v42  ;;  %v4621_v12 = vpop.eup %3764 }
 0x782   :  { %3612 = vmatprep.subr.bf16.mxu1 %v4957_v42  ;;  %v2289_v17 = vpack.c.bf16 %v4617_v27, %v4621_v12 }
 0x784   :  { %3597 = vmatmul.mubr.msk.bf16.vlgmr.msra.gmra.mxu0 %vm466_vm1, %v2109_v57 }
 0x785   :  { %3607 = vmatpush3.bf16.msra.mxu0 %v4438_v18  ;;  %3608 = vmatprep.mubr.msk.bf16.mxu0 %vm3855_vm3, %v4957_v42 }
 0x786   :  { %3618 = vmatprep.subr.bf16.mxu0 %v4957_v42 }
 0x788   :  { %3603 = vmatmul.mubr.msk.bf16.vlgmr.msra.gmra.mxu1 %vm466_vm1, %v2288_v44 }
 0x789   :  { %3613 = vmatpush3.bf16.xpose.msra.mxu1 %v4296_v31  ;;  %3614 = vmatprep.mubr.msk.bf16.mxu1 %vm3855_vm3, %v4957_v42 }
 0x78a   :  { %3624 = vmatprep.subr.bf16.mxu1 %v4957_v42 }
 0x78c   :  { %3609 = vmatmul.mubr.msk.bf16.vlgmr.msra.gmra.mxu0 %vm466_vm1, %v2289_v17 }
 0x78d   :  { %3619 = vmatpush3.bf16.xpose.msra.mxu0 %v4292_v30  ;;  %3620 = vmatprep.mubr.msk.bf16.mxu0 %vm3855_vm3, %v4957_v42 }
 0x78e   :  { %3630 = vmatprep.subr.bf16.mxu0 %v4957_v42 }
 0x790   :  { %3615 = vmatmul.mubr.msk.bf16.vlgmr.msra.gmra.mxu1 %vm466_vm1, %v4285_v14 }
 0x791   :  { %3625 = vmatpush3.bf16.xpose.msra.mxu1 %v4312_v52  ;;  %3626 = vmatprep.mubr.msk.bf16.mxu1 %vm3855_vm3, %v4957_v42 }
 0x792   :  { %3636 = vmatprep.subr.bf16.mxu1 %v4957_v42 }
 0x794   :  { %3621 = vmatmul.mubr.msk.bf16.vlgmr.msra.gmra.mxu0 %vm466_vm1, %v4283_v55 }
 0x795   :  { %3631 = vmatpush3.bf16.xpose.msra.mxu0 %v4304_v32  ;;  %3632 = vmatprep.mubr.msk.bf16.mxu0 %vm3855_vm3, %v4957_v42 }
 0x796   :  { %3642 = vmatprep.subr.bf16.mxu0 %v4957_v42 }
 0x798   :  { %3627 = vmatmul.mubr.msk.bf16.vlgmr.msra.gmra.mxu1 %vm466_vm1, %v4285_v14 }
 0x799   :  { %3637 = vmatpush3.bf16.xpose.msra.mxu1 %v4332_v39  ;;  %3638 = vmatprep.mubr.msk.bf16.mxu1 %vm3855_vm3, %v4957_v42 }
 0x79a   :  { %3648 = vmatprep.subr.bf16.mxu1 %v4957_v42 }
 0x79c   :  { %3633 = vmatmul.mubr.msk.bf16.vlgmr.msra.gmra.mxu0 %vm466_vm1, %v4283_v55 }
 0x79d   :  { %3643 = vmatpush3.bf16.xpose.msra.mxu0 %v4324_v60  ;;  %3644 = vmatprep.mubr.msk.bf16.mxu0 %vm3855_vm3, %v4957_v42 }
 0x79e   :  { %3654 = vmatprep.subr.bf16.mxu0 %v4957_v42 }
 0x7a0   :  { %3639 = vmatmul.mubr.msk.bf16.vlgmr.msra.gmra.mxu1 %vm466_vm1, %v4285_v14 }
 0x7a1   :  { %3649 = vmatpush3.bf16.msra.mxu1 %v4341_v35  ;;  %3650 = vmatprep.mubr.msk.bf16.mxu1 %vm3855_vm3, %v4957_v42 }
 0x7a2   :  { %3660 = vmatprep.subr.bf16.mxu1 %v4957_v42 }
 0x7a4   :  { %3645 = vmatmul.mubr.msk.bf16.vlgmr.msra.gmra.mxu0 %vm466_vm1, %v4283_v55 }
 0x7a5   :  { %3655 = vmatpush3.bf16.msra.mxu0 %v4398_v11  ;;  %3656 = vmatprep.mubr.msk.bf16.mxu0 %vm3855_vm3, %v4957_v42 }
 0x7a6   :  { %3666 = vmatprep.subr.bf16.mxu0 %v4957_v42 }
 0x838   :  { %v2149_v30 = vpop.f32.mrf.mxu1 }
 0x83a   :  { %v3580_v31 = vpop.f32.mrf.mxu1 }
 0x83c   :  { %v2193_v14 = vpop.f32.mrf.mxu0  ;;  %v2152_v32 = vpop.f32.mrf.mxu1 }
 0x83e   :  { %v3586_v52 = vpop.f32.mrf.mxu0  ;;  %v3581_v60 = vpop.f32.mrf.mxu1 }
 0x840   :  { %v2196_v39 = vpop.f32.mrf.mxu0  ;;  %v2237_v35 = vpop.f32.mrf.mxu1 }
 0x841   :  { %v2238_v4 = vadd.f32 %v2237_v35, %v2149_v30 }
 0x842   :  { %v3587_v54 = vpop.f32.mrf.mxu0  ;;  %v3592_v46 = vpop.f32.mrf.mxu1 }
 0x844   :  { %v2281_v38 = vpop.f32.mrf.mxu0  ;;  %v2240_v55 = vpop.f32.mrf.mxu1 }
 0x845   :  { %v2282_v21 = vadd.f32 %v2281_v38, %v2193_v14  ;;  %v2241_v11 = vadd.f32 %v2240_v55, %v2152_v32 }
 0x846   :  { %v3598_v20 = vpop.f32.mrf.mxu0  ;;  %v3593_v1 = vpop.f32.mrf.mxu1 }
 0x848   :  { %v2284_v6 = vpop.f32.mrf.mxu0  ;;  %v2327_v0 = vpop.f32.mrf.mxu1 }
 0x849   :  { %v2285_v13 = vadd.f32 %v2284_v6, %v2196_v39  ;;  %v4671_v23 = vadd.f32 %v2327_v0, %v2238_v4 }
 0x84a   :  { %v3599_v3 = vpop.f32.mrf.mxu0  ;;  %v3604_v53 = vpop.f32.mrf.mxu1 }
 0x84c   :  { %v2371_v37 = vpop.f32.mrf.mxu0  ;;  %v2330_v40 = vpop.f32.mrf.mxu1 }
 0x84d   :  { %v4673_v5 = vadd.f32 %v2371_v37, %v2282_v21  ;;  %v4675_v7 = vadd.f32 %v2330_v40, %v2241_v11 }
 0x84e   :  { %v3610_v58 = vpop.f32.mrf.mxu0  ;;  %v3605_v16 = vpop.f32.mrf.mxu1 }
 0x850   :  { %v2374_v8 = vpop.f32.mrf.mxu0  ;;  %v4679_v34 = vpop.f32.mrf.mxu1 }
 0x851   :  { %v4677_v59 = vadd.f32 %v2374_v8, %v2285_v13  ;;  %v2661_v39 = vsel %vm466_vm1, %v4679_v34, -inf }
 0x852   :  { %v3611_v57 = vpop.f32.mrf.mxu0  ;;  %v3616_v44 = vpop.f32.mrf.mxu1 }
 0x854   :  { %v4681_v17 = vpop.f32.mrf.mxu0  ;;  %v4683_v30 = vpop.f32.mrf.mxu1 }
 0x855   :  { %v2667_v31 = vsel %vm466_vm1, %v4681_v17, -inf  ;;  %v2664_v55 = vsel %vm466_vm1, %v4683_v30, -inf }
 0x856   :  { %2668 = vmax.xlane.f32.xlu1 %v2667_v31  ;;  %v3622_v14 = vpop.f32.mrf.mxu0  ;;  %v3617_v32 = vpop.f32.mrf.mxu1 }
 0x858   :  { %v4687_v52 = vpop.f32.mrf.mxu0  ;;  %v4689_v60 = vpop.f32.mrf.mxu1 }
 0x859   :  { %v2670_v35 = vsel %vm466_vm1, %v4687_v52, -inf  ;;  %v2673_v13 = vsel %vm466_vm1, %v4689_v60, -inf }
 0x85a   :  { %2662 = vmax.xlane.f32.xlu1 %v2661_v39  ;;  %2671 = vmax.xlane.f32.xlu0 %v2670_v35  ;;  %v3623_v4 = vpop.f32.mrf.mxu0  ;;  %v3628_v54 = vpop.f32.mrf.mxu1  ;;  %v1369_v39 = vsel %vm466_vm1, %v4450_v45, 0.0  ;;  %v1387_v45 = vsel %vm466_vm1, %v4407_v15, 0.0  ;;  %v2076_v15 = vsel %vm466_vm1, %v4569_v24, 0.0  ;;  %v1403_v24 = vsel %vm466_vm1, %v4454_v48, 0.0 }
 0x85b   :  { %v1375_v4 = vsel %vm466_vm1, %v4430_v36, 0.0  ;;  %v1372_v54 = vsel %vm466_vm1, %v4442_v41, 0.0  ;;  %v2064_v36 = vsel %vm466_vm1, %v4592_v61, 0.0  ;;  %v1390_v41 = vsel %vm466_vm1, %v4410_v47, 0.0 }
 0x85c   :  { %v4695_v46 = vpop.f32.mrf.mxu0  ;;  %v4697_v38 = vpop.f32.mrf.mxu1  ;;  %v2082_v47 = vsel %vm466_vm1, %v4575_v25, 0.0  ;;  %v2079_v61 = vsel %vm466_vm1, %v4571_v63, 0.0  ;;  %v2092_v63 = vsel %vm466_vm1, %v4614_v9, 0.0  ;;  %v1406_v25 = vsel %vm466_vm1, %v4447_v43, 0.0 }
 0x85d   :  { %v2679_v21 = vsel %vm466_vm1, %v4695_v46, -inf  ;;  %v2676_v16 = vsel %vm466_vm1, %v4697_v38, -inf  ;;  %v2101_v48 = vsel %vm466_vm1, %v4617_v27, 0.0 }
 0x85e   :  { %2665 = vmax.xlane.f32.xlu0 %v2664_v55  ;;  %2680 = vmax.xlane.f32.xlu1 %v2679_v21  ;;  %v3634_v11 = vpop.f32.mrf.mxu0  ;;  %v3629_v20 = vpop.f32.mrf.mxu1  ;;  %v1381_v55 = vsel %vm466_vm1, %v4423_v26, 0.0  ;;  %v1378_v21 = vsel %vm466_vm1, %v4418_v33, 0.0  ;;  %v2070_v33 = vsel %vm466_vm1, %v4599_v22, 0.0  ;;  %v2067_v26 = vsel %vm466_vm1, %v4586_v29, 0.0 }
 0x85f   :  { %v1384_v11 = vsel %vm466_vm1, %v4426_v28, 0.0  ;;  %v2073_v28 = vsel %vm466_vm1, %v4595_v56, 0.0  ;;  %v1397_v29 = vsel %vm466_vm1, %v4472_v50, 0.0  ;;  %v2085_v22 = vsel %vm466_vm1, %v4577_v62, 0.0 }
 0x860   :  { %v4703_v1 = vpop.f32.mrf.mxu0  ;;  %v4705_v6 = vpop.f32.mrf.mxu1  ;;  %v1400_v56 = vsel %vm466_vm1, %v4466_v2, 0.0  ;;  %v2098_v50 = vsel %vm466_vm1, %v4621_v12, 0.0  ;;  %v2095_v62 = vsel %vm466_vm1, %v4608_v19, 0.0 }
 0x861   :  { %v2682_v0 = vsel %vm466_vm1, %v4703_v1, -inf  ;;  %v2689_v58 = vsel %vm466_vm1, %v4705_v6, -inf }
 0x862   :  { %2674 = vmax.xlane.f32.xlu1 %v2673_v13  ;;  %2683 = vmax.xlane.f32.xlu0 %v2682_v0  ;;  %v3635_v3 = vpop.f32.mrf.mxu0  ;;  %v3640_v53 = vpop.f32.mrf.mxu1 }
 0x864   :  { %v4711_v37 = vpop.f32.mrf.mxu0  ;;  %v4713_v40 = vpop.f32.mrf.mxu1 }
 0x865   :  { %v2692_v31 = vsel %vm466_vm1, %v4713_v40, -inf  ;;  %v2695_v14 = vsel %vm466_vm1, %v4711_v37, -inf }
 0x866   :  { %2690 = vmax.xlane.f32.xlu1 %v2689_v58  ;;  %2677 = vmax.xlane.f32.xlu0 %v2676_v16  ;;  %v3646_v8 = vpop.f32.mrf.mxu0  ;;  %v3641_v57 = vpop.f32.mrf.mxu1 }
 0x868   :  { %v4719_v44 = vpop.f32.mrf.mxu0 }
 0x869   :  { %v2698_v35 = vsel %vm466_vm1, %v4719_v44, -inf }
 0x86a   :  { %2693 = vmax.xlane.f32.xlu0 %v2692_v31  ;;  %2696 = vmax.xlane.f32.xlu1 %v2695_v14  ;;  %v3647_v32 = vpop.f32.mrf.mxu0 }
 0x86e   :  { %1370 = vadd.xlane.f32.xlu1 %v1369_v39  ;;  %2699 = vmax.xlane.f32.xlu0 %v2698_v35 }
 0x872   :  { %1376 = vadd.xlane.f32.xlu1 %v1375_v4  ;;  %1373 = vadd.xlane.f32.xlu0 %v1372_v54 }
 0x876   :  { %1382 = vadd.xlane.f32.xlu1 %v1381_v55  ;;  %1379 = vadd.xlane.f32.xlu0 %v1378_v21 }
 0x87a   :  { %1388 = vadd.xlane.f32.xlu1 %v1387_v45  ;;  %1385 = vadd.xlane.f32.xlu0 %v1384_v11 }
 0x87e   :  { %2065 = vadd.xlane.f32.xlu1 %v2064_v36  ;;  %1391 = vadd.xlane.f32.xlu0 %v1390_v41 }
 0x882   :  { %2071 = vadd.xlane.f32.xlu1 %v2070_v33  ;;  %2068 = vadd.xlane.f32.xlu0 %v2067_v26 }
 0x886   :  { %2077 = vadd.xlane.f32.xlu1 %v2076_v15  ;;  %2074 = vadd.xlane.f32.xlu0 %v2073_v28 }
 0x88a   :  { %2083 = vadd.xlane.f32.xlu1 %v2082_v47  ;;  %2080 = vadd.xlane.f32.xlu0 %v2079_v61 }
 0x88e   :  { %1398 = vadd.xlane.f32.xlu1 %v1397_v29  ;;  %2086 = vadd.xlane.f32.xlu0 %v2085_v22 }
 0x892   :  { %1404 = vadd.xlane.f32.xlu1 %v1403_v24  ;;  %1401 = vadd.xlane.f32.xlu0 %v1400_v56 }
 0x896   :  { %2093 = vadd.xlane.f32.xlu1 %v2092_v63  ;;  %1407 = vadd.xlane.f32.xlu0 %v1406_v25 }
 0x89a   :  { %2099 = vadd.xlane.f32.xlu1 %v2098_v50  ;;  %2096 = vadd.xlane.f32.xlu0 %v2095_v62 }
 0x89e   :  { %2102 = vadd.xlane.f32.xlu0 %v2101_v48 }
 0x8df   :  { %v2669_v2 = vpop.xlane.xlu1 %2668 }
 0x8e3   :  { %v2663_v20 = vpop.xlane.xlu1 %2662  ;;  %v2672_v9 = vpop.xlane.xlu0 %2671 }
 0x8e7   :  { %v2666_v13 = vpop.xlane.xlu0 %2665  ;;  %v2681_v0 = vpop.xlane.xlu1 %2680 }
 0x8e8   :  { %v2687_v57 = vmax.f32 %v2669_v2, %v2681_v0 }
 0x8eb   :  { %v2675_v43 = vpop.xlane.xlu1 %2674  ;;  %v2684_v3 = vpop.xlane.xlu0 %2683 }
 0x8ec   :  { %v2685_v53 = vmax.f32 %v2663_v20, %v2675_v43  ;;  %v2688_v54 = vmax.f32 %v2672_v9, %v2684_v3 }
 0x8ef   :  { %v2691_v58 = vpop.xlane.xlu1 %2690  ;;  %v2678_v16 = vpop.xlane.xlu0 %2677 }
 0x8f0   :  { %v2701_v12 = vmax.f32 %v2685_v53, %v2691_v58  ;;  %v2686_v19 = vmax.f32 %v2666_v13, %v2678_v16 }
 0x8f2   :  { %v2717_v8 = vsub.f32 %v4689_v60, %v2701_v12  ;;  %v2705_v33 = vsub.f32 %v4679_v34, %v2701_v12 }
 0x8f3   :  { %v2694_v31 = vpop.xlane.xlu0 %2693  ;;  %v2697_v14 = vpop.xlane.xlu1 %2696 }
 0x8f4   :  { %v2702_v32 = vmax.f32 %v2686_v19, %v2694_v31  ;;  %v2703_v27 = vmax.f32 %v2687_v57, %v2697_v14  ;;  %v2721_v39 = vmul.f32 1.442695, %v2717_v8  ;;  %v2709_v61 = vmul.f32 1.442695, %v2705_v33 }
 0x8f6   :  { %v2706_v35 = vsub.f32 %v4683_v30, %v2702_v32  ;;  %v2718_v4 = vsub.f32 %v4697_v38, %v2702_v32  ;;  %v2707_v55 = vsub.f32 %v4681_v17, %v2703_v27  ;;  %v2719_v21 = vsub.f32 %v4695_v46, %v2703_v27 }
 0x8f7   :  { %v4780_v45 = vpop.xlane.xlu1 %1370  ;;  %v2700_v11 = vpop.xlane.xlu0 %2699  ;;  %3766 = vpow2.f32 %v2721_v39  ;;  %v2730_v22 = vsub.f32 %v4713_v40, %v2702_v32  ;;  %v2731_v63 = vsub.f32 %v4711_v37, %v2703_v27 }
 0x8f8   :  { %v2723_v60 = vmul.f32 1.442695, %v2718_v4  ;;  %v2713_v36 = vmul.f32 1.442695, %v2707_v55  ;;  %v2704_v41 = vmax.f32 %v2688_v54, %v2700_v11  ;;  %v2711_v26 = vmul.f32 1.442695, %v2706_v35 }
 0x8f9   :  { %v2725_v15 = vmul.f32 1.442695, %v2719_v21  ;;  %v2735_v56 = vmul.f32 1.442695, %v2730_v22 }
 0x8fa   :  { %3768 = vpow2.f32 %v2723_v60  ;;  %v2708_v30 = vsub.f32 %v4687_v52, %v2704_v41  ;;  %v2720_v38 = vsub.f32 %v4703_v1, %v2704_v41  ;;  %v2729_v52 = vsub.f32 %v4705_v6, %v2701_v12 }
 0x8fb   :  { %v4785_v28 = vpop.xlane.xlu1 %1376  ;;  %v4787_v17 = vpop.xlane.xlu0 %1373  ;;  %3770 = vpow2.f32 %v2713_v36  ;;  %v2732_v62 = vsub.f32 %v4719_v44, %v2704_v41  ;;  %v2737_v6 = vmul.f32 1.442695, %v2731_v63 }
 0x8fc   :  { %v2715_v46 = vmul.f32 1.442695, %v2708_v30  ;;  %v2727_v47 = vmul.f32 1.442695, %v2720_v38  ;;  %3772 = vpow2.f32 %v2711_v26  ;;  %v2733_v50 = vmul.f32 1.442695, %v2729_v52 }
 0x8fd   :  { %3774 = vpow2.f32 %v2725_v15  ;;  %v2739_v0 = vmul.f32 1.442695, %v2732_v62 }
 0x8fe   :  { %3776 = vpow2.f32 %v2715_v46 }
 0x8ff   :  { %v1383_v29 = vpop.xlane.xlu1 %1382  ;;  %v4789_v34 = vpop.xlane.xlu0 %1379  ;;  %3778 = vpow2.f32 %v2727_v47 }
 0x900   :  { %3780 = vpow2.f32 %v2709_v61  ;;  %v1393_v35 = vadd.f32 %v1383_v29, %v4780_v45 }
 0x901   :  { %3782 = vpow2.f32 %v2735_v56 }
 0x902   :  { %3784 = vpow2.f32 %v2733_v50 }
 0x903   :  { %v4793_v1 = vpop.xlane.xlu1 %1388  ;;  %v4795_v24 = vpop.xlane.xlu0 %1385  ;;  %3786 = vpow2.f32 %v2737_v6 }
 0x904   :  { %v3767_v25 = vpop.eup %3766  ;;  %3788 = vpow2.f32 %v2739_v0  ;;  %v1394_v41 = vadd.f32 %v4795_v24, %v4787_v17  ;;  %v1395_v26 = vadd.f32 %v4793_v1, %v4785_v28 }
 0x905   :  { %v2753_v54 = vsel %vm466_vm1, %v3767_v25, 0.0 }
 0x907   :  { %v4799_v48 = vpop.xlane.xlu1 %2065  ;;  %v4801_v2 = vpop.xlane.xlu0 %1391 }
 0x908   :  { %v3769_v40 = vpop.eup %3768  ;;  %v1396_v28 = vadd.f32 %v4801_v2, %v4789_v34 }
 0x909   :  { %v2787_v20 = vpack.c.bf16 %v3769_v40, %v3767_v25  ;;  %v3771_v9 = vpop.eup %3770  ;;  %v2756_v45 = vsel %vm466_vm1, %v3769_v40, 0.0 }
 0x90a   :  { %v3773_v13 = vpop.eup %3772  ;;  %v2747_v43 = vsel %vm466_vm1, %v3771_v9, 0.0 }
 0x90b   :  { %3651 = vmatmul.mubr.msk.bf16.vlgmr.msra.gmra.mxu1 %vm466_vm1, %v2787_v20  ;;  %v4805_v37 = vpop.xlane.xlu1 %2071  ;;  %v4807_v3 = vpop.xlane.xlu0 %2068  ;;  %2748 = vadd.xlane.f32.xlu1 %v2747_v43  ;;  %v2744_v4 = vsel %vm466_vm1, %v3773_v13, 0.0 }
 0x90c   :  { %v3775_v44 = vpop.eup %3774  ;;  %3661 = vmatpush3.bf16.msra.mxu1 %v4405_v10  ;;  %3662 = vmatprep.mubr.msk.bf16.mxu1 %vm3855_vm3, %v4957_v42 }
 0x90d   :  { %v3777_v53 = vpop.eup %3776  ;;  %3672 = vmatprep.subr.bf16.mxu1 %v4957_v42  ;;  %v2759_v12 = vsel %vm466_vm1, %v3775_v44, 0.0 }
 0x90e   :  { %v3779_v58 = vpop.eup %3778  ;;  %v2750_v16 = vsel %vm466_vm1, %v3777_v53, 0.0  ;;  %v2786_v55 = vpack.c.bf16 %v3777_v53, %v3771_v9 }
 0x90f   :  { %2751 = vadd.xlane.f32.xlu0 %v2750_v16  ;;  %v2788_v8 = vpack.c.bf16 %v3779_v58, %v3775_v44  ;;  %v2078_v19 = vpop.xlane.xlu1 %2077  ;;  %v4815_v57 = vpop.xlane.xlu0 %2074  ;;  %2760 = vadd.xlane.f32.xlu1 %v2759_v12  ;;  %v2762_v14 = vsel %vm466_vm1, %v3779_v58, 0.0  ;;  %v4960_v12 = vld [vmem:[#allocation9_spill] sm:$0xff] }
 0x910   :  { %v3781_v31 = vpop.eup %3780  ;;  %v2088_v47 = vadd.f32 %v2078_v19, %v4799_v48  ;;  %v4961_v19 = vld [vmem:[#allocation10_spill] sm:$0xff] }
 0x911   :  { %3657 = vmatmul.mubr.msk.bf16.vlgmr.msra.gmra.mxu0 %vm466_vm1, %v2788_v8  ;;  %v2785_v10 = vpack.c.bf16 %v3773_v13, %v3781_v31  ;;  %v2741_v32 = vsel %vm466_vm1, %v3781_v31, 0.0  ;;  %v4958_v13 = vld [vmem:[#allocation15_spill] sm:$0xff]  ;;  %v4962_v31 = vld [vmem:[#allocation13_spill] sm:$0xff] }
 0x912   :  { %3667 = vmatpush3.bf16.msra.mxu0 %v4415_v51  ;;  %3668 = vmatprep.mubr.msk.bf16.mxu0 %vm3855_vm3, %v4957_v42  ;;  %v3783_v51 = vpop.eup %3782 }
 0x913   :  { %2763 = vadd.xlane.f32.xlu0 %v2762_v14  ;;  %3663 = vmatmul.mubr.msk.bf16.vlgmr.msra.gmra.mxu1 %vm466_vm1, %v2785_v10  ;;  %v2084_v27 = vpop.xlane.xlu1 %2083  ;;  %v2081_v39 = vpop.xlane.xlu0 %2080  ;;  %v2772_v61 = vsel %vm466_vm1, %v3783_v51, 0.0 }
 0x914   :  { %2742 = vadd.xlane.f32.xlu1 %v2741_v32  ;;  %3673 = vmatpush3.bf16.msra.mxu1 %v4456_v49  ;;  %v3785_v60 = vpop.eup %3784  ;;  %v2090_v63 = vadd.f32 %v2084_v27, %v4805_v37  ;;  %v2089_v25 = vadd.f32 %v2081_v39, %v4807_v3  ;;  %v4959_v37 = vld [vmem:[#allocation16_spill] sm:$0xff] }
 0x915   :  { %3678 = vmatprep.subr.bf16.mxu0 %v4957_v42  ;;  %3674 = vmatprep.mubr.msk.bf16.mxu1 %vm3855_vm3, %v4957_v42  ;;  %v2965_v36 = vpack.c.bf16 %v3783_v51, %v3785_v60  ;;  %v3787_v33 = vpop.eup %3786  ;;  %v2769_v15 = vsel %vm466_vm1, %v3785_v60, 0.0 }
 0x916   :  { %3684 = vmatprep.subr.mxu1 %v4957_v42  ;;  %v3789_v17 = vpop.eup %3788  ;;  %v2775_v29 = vsel %vm466_vm1, %v3787_v33, 0.0 }
 0x917   :  { %2745 = vadd.xlane.f32.xlu0 %v2744_v4  ;;  %v1399_v21 = vpop.xlane.xlu1 %1398  ;;  %v2087_v11 = vpop.xlane.xlu0 %2086  ;;  %v2966_v22 = vpack.c.bf16 %v3789_v17, %v3787_v33  ;;  %v2778_v34 = vsel %vm466_vm1, %v3789_v17, 0.0  ;;  %v3126_v33 = vld [vmem:[%s4927_s15] sm:$0xff] }
 0x918   :  { %2754 = vadd.xlane.f32.xlu1 %v2753_v54  ;;  %v1409_v49 = vadd.f32 %v1399_v21, %v1393_v35  ;;  %v2091_v40 = vadd.f32 %v2087_v11, %v4815_v57 }
 0x919   :  { %3669 = vmatmul.mubr.msk.bf16.vlgmr.msra.gmra.mxu0 %vm466_vm1, %v2786_v55 }
 0x91a   :  { %3679 = vmatpush3.bf16.msra.mxu0 %v4438_v18  ;;  %3790 = vrcp.f32 %v1409_v49  ;;  %3680 = vmatprep.mubr.msk.bf16.mxu0 %vm3855_vm3, %v4957_v42 }
 0x91b   :  { %2757 = vadd.xlane.f32.xlu0 %v2756_v45  ;;  %3675 = vmatmul.mubr.msk.bf16.vlgmr.msra.gmra.mxu1 %vm466_vm1, %v2965_v36  ;;  %v1405_v30 = vpop.xlane.xlu1 %1404  ;;  %v1402_v38 = vpop.xlane.xlu0 %1401  ;;  %v3127_v45 = vld [vmem:[%s4927_s15 + $0x8] sm:$0xff]  ;;  %s2407_s15 = sadd.f32 %s4204_s3, %s4199_s8 }
 0x91c   :  { %2770 = vadd.xlane.f32.xlu1 %v2769_v15  ;;  %v1410_v18 = vadd.f32 %v1402_v38, %v1394_v41  ;;  %3688 = vmatprep.mubr.msk.f32.mxu1 %vm3855_vm3, %v4957_v42  ;;  %v1411_v46 = vadd.f32 %v1405_v30, %v1395_v26 }
 0x91d   :  { %3685 = vmatpush3.msra.mxu1 %v3127_v45  ;;  %s3084_s5 = sadd.f32 %s4230_s29, %s2407_s15 }
 0x91e   :  { %3792 = vrcp.f32 %v1410_v18  ;;  %3686 = vmatprep.subr.mxu1 %v4957_v42 }
 0x91f   :  { %2773 = vadd.xlane.f32.xlu0 %v2772_v61  ;;  %v2094_v52 = vpop.xlane.xlu1 %2093  ;;  %v1408_v1 = vpop.xlane.xlu0 %1407  ;;  %3794 = vrcp.f32 %v1411_v46  ;;  %3687 = vmatpush3.msra.mxu1 %v3126_v33 }
 0x920   :  { %2776 = vadd.xlane.f32.xlu1 %v2775_v29  ;;  %v2104_v24 = vadd.f32 %v2094_v52, %v2088_v47  ;;  %v1412_v56 = vadd.f32 %v1408_v1, %v1396_v28 }
 0x921   :  { %3681 = vmatmul.mubr.msk.bf16.vlgmr.msra.gmra.mxu0 %vm466_vm1, %v2966_v22 }
 0x922   :  { %3796 = vrcp.f32 %v2104_v24 }
 0x923   :  { %2779 = vadd.xlane.f32.xlu0 %v2778_v34  ;;  %v2100_v50 = vpop.xlane.xlu1 %2099  ;;  %v2097_v62 = vpop.xlane.xlu0 %2096  ;;  %3798 = vrcp.f32 %v1412_v56 }
 0x924   :  { %v2106_v48 = vadd.f32 %v2100_v50, %v2090_v63  ;;  %v2105_v2 = vadd.f32 %v2097_v62, %v2089_v25 }
 0x926   :  { %3800 = vrcp.f32 %v2106_v48 }
 0x927   :  { %v3791_v20 = vpop.eup %3790  ;;  %3802 = vrcp.f32 %v2105_v2  ;;  %v2103_v9 = vpop.xlane.xlu0 %2102 }
 0x928   :  { %v2107_v6 = vadd.f32 %v2103_v9, %v2091_v40  ;;  %v1706_v0 = vmul.f32 %v3791_v20, %v4958_v13 }
 0x92a   :  { %3804 = vrcp.f32 %v2107_v6  ;;  %v1714_v8 = vmul.f32 %v4960_v12, %v1706_v0 }
 0x92b   :  { %v3793_v43 = vpop.eup %3792 }
 0x92c   :  { %v1708_v3 = vmul.f32 %v3793_v43, %v4959_v37  ;;  %v3795_v44 = vpop.eup %3794 }
 0x92d   :  { %v1710_v10 = vmul.f32 %v3795_v44, %v4962_v31 }
 0x92e   :  { %v1715_v21 = vmul.f32 %v4960_v12, %v1708_v3 }
 0x92f   :  { %v3797_v53 = vpop.eup %3796  ;;  %v1716_v35 = vmul.f32 %v4960_v12, %v1710_v10 }
 0x930   :  { %v2383_v58 = vmul.f32 %v3797_v53, %v4671_v23  ;;  %v3799_v16 = vpop.eup %3798  ;;  %v4963_v23 = vld [vmem:[#allocation14_spill] sm:$0xff] }
 0x931   :  { %v1712_v54 = vmul.f32 %v3799_v16, %v4963_v23 }
 0x932   :  { %v2391_v57 = vmul.f32 %v4961_v19, %v2383_v58 }
 0x933   :  { %v3801_v14 = vpop.eup %3800 }
 0x934   :  { %v3803_v32 = vpop.eup %3802  ;;  %v4861_v27 = vadd.f32 %v2391_v57, %v1714_v8  ;;  %v2387_v39 = vmul.f32 %v3801_v14, %v4673_v5  ;;  %v1717_v5 = vmul.f32 %v4960_v12, %v1712_v54 }
 0x935   :  { %v2385_v51 = vmul.f32 %v3803_v32, %v4675_v7  ;;  %v4964_v32 = vld [vmem:[#allocation11_spill] sm:$0xff] }
 0x936   :  { %v2393_v4 = vmul.f32 %v4961_v19, %v2387_v39 }
 0x937   :  { %v3805_v55 = vpop.eup %3804  ;;  %v2392_v11 = vmul.f32 %v4961_v19, %v2385_v51 }
 0x938   :  { %v4870_v60 = vadd.f32 %v2393_v4, %v1716_v35  ;;  %v2389_v49 = vmul.f32 %v3805_v55, %v4677_v59 }
 0x939   :  { %v4873_v36 = vadd.f32 %v2392_v11, %v1715_v21 }
 0x93a   :  { %v2394_v7 = vmul.f32 %v4961_v19, %v2389_v49 }
 0x93c   :  { %v4877_v41 = vadd.f32 %v2394_v7, %v1717_v5 }
 0x994   :  { %v2749_v59 = vpop.xlane.xlu1 %2748 }
 0x998   :  { %v2752_v26 = vpop.xlane.xlu0 %2751  ;;  %v2761_v15 = vpop.xlane.xlu1 %2760 }
 0x999   :  { %v2767_v63 = vadd.f32 %v2761_v15, %v2749_v59 }
 0x99c   :  { %v2764_v30 = vpop.xlane.xlu0 %2763 }
 0x99d   :  { %v2743_v38 = vpop.xlane.xlu1 %2742  ;;  %v2768_v40 = vadd.f32 %v2764_v30, %v2752_v26 }
 0x9a0   :  { %v2746_v17 = vpop.xlane.xlu0 %2745 }
 0x9a1   :  { %v2755_v18 = vpop.xlane.xlu1 %2754 }
 0x9a2   :  { %v2765_v61 = vadd.f32 %v2755_v18, %v2743_v38 }
 0x9a4   :  { %v2758_v46 = vpop.xlane.xlu0 %2757 }
 0x9a5   :  { %v2771_v47 = vpop.xlane.xlu1 %2770  ;;  %v2766_v1 = vadd.f32 %v2758_v46, %v2746_v17 }
 0x9a6   :  { %v2781_v29 = vadd.f32 %v2771_v47, %v2765_v61 }
 0x9a8   :  { %v2774_v22 = vpop.xlane.xlu0 %2773  ;;  %3806 = vrcp.f32 %v2781_v29 }
 0x9a9   :  { %v2777_v24 = vpop.xlane.xlu1 %2776  ;;  %v2782_v42 = vadd.f32 %v2774_v22, %v2766_v1 }
 0x9aa   :  { %v2783_v50 = vadd.f32 %v2777_v24, %v2767_v63 }
 0x9ab   :  { %3808 = vrcp.f32 %v2782_v42 }
 0x9ac   :  { %v2780_v62 = vpop.xlane.xlu0 %2779  ;;  %3810 = vrcp.f32 %v2783_v50 }
 0x9ad   :  { %v2784_v6 = vadd.f32 %v2780_v62, %v2768_v40 }
 0x9af   :  { %3812 = vrcp.f32 %v2784_v6 }
 0x9b5   :  { %v3807_v16 = vpop.eup %3806 }
 0x9b8   :  { %v3809_v35 = vpop.eup %3808 }
 0x9b9   :  { %v3811_v21 = vpop.eup %3810 }
 0x9bc   :  { %v3813_v30 = vpop.eup %3812 }
 0x9cb   :  { %v2826_v28 = vpop.f32.mrf.mxu1 }
 0x9cd   :  { %v3652_v52 = vpop.f32.mrf.mxu1 }
 0x9cf   :  { %v2829_v56 = vpop.f32.mrf.mxu1 }
 0x9d1   :  { %v2870_v25 = vpop.f32.mrf.mxu0  ;;  %v3653_v34 = vpop.f32.mrf.mxu1 }
 0x9d3   :  { %v3658_v48 = vpop.f32.mrf.mxu0  ;;  %v2914_v2 = vpop.f32.mrf.mxu1 }
 0x9d4   :  { %v2915_v3 = vadd.f32 %v2914_v2, %v2826_v28 }
 0x9d5   :  { %v2873_v20 = vpop.f32.mrf.mxu0  ;;  %v3664_v9 = vpop.f32.mrf.mxu1 }
 0x9d6   :  { %v3129_v9 = vstv %s3084_s5 }
 0x9d7   :  { %v3659_v13 = vpop.f32.mrf.mxu0  ;;  %v2917_v0 = vpop.f32.mrf.mxu1 }
 0x9d8   :  { %v2918_v19 = vadd.f32 %v2917_v0, %v2829_v56  ;;  %v4965_v13 = vld [vmem:[#allocation8_spill] sm:$0xff] }
 0x9d9   :  { %v2958_v43 = vpop.f32.mrf.mxu0  ;;  %v3665_v37 = vpop.f32.mrf.mxu1  ;;  %v4966_v0 = vsub.s32 0, %v4965_v13 }
 0x9da   :  { %v2959_v14 = vadd.f32 %v2958_v43, %v2870_v25 }
 0x9db   :  { %v3670_v44 = vpop.f32.mrf.mxu0  ;;  %v3004_v53 = vpop.f32.mrf.mxu1 }
 0x9dc   :  { %v3055_v58 = vadd.f32 %v3004_v53, %v2915_v3  ;;  %v4967_v53 = vld [vmem:[#allocation12_spill] sm:$0xff] }
 0x9dd   :  { %v2961_v12 = vpop.f32.mrf.mxu0  ;;  %v3676_v8 = vpop.f32.mrf.mxu1 }
 0x9de   :  { %v3060_v57 = vmul.f32 %v3807_v16, %v3055_v58  ;;  %v2962_v49 = vadd.f32 %v2961_v12, %v2873_v20  ;;  %v3128_v20 = vld [vmem:[%s4928_s16] sm:$0x1] }
 0x9df   :  { %v3671_v31 = vpop.f32.mrf.mxu0  ;;  %v3007_v10 = vpop.f32.mrf.mxu1  ;;  %v3130_v6 = vmul.f32 %v3129_v9, %v3128_v20 }
 0x9e0   :  { %v3068_v39 = vmul.f32 %v4964_v32, %v3060_v57  ;;  %v3056_v51 = vadd.f32 %v3007_v10, %v2918_v19 }
 0x9e1   :  { %v3048_v4 = vpop.f32.mrf.mxu0  ;;  %v3677_v23 = vpop.f32.mrf.mxu1  ;;  %v3135_v43 = vrot.slane %v3130_v6, %v4966_v0 }
 0x9e2   :  { %v3062_v54 = vmul.f32 %v3809_v35, %v3056_v51  ;;  %v3057_v55 = vadd.f32 %v3048_v4, %v2959_v14  ;;  %v3072_v5 = vadd.f32 %v3068_v39, %v4861_v27 }
 0x9e3   :  { %v3682_v11 = vpop.f32.mrf.mxu0 }
 0x9e4   :  { %v3069_v7 = vmul.f32 %v4964_v32, %v3062_v54  ;;  %v3064_v45 = vmul.f32 %v3811_v21, %v3057_v55  ;;  %v3085_v17 = vsel %vm466_vm1, %v3072_v5, 0.0 }
 0x9e5   :  { %v3051_v33 = vpop.f32.mrf.mxu0 }
 0x9e6   :  { %v3073_v59 = vadd.f32 %v3069_v7, %v4873_v36  ;;  %v3070_v26 = vmul.f32 %v4964_v32, %v3064_v45  ;;  %v3058_v15 = vadd.f32 %v3051_v33, %v2962_v49 }
 0x9e7   :  { %v3683_v38 = vpop.f32.mrf.mxu0 }
 0x9e8   :  { %v3086_v18 = vsel %vm466_vm1, %v3073_v59, 0.0  ;;  %v3066_v46 = vmul.f32 %v3813_v30, %v3058_v15  ;;  %v3074_v61 = vadd.f32 %v3070_v26, %v4870_v60 }
 0x9e9   :  { %v3087_v47 = vadd.f32 %v3086_v18, %v3085_v17 }
 0x9ea   :  { %v3071_v27 = vmul.f32 %v4964_v32, %v3066_v46  ;;  %v3094_v36 = vsel %vm466_vm1, %v3074_v61, 0.0 }
 0x9eb   :  { %v3088_v28 = vrot.slane %v3087_v47, 4 }
 0x9ec   :  { %v3075_v29 = vadd.f32 %v3071_v27, %v4877_v41 }
 0x9ed   :  { %v3089_v22 = vadd.f32 %v3088_v28, %v3087_v47 }
 0x9ee   :  { %v3095_v52 = vsel %vm466_vm1, %v3075_v29, 0.0 }
 0x9ef   :  { %v3090_v1 = vrot.slane %v3089_v22, 2  ;;  %v3096_v24 = vadd.f32 %v3095_v52, %v3094_v36 }
 0x9f1   :  { %v3097_v56 = vrot.slane %v3096_v24, 4  ;;  %v3091_v63 = vadd.f32 %v3090_v1, %v3089_v22 }
 0x9f3   :  { %v3098_v42 = vadd.f32 %v3097_v56, %v3096_v24  ;;  %v3092_v60 = vrot.slane %v3091_v63, 1 }
 0x9f5   :  { %v3099_v25 = vrot.slane %v3098_v42, 2  ;;  %v3093_v50 = vadd.f32 %v3092_v60, %v3091_v63 }
 0x9f7   :  { %v3100_v34 = vadd.f32 %v3099_v25, %v3098_v42  ;;  %v3104_v41 = vmul.f32 0.0625, %v3093_v50 }
 0x9f9   :  { %v3101_v62 = vrot.slane %v3100_v34, 1 }
 0x9fb   :  { %v3102_v48 = vadd.f32 %v3101_v62, %v3100_v34 }
 0x9fd   :  { %v3105_v2 = vmul.f32 0.0625, %v3102_v48 }
 0x9ff   :  { %v3140_v40 = vsel %vm3139_vm2, %v3105_v2, %v3104_v41 }
 0xa00   :  { %3689 = vmatmul.mubr.msk.f32.vlgmr.msra.gmra.mxu1 %vm466_vm1, %v3140_v40 }
 0xac0   :  { %v3209_v37 = vpop.f32.mrf.mxu1 }
 0xac1   :  { %v3210_v3 = vadd.f32 %v3209_v37, %v3135_v43 }
 0xac2   :  { %v3690_v44 = vpop.f32.mrf.mxu1 }
 0xac3   :  { %v3217_v58 = vadd.f32 %v4967_v53, %v3210_v3 }
 0xac5   :  { %3219 = vst.msk [vmem:[#allocation5] sm:$0x3] %vm3218_vm4, %v3217_v58 }
 0xac6   :  { %3837 = shalt.err (!%p3834_p9)
}
 0xac7   :  { %3229 = dma.vmem_to_hbm [thread:$0]  %s3227_s22, 32, %s4930_s18, [#allocation3]  }
 0xac8   :  { %3848 = dma.done.wait [#allocation3], 32  }
 0xac9   :  { %3849 = vsyncadd [#allocation3], 4294967264 }
 0xaca   :  { %3233 = vsyncpa [#allocation3], 1 }
 0xacb   :  { %3234 = vsyncpa [#allocation4], 1 }

</bundles_post_ra>
